<compile_context>
chip_gen: v6e
topology: v6e:2x2x1
jax: 0.10.0
libtpu: 0.0.40
codegen_flags: <defaults>
</compile_context>

<pallas_src>
import math
import numpy as np
import jax
import jax.numpy as jnp
from jax import lax
from jax.experimental import pallas as pl
from jax.experimental.pallas import tpu as pltpu

N_DIM = 3                      # Euclidean basis vectors -> 2**3 = 8 blades
M_BLADES = 2 ** N_DIM          # binary (bitmask) blade ordering: index == bitmask
N_GRADES = N_DIM + 1
IN_FEATURES = 16               # number of points / input multivector channels
HIDDEN = 32
OUT_FEATURES = 1
NUM_GP_LAYERS = 4
BATCH = 2
INV_SQRT2 = 1.0 / math.sqrt(2.0)
EPS = 1e-16
MC = M_BLADES * IN_FEATURES    # 128  (flattened input width, lane axis)
MH = M_BLADES * HIDDEN         # 256  (flattened hidden width, lane axis)


# ---------------------------------------------------------------------------
# Clifford algebra tables for Cl(3,0,0) in binary blade order (host-side numpy).
# The forward output (per-channel multivector norms) is blade-order independent.
# ---------------------------------------------------------------------------
def _reorder_sign(a, b):
    a >>= 1
    s = 0
    while a:
        s += bin(a & b).count("1")
        a >>= 1
    return 1.0 if s % 2 == 0 else -1.0


GRADES_NP = np.array([bin(m).count("1") for m in range(M_BLADES)], np.int32)
SIGN_NP = np.array([[_reorder_sign(i, k) for k in range(M_BLADES)]
                    for i in range(M_BLADES)], np.float32)
CAYLEY_NP = np.zeros((M_BLADES,) * 3, np.float32)
for _i in range(M_BLADES):
    for _k in range(M_BLADES):
        CAYLEY_NP[_i, _i ^ _k, _k] = SIGN_NP[_i, _k]      # e_i e_k = sign * e_{i^k}


# ---------------------------------------------------------------------------
# Pallas kernel
# ---------------------------------------------------------------------------
def _xor_swap(x, s):
    """y[..., p] = x[..., p ^ s]  for a power-of-two lane block size s (swap
    adjacent s-lane blocks).  Static slices + concat -> lowers cleanly."""
    w = x.shape[-1]
    blocks = [x[..., b * s:(b + 1) * s] for b in range(w // s)]
    out = []
    for b in range(0, len(blocks), 2):
        out.append(blocks[b + 1])
        out.append(blocks[b])
    return jnp.concatenate(out, axis=-1)


def hull_glgmlp_kernel(x_ref, prod_ref, w_lin_ref, b_lin_ref, w_left_ref,
                       b_left_ref, w_right_ref, s_norm_ref, wk_ref, gsum_ref,
                       csum_ref, w1_ref, b1_ref, w2_ref, b2_ref, loss_ref):
    H = HIDDEN
    f32 = jnp.float32

    x = x_ref[...]                                                   # (BB, M*C)

    # QTLinear: block-diagonal per-blade channel mixing -> one MXU matmul.
    h = jnp.dot(x, w_lin_ref[...], preferred_element_type=f32) + b_lin_ref[...]

    gsum = gsum_ref[...]                                             # (MH, MH)

    for l in range(NUM_GP_LAYERS):                                   # static unroll
        left = jnp.dot(h, w_left_ref[l], preferred_element_type=f32) + b_left_ref[l]
        right = jnp.dot(h, w_right_ref[l], preferred_element_type=f32)

        # grade-wise smooth normalization; per-grade sums broadcast back to
        # every blade via one MXU matmul with the 0/1 same-grade matrix.
        sq = right * right
        q = jnp.dot(sq, gsum, preferred_element_type=f32)            # (BB, MH)
        nrm = jnp.sqrt(jnp.sqrt(q * q + EPS))
        div = s_norm_ref[l] * (nrm - 1.0) + 1.0                      # sigmoid hoisted
        rn = right / div

        # weighted geometric product (Cayley-sparse):
        #   gp[b, (i^k)*H + f] += h[b, i*H + f] * wk[l, i, k*H + f] * rn[b, k*H + f]
        # The 8 XOR-translate scatters are fused with a 3-level lane butterfly.
        wk_l = wk_ref[l]                                             # (M, M*H)
        c = []
        for i in range(M_BLADES):
            h_i = h[:, i * H:(i + 1) * H]                            # (BB, H)
            h_t = jnp.concatenate([h_i] * M_BLADES, axis=-1)         # (BB, M*H)
            c.append(h_t * wk_l[i:i + 1, :] * rn)
        d = [c[2 * m] + _xor_swap(c[2 * m + 1], H) for m in range(4)]
        e = [d[2 * p] + _xor_swap(d[2 * p + 1], 2 * H) for p in range(2)]
        gp = e[0] + _xor_swap(e[1], 4 * H)

        h = (left + gp) * INV_SQRT2

    # per-channel multivector norm over all blades: one (MH, H) sum matmul.
    ysq = jnp.dot(h * h, csum_ref[...], preferred_element_type=f32)  # (BB, H)
    y = jnp.sqrt(ysq)

    # mlp: Linear -> SiLU -> Linear(H, 1)
    z = jnp.dot(y, w1_ref[...], preferred_element_type=f32) + b1_ref[...]
    z = z * jax.nn.sigmoid(z)                                        # SiLU
    # out (1, BB): contract channels of z against the (1, H) output weight row
    out = lax.dot_general(w2_ref[...], z, (((1,), (1,)), ((), ())),
                          preferred_element_type=f32) + b2_ref[...]

    diff = out - prod_ref[0]                                         # (1, BB)
    loss_ref[0] = diff * diff                                        # lane-dense store


# ---------------------------------------------------------------------------
# Parameter init (grade-level, CGENN-style) + packing into kernel layout
# ---------------------------------------------------------------------------
def _block_diag(w):
    """(M, a, b) per-blade mixing blocks -> (M*a, M*b) block-diagonal matrix."""
    w = np.asarray(w)
    m, a, b = w.shape
    out = np.zeros((m * a, m * b), np.float32)
    for i in range(m):
        out[i * a:(i + 1) * a, i * b:(i + 1) * b] = w[i]
    return jnp.asarray(out)


def pack_kernel_params(p):
    L, H, Mb = NUM_GP_LAYERS, HIDDEN, M_BLADES

    w_lin = _block_diag(p["w_lin"])                                  # (M*C, M*H)
    b_lin = jnp.reshape(p["b_lin"], (1, Mb * H))
    w_left = jnp.stack([_block_diag(p["w_left"][l]) for l in range(L)])   # (L, MH, MH)
    w_right = jnp.stack([_block_diag(p["w_right"][l]) for l in range(L)])
    b_left = jnp.reshape(p["b_left"], (L, 1, Mb * H))

    # sigmoid gate hoisted out of the kernel, expanded per blade.
    s_norm = jnp.reshape(jax.nn.sigmoid(p["a_norm"])[:, GRADES_NP, :], (L, 1, Mb * H))

    # compact geometric-product weights: for each (i, k) only j = i^k is nonzero
    ar = np.arange(Mb)
    wk = p["w_gp"][:, ar[:, None], ar[:, None] ^ ar[None, :], ar[None, :], :]  # (L,M,M,H)
    wk = jnp.reshape(wk, (L, Mb, Mb * H))

    # 0/1 matrices: same-grade sum (normalization) and channel sum (final norm)
    same_grade = (GRADES_NP[:, None] == GRADES_NP[None, :]).astype(np.float32)
    gsum = jnp.asarray(np.kron(same_grade, np.eye(H, dtype=np.float32)))    # (MH, MH)
    csum = jnp.asarray(np.tile(np.eye(H, dtype=np.float32), (Mb, 1)))       # (MH, H)

    return dict(w_lin=w_lin, b_lin=b_lin, w_left=w_left, b_left=b_left,
                w_right=w_right, s_norm=s_norm, wk=wk, gsum=gsum, csum=csum,
                w1=p["w1"], b1=p["b1"], w2=p["w2"], b2=p["b2"])


def init_params(key):
    gr = GRADES_NP
    L, H, C, Gd, Mb = NUM_GP_LAYERS, HIDDEN, IN_FEATURES, N_GRADES, M_BLADES
    ks = jax.random.split(key, 10)

    w_lin_g = jax.random.normal(ks[0], (Gd, C, H), jnp.float32) / math.sqrt(C)
    w_lin = w_lin_g[gr]                                              # (M, C, H)
    b_lin = jnp.zeros((Mb, H), jnp.float32).at[0].set(
        jax.random.normal(ks[1], (H,), jnp.float32) * 0.1)           # scalar-blade bias

    wl_g = jax.random.normal(ks[2], (L, Gd, H, H), jnp.float32) / math.sqrt(H)
    w_left = wl_g[:, gr]                                             # (L, M, H, H)
    b_left = jnp.zeros((L, Mb, H), jnp.float32).at[:, 0, :].set(
        jax.random.normal(ks[3], (L, H), jnp.float32) * 0.1)
    wr_g = jax.random.normal(ks[4], (L, Gd, H, H), jnp.float32) / math.sqrt(H)
    w_right = wr_g[:, gr]                                            # (L, M, H, H)

    a_norm = jnp.zeros((L, Gd, H), jnp.float32)                      # norm_init = 0

    w_gp_g = jax.random.normal(ks[5], (L, H, Gd, Gd, Gd), jnp.float32) / math.sqrt(Gd)
    wsel = w_gp_g[:, :, gr[:, None, None], gr[None, :, None], gr[None, None, :]]  # (L,H,M,M,M)
    w_gp = jnp.transpose(wsel, (0, 2, 3, 4, 1)) * jnp.asarray(CAYLEY_NP)[None, ..., None]

    w1 = jax.random.normal(ks[6], (H, H), jnp.float32) / math.sqrt(H)
    b1 = jax.random.normal(ks[7], (1, H), jnp.float32) * 0.1
    w2 = jax.random.normal(ks[8], (1, H), jnp.float32) / math.sqrt(H)   # Linear(H, 1)
    b2 = jax.random.normal(ks[9], (1, 1), jnp.float32) * 0.1

    goh = jnp.asarray(np.eye(Gd, dtype=np.float32)[gr])              # (M, G)

    ref_params = dict(goh=goh, w_lin=w_lin, b_lin=b_lin, w_left=w_left,
                      b_left=b_left, w_right=w_right, a_norm=a_norm, w_gp=w_gp,
                      w1=w1, b1=b1, w2=w2, b2=b2)
    return ref_params, pack_kernel_params(ref_params)


# ---------------------------------------------------------------------------
# Wrapper: embedding, padding, batch grid, pallas_call
# ---------------------------------------------------------------------------
def _round_up(v, m):
    return (v + m - 1) // m * m


def convex_hull_glgmlp_forward(points, products, kparams, *, batch_block=128):
    """Mirrors ConvexHullGLGMLP.forward((points, products), step)."""
    B = points.shape[0]
    C = IN_FEATURES
    BB = min(batch_block, _round_up(B, 8))
    G = -(-B // BB)
    Bp = G * BB

    # grade-1 embedding, flattened lane-dense: x_flat[b, m*C + c] = mv[b, m, c]
    x_flat = jnp.zeros((Bp, MC), jnp.float32)
    for a, m in enumerate((1, 2, 4)):                                # e1, e2, e3 blades
        x_flat = x_flat.at[:B, m * C:(m + 1) * C].set(points[..., a].astype(jnp.float32))
    prod = jnp.zeros((Bp,), jnp.float32).at[:B].set(products.astype(jnp.float32))
    prod3 = prod.reshape(G, 1, BB)

    weight_args = (kparams["w_lin"], kparams["b_lin"], kparams["w_left"],
                   kparams["b_left"], kparams["w_right"], kparams["s_norm"],
                   kparams["wk"], kparams["gsum"], kparams["csum"],
                   kparams["w1"], kparams["b1"], kparams["w2"], kparams["b2"])

    def _full_spec(arr):
        nd = arr.ndim
        return pl.BlockSpec(tuple(arr.shape), lambda g, _nd=nd: (0,) * _nd)

    in_specs = [
        pl.BlockSpec((BB, MC), lambda g: (g, 0)),        # batch chunk of x
        pl.BlockSpec((1, 1, BB), lambda g: (g, 0, 0)),   # batch chunk of products
    ] + [_full_spec(w) for w in weight_args]
    out_spec = pl.BlockSpec((1, 1, BB), lambda g: (g, 0, 0))

    loss3 = pl.pallas_call(
        hull_glgmlp_kernel,
        out_shape=jax.ShapeDtypeStruct((G, 1, BB), jnp.float32),
        grid=(G,),
        in_specs=in_specs,
        out_specs=out_spec,
        compiler_params=pltpu.CompilerParams(
            dimension_semantics=("parallel",),           # batch chunks -> both v7x TCs
            vmem_limit_bytes=32 * 1024 * 1024),
    )(x_flat, prod3, *weight_args)

    loss = loss3.reshape(Bp)[:B]
    return loss.mean(), {"loss": loss}


# ---------------------------------------------------------------------------
# Pure-JAX reference of the original (dense, blade-level) formulation.
# Validates the block-diagonal / Cayley-sparse / butterfly reformulation.
# ---------------------------------------------------------------------------
def embed_grade_1(points):
    """points (B, P, n) -> multivectors (B, 2**n, P) with grade-1 part set."""
    b, p, _ = points.shape
    mv = jnp.zeros((b, M_BLADES, p), jnp.float32)
    for a, m in enumerate((1, 2, 4)):
        mv = mv.at[:, m, :].set(points[..., a].astype(jnp.float32))
    return mv


def reference_forward(x_mv, prod, p):
    def mv_linear(h, w, b=None):
        out = jnp.einsum("bmc,mco->bmo", h, w)
        if b is not None:
            out = out + b[None]
        return out

    goh = p["goh"]
    h = mv_linear(x_mv, p["w_lin"], p["b_lin"])
    for l in range(NUM_GP_LAYERS):
        left = mv_linear(h, p["w_left"][l], p["b_left"][l])
        right = mv_linear(h, p["w_right"][l])
        sq = right * right
        qg = jnp.einsum("bmf,mg->bgf", sq, goh)
        nrm = jnp.sqrt(jnp.sqrt(qg * qg + EPS))
        s = jax.nn.sigmoid(p["a_norm"][l])[None]
        nrm = s * (nrm - 1.0) + 1.0
        div = jnp.einsum("bgf,mg->bmf", nrm, goh)
        rn = right / div
        gp = jnp.einsum("bif,ijkf,bkf->bjf", h, p["w_gp"][l], rn)
        h = (left + gp) * INV_SQRT2
    y = jnp.sqrt(jnp.sum(h * h, axis=1))                             # (B, H)
    z = jnp.dot(y, p["w1"]) + p["b1"]
    z = z * jax.nn.sigmoid(z)
    out = jnp.dot(z, p["w2"].T) + p["b2"]                            # (B, 1)
    diff = out - prod
    return (diff * diff)[:, 0]


if __name__ == "__main__":
    key = jax.random.PRNGKey(0)
    k_param, k_pts, k_prod = jax.random.split(key, 3)

    ref_params, kernel_params = init_params(k_param)
    points = jax.random.normal(k_pts, (BATCH, IN_FEATURES, N_DIM), jnp.float32)
    products = jax.random.normal(k_prod, (BATCH,), jnp.float32)

    loss_mean, aux = convex_hull_glgmlp_forward(points, products, kernel_params)
    loss_mean, aux = jax.block_until_ready((loss_mean, aux))

    # validate the optimized kernel against the original-formulation reference
    x_mv = embed_grade_1(points)
    ref_loss = jax.jit(reference_forward)(x_mv, products[:, None], ref_params)
    assert jnp.allclose(aux["loss"], ref_loss, rtol=1e-3, atol=1e-4)
    assert jnp.allclose(loss_mean, jnp.mean(ref_loss), rtol=1e-3, atol=1e-4)

    print("KERNEL_OK")
</pallas_src>

<mosaic_0001>
module attributes {stable_mosaic.version = 11 : i64} {
  func.func @hull_glgmlp_kernel(%arg0: i32, %arg1: memref<8x128xf32, #tpu.memory_space<vmem>>, %arg2: memref<1x1x8xf32, #tpu.memory_space<vmem>>, %arg3: memref<128x256xf32, #tpu.memory_space<vmem>>, %arg4: memref<1x256xf32, #tpu.memory_space<vmem>>, %arg5: memref<4x256x256xf32, #tpu.memory_space<vmem>>, %arg6: memref<4x1x256xf32, #tpu.memory_space<vmem>>, %arg7: memref<4x256x256xf32, #tpu.memory_space<vmem>>, %arg8: memref<4x1x256xf32, #tpu.memory_space<vmem>>, %arg9: memref<4x8x256xf32, #tpu.memory_space<vmem>>, %arg10: memref<256x256xf32, #tpu.memory_space<vmem>>, %arg11: memref<256x32xf32, #tpu.memory_space<vmem>>, %arg12: memref<32x32xf32, #tpu.memory_space<vmem>>, %arg13: memref<1x32xf32, #tpu.memory_space<vmem>>, %arg14: memref<1x32xf32, #tpu.memory_space<vmem>>, %arg15: memref<1x1xf32, #tpu.memory_space<vmem>>, %arg16: memref<1x1x8xf32, #tpu.memory_space<vmem>>) attributes {dimension_semantics = [#tpu.dimension_semantics<parallel>], iteration_bounds = array<i64: 1>, scalar_prefetch = 0 : i64, scratch_operands = 0 : i64, tpu.core_type = #tpu.core_type<tc>, window_params = [{transform_indices = @transform_0, window_bounds = array<i64: 8, 128>}, {transform_indices = @transform_1, window_bounds = array<i64: 1, 1, 8>}, {pipeline_mode = #tpu.pipeline_mode<synchronous>, transform_indices = @transform_2, window_bounds = array<i64: 128, 256>}, {pipeline_mode = #tpu.pipeline_mode<synchronous>, transform_indices = @transform_3, window_bounds = array<i64: 1, 256>}, {pipeline_mode = #tpu.pipeline_mode<synchronous>, transform_indices = @transform_4, window_bounds = array<i64: 4, 256, 256>}, {pipeline_mode = #tpu.pipeline_mode<synchronous>, transform_indices = @transform_5, window_bounds = array<i64: 4, 1, 256>}, {pipeline_mode = #tpu.pipeline_mode<synchronous>, transform_indices = @transform_6, window_bounds = array<i64: 4, 256, 256>}, {pipeline_mode = #tpu.pipeline_mode<synchronous>, transform_indices = @transform_7, window_bounds = array<i64: 4, 1, 256>}, {pipeline_mode = #tpu.pipeline_mode<synchronous>, transform_indices = @transform_8, window_bounds = array<i64: 4, 8, 256>}, {pipeline_mode = #tpu.pipeline_mode<synchronous>, transform_indices = @transform_9, window_bounds = array<i64: 256, 256>}, {pipeline_mode = #tpu.pipeline_mode<synchronous>, transform_indices = @transform_10, window_bounds = array<i64: 256, 32>}, {pipeline_mode = #tpu.pipeline_mode<synchronous>, transform_indices = @transform_11, window_bounds = array<i64: 32, 32>}, {pipeline_mode = #tpu.pipeline_mode<synchronous>, transform_indices = @transform_12, window_bounds = array<i64: 1, 32>}, {pipeline_mode = #tpu.pipeline_mode<synchronous>, transform_indices = @transform_13, window_bounds = array<i64: 1, 32>}, {pipeline_mode = #tpu.pipeline_mode<synchronous>, transform_indices = @transform_14, window_bounds = array<i64: 1, 1>}, {transform_indices = @transform_15, window_bounds = array<i64: 1, 1, 8>}]} {
    %c0 = arith.constant 0 : index
    %c0_0 = arith.constant 0 : index
    %0 = vector.load %arg1[%c0, %c0_0] : memref<8x128xf32, #tpu.memory_space<vmem>>, vector<8x128xf32>
    %c0_1 = arith.constant 0 : index
    %c0_2 = arith.constant 0 : index
    %1 = vector.load %arg3[%c0_1, %c0_2] : memref<128x256xf32, #tpu.memory_space<vmem>>, vector<128x256xf32>
    %cst = arith.constant dense<0.000000e+00> : vector<8x256xf32>
    %2 = tpu.matmul %0, %1, %cst {dimension_numbers = #tpu.dot_dimension_numbers<[1], [0], [0], [1], [0, 0, 1, 1], [], []>} : vector<8x128xf32>, vector<128x256xf32>, vector<8x256xf32> -> vector<8x256xf32>
    %c0_3 = arith.constant 0 : index
    %c0_4 = arith.constant 0 : index
    %3 = vector.load %arg4[%c0_3, %c0_4] : memref<1x256xf32, #tpu.memory_space<vmem>>, vector<1x256xf32>
    %4 = vector.broadcast %3 : vector<1x256xf32> to vector<8x256xf32>
    %5 = arith.addf %2, %4 : vector<8x256xf32>
    %c0_5 = arith.constant 0 : index
    %c0_6 = arith.constant 0 : index
    %6 = vector.load %arg10[%c0_5, %c0_6] : memref<256x256xf32, #tpu.memory_space<vmem>>, vector<256x256xf32>
    %c0_7 = arith.constant 0 : index
    %c0_8 = arith.constant 0 : index
    %c0_9 = arith.constant 0 : index
    %7 = vector.load %arg5[%c0_7, %c0_8, %c0_9] : memref<4x256x256xf32, #tpu.memory_space<vmem>>, vector<1x256x256xf32>
    %8 = vector.shape_cast %7 : vector<1x256x256xf32> to vector<256x256xf32>
    %cst_10 = arith.constant dense<0.000000e+00> : vector<8x256xf32>
    %9 = tpu.matmul %5, %8, %cst_10 {dimension_numbers = #tpu.dot_dimension_numbers<[1], [0], [0], [1], [0, 0, 1, 1], [], []>} : vector<8x256xf32>, vector<256x256xf32>, vector<8x256xf32> -> vector<8x256xf32>
    %c0_11 = arith.constant 0 : index
    %c0_12 = arith.constant 0 : index
    %c0_13 = arith.constant 0 : index
    %10 = vector.load %arg6[%c0_11, %c0_12, %c0_13] : memref<4x1x256xf32, #tpu.memory_space<vmem>>, vector<1x1x256xf32>
    %11 = vector.shape_cast %10 : vector<1x1x256xf32> to vector<1x256xf32>
    %12 = vector.broadcast %11 : vector<1x256xf32> to vector<8x256xf32>
    %13 = arith.addf %9, %12 : vector<8x256xf32>
    %c0_14 = arith.constant 0 : index
    %c0_15 = arith.constant 0 : index
    %c0_16 = arith.constant 0 : index
    %14 = vector.load %arg7[%c0_14, %c0_15, %c0_16] : memref<4x256x256xf32, #tpu.memory_space<vmem>>, vector<1x256x256xf32>
    %15 = vector.shape_cast %14 : vector<1x256x256xf32> to vector<256x256xf32>
    %cst_17 = arith.constant dense<0.000000e+00> : vector<8x256xf32>
    %16 = tpu.matmul %5, %15, %cst_17 {dimension_numbers = #tpu.dot_dimension_numbers<[1], [0], [0], [1], [0, 0, 1, 1], [], []>} : vector<8x256xf32>, vector<256x256xf32>, vector<8x256xf32> -> vector<8x256xf32>
    %17 = arith.mulf %16, %16 : vector<8x256xf32>
    %cst_18 = arith.constant dense<0.000000e+00> : vector<8x256xf32>
    %18 = tpu.matmul %17, %6, %cst_18 {dimension_numbers = #tpu.dot_dimension_numbers<[1], [0], [0], [1], [0, 0, 1, 1], [], []>} : vector<8x256xf32>, vector<256x256xf32>, vector<8x256xf32> -> vector<8x256xf32>
    %19 = arith.mulf %18, %18 : vector<8x256xf32>
    %cst_19 = arith.constant 1.000000e-16 : f32
    %20 = vector.broadcast %cst_19 : f32 to vector<8x256xf32>
    %21 = arith.addf %19, %20 : vector<8x256xf32>
    %22 = math.sqrt %21 : vector<8x256xf32>
    %23 = math.sqrt %22 : vector<8x256xf32>
    %c0_20 = arith.constant 0 : index
    %c0_21 = arith.constant 0 : index
    %c0_22 = arith.constant 0 : index
    %24 = vector.load %arg8[%c0_20, %c0_21, %c0_22] : memref<4x1x256xf32, #tpu.memory_space<vmem>>, vector<1x1x256xf32>
    %25 = vector.shape_cast %24 : vector<1x1x256xf32> to vector<1x256xf32>
    %cst_23 = arith.constant 1.000000e+00 : f32
    %26 = vector.broadcast %cst_23 : f32 to vector<8x256xf32>
    %27 = arith.subf %23, %26 : vector<8x256xf32>
    %28 = vector.broadcast %25 : vector<1x256xf32> to vector<8x256xf32>
    %29 = arith.mulf %28, %27 : vector<8x256xf32>
    %cst_24 = arith.constant 1.000000e+00 : f32
    %30 = vector.broadcast %cst_24 : f32 to vector<8x256xf32>
    %31 = arith.addf %29, %30 : vector<8x256xf32>
    %32 = arith.divf %16, %31 : vector<8x256xf32>
    %c0_25 = arith.constant 0 : index
    %c0_26 = arith.constant 0 : index
    %c0_27 = arith.constant 0 : index
    %33 = vector.load %arg9[%c0_25, %c0_26, %c0_27] : memref<4x8x256xf32, #tpu.memory_space<vmem>>, vector<1x8x256xf32>
    %34 = vector.shape_cast %33 : vector<1x8x256xf32> to vector<8x256xf32>
    %35 = vector.extract_strided_slice %5 {offsets = [0, 0], sizes = [8, 32], strides = [1, 1]} : vector<8x256xf32> to vector<8x32xf32>
    %36 = tpu.concatenate %35, %35, %35, %35, %35, %35, %35, %35 in 1 : vector<8x32xf32>, vector<8x32xf32>, vector<8x32xf32>, vector<8x32xf32>, vector<8x32xf32>, vector<8x32xf32>, vector<8x32xf32>, vector<8x32xf32> -> vector<8x256xf32>
    %37 = vector.extract_strided_slice %34 {offsets = [0, 0], sizes = [1, 256], strides = [1, 1]} : vector<8x256xf32> to vector<1x256xf32>
    %38 = vector.broadcast %37 : vector<1x256xf32> to vector<8x256xf32>
    %39 = arith.mulf %36, %38 : vector<8x256xf32>
    %40 = arith.mulf %39, %32 : vector<8x256xf32>
    %41 = vector.extract_strided_slice %5 {offsets = [0, 32], sizes = [8, 32], strides = [1, 1]} : vector<8x256xf32> to vector<8x32xf32>
    %42 = tpu.concatenate %41, %41, %41, %41, %41, %41, %41, %41 in 1 : vector<8x32xf32>, vector<8x32xf32>, vector<8x32xf32>, vector<8x32xf32>, vector<8x32xf32>, vector<8x32xf32>, vector<8x32xf32>, vector<8x32xf32> -> vector<8x256xf32>
    %43 = vector.extract_strided_slice %34 {offsets = [1, 0], sizes = [1, 256], strides = [1, 1]} : vector<8x256xf32> to vector<1x256xf32>
    %44 = vector.broadcast %43 : vector<1x256xf32> to vector<8x256xf32>
    %45 = arith.mulf %42, %44 : vector<8x256xf32>
    %46 = arith.mulf %45, %32 : vector<8x256xf32>
    %47 = vector.extract_strided_slice %5 {offsets = [0, 64], sizes = [8, 32], strides = [1, 1]} : vector<8x256xf32> to vector<8x32xf32>
    %48 = tpu.concatenate %47, %47, %47, %47, %47, %47, %47, %47 in 1 : vector<8x32xf32>, vector<8x32xf32>, vector<8x32xf32>, vector<8x32xf32>, vector<8x32xf32>, vector<8x32xf32>, vector<8x32xf32>, vector<8x32xf32> -> vector<8x256xf32>
    %49 = vector.extract_strided_slice %34 {offsets = [2, 0], sizes = [1, 256], strides = [1, 1]} : vector<8x256xf32> to vector<1x256xf32>
    %50 = vector.broadcast %49 : vector<1x256xf32> to vector<8x256xf32>
    %51 = arith.mulf %48, %50 : vector<8x256xf32>
    %52 = arith.mulf %51, %32 : vector<8x256xf32>
    %53 = vector.extract_strided_slice %5 {offsets = [0, 96], sizes = [8, 32], strides = [1, 1]} : vector<8x256xf32> to vector<8x32xf32>
    %54 = tpu.concatenate %53, %53, %53, %53, %53, %53, %53, %53 in 1 : vector<8x32xf32>, vector<8x32xf32>, vector<8x32xf32>, vector<8x32xf32>, vector<8x32xf32>, vector<8x32xf32>, vector<8x32xf32>, vector<8x32xf32> -> vector<8x256xf32>
    %55 = vector.extract_strided_slice %34 {offsets = [3, 0], sizes = [1, 256], strides = [1, 1]} : vector<8x256xf32> to vector<1x256xf32>
    %56 = vector.broadcast %55 : vector<1x256xf32> to vector<8x256xf32>
    %57 = arith.mulf %54, %56 : vector<8x256xf32>
    %58 = arith.mulf %57, %32 : vector<8x256xf32>
    %59 = vector.extract_strided_slice %5 {offsets = [0, 128], sizes = [8, 32], strides = [1, 1]} : vector<8x256xf32> to vector<8x32xf32>
    %60 = tpu.concatenate %59, %59, %59, %59, %59, %59, %59, %59 in 1 : vector<8x32xf32>, vector<8x32xf32>, vector<8x32xf32>, vector<8x32xf32>, vector<8x32xf32>, vector<8x32xf32>, vector<8x32xf32>, vector<8x32xf32> -> vector<8x256xf32>
    %61 = vector.extract_strided_slice %34 {offsets = [4, 0], sizes = [1, 256], strides = [1, 1]} : vector<8x256xf32> to vector<1x256xf32>
    %62 = vector.broadcast %61 : vector<1x256xf32> to vector<8x256xf32>
    %63 = arith.mulf %60, %62 : vector<8x256xf32>
    %64 = arith.mulf %63, %32 : vector<8x256xf32>
    %65 = vector.extract_strided_slice %5 {offsets = [0, 160], sizes = [8, 32], strides = [1, 1]} : vector<8x256xf32> to vector<8x32xf32>
    %66 = tpu.concatenate %65, %65, %65, %65, %65, %65, %65, %65 in 1 : vector<8x32xf32>, vector<8x32xf32>, vector<8x32xf32>, vector<8x32xf32>, vector<8x32xf32>, vector<8x32xf32>, vector<8x32xf32>, vector<8x32xf32> -> vector<8x256xf32>
    %67 = vector.extract_strided_slice %34 {offsets = [5, 0], sizes = [1, 256], strides = [1, 1]} : vector<8x256xf32> to vector<1x256xf32>
    %68 = vector.broadcast %67 : vector<1x256xf32> to vector<8x256xf32>
    %69 = arith.mulf %66, %68 : vector<8x256xf32>
    %70 = arith.mulf %69, %32 : vector<8x256xf32>
    %71 = vector.extract_strided_slice %5 {offsets = [0, 192], sizes = [8, 32], strides = [1, 1]} : vector<8x256xf32> to vector<8x32xf32>
    %72 = tpu.concatenate %71, %71, %71, %71, %71, %71, %71, %71 in 1 : vector<8x32xf32>, vector<8x32xf32>, vector<8x32xf32>, vector<8x32xf32>, vector<8x32xf32>, vector<8x32xf32>, vector<8x32xf32>, vector<8x32xf32> -> vector<8x256xf32>
    %73 = vector.extract_strided_slice %34 {offsets = [6, 0], sizes = [1, 256], strides = [1, 1]} : vector<8x256xf32> to vector<1x256xf32>
    %74 = vector.broadcast %73 : vector<1x256xf32> to vector<8x256xf32>
    %75 = arith.mulf %72, %74 : vector<8x256xf32>
    %76 = arith.mulf %75, %32 : vector<8x256xf32>
    %77 = vector.extract_strided_slice %5 {offsets = [0, 224], sizes = [8, 32], strides = [1, 1]} : vector<8x256xf32> to vector<8x32xf32>
    %78 = tpu.concatenate %77, %77, %77, %77, %77, %77, %77, %77 in 1 : vector<8x32xf32>, vector<8x32xf32>, vector<8x32xf32>, vector<8x32xf32>, vector<8x32xf32>, vector<8x32xf32>, vector<8x32xf32>, vector<8x32xf32> -> vector<8x256xf32>
    %79 = vector.extract_strided_slice %34 {offsets = [7, 0], sizes = [1, 256], strides = [1, 1]} : vector<8x256xf32> to vector<1x256xf32>
    %80 = vector.broadcast %79 : vector<1x256xf32> to vector<8x256xf32>
    %81 = arith.mulf %78, %80 : vector<8x256xf32>
    %82 = arith.mulf %81, %32 : vector<8x256xf32>
    %83 = vector.extract_strided_slice %46 {offsets = [0, 0], sizes = [8, 32], strides = [1, 1]} : vector<8x256xf32> to vector<8x32xf32>
    %84 = vector.extract_strided_slice %46 {offsets = [0, 32], sizes = [8, 32], strides = [1, 1]} : vector<8x256xf32> to vector<8x32xf32>
    %85 = vector.extract_strided_slice %46 {offsets = [0, 64], sizes = [8, 32], strides = [1, 1]} : vector<8x256xf32> to vector<8x32xf32>
    %86 = vector.extract_strided_slice %46 {offsets = [0, 96], sizes = [8, 32], strides = [1, 1]} : vector<8x256xf32> to vector<8x32xf32>
    %87 = vector.extract_strided_slice %46 {offsets = [0, 128], sizes = [8, 32], strides = [1, 1]} : vector<8x256xf32> to vector<8x32xf32>
    %88 = vector.extract_strided_slice %46 {offsets = [0, 160], sizes = [8, 32], strides = [1, 1]} : vector<8x256xf32> to vector<8x32xf32>
    %89 = vector.extract_strided_slice %46 {offsets = [0, 192], sizes = [8, 32], strides = [1, 1]} : vector<8x256xf32> to vector<8x32xf32>
    %90 = vector.extract_strided_slice %46 {offsets = [0, 224], sizes = [8, 32], strides = [1, 1]} : vector<8x256xf32> to vector<8x32xf32>
    %91 = tpu.concatenate %84, %83, %86, %85, %88, %87, %90, %89 in 1 : vector<8x32xf32>, vector<8x32xf32>, vector<8x32xf32>, vector<8x32xf32>, vector<8x32xf32>, vector<8x32xf32>, vector<8x32xf32>, vector<8x32xf32> -> vector<8x256xf32>
    %92 = arith.addf %40, %91 : vector<8x256xf32>
    %93 = vector.extract_strided_slice %58 {offsets = [0, 0], sizes = [8, 32], strides = [1, 1]} : vector<8x256xf32> to vector<8x32xf32>
    %94 = vector.extract_strided_slice %58 {offsets = [0, 32], sizes = [8, 32], strides = [1, 1]} : vector<8x256xf32> to vector<8x32xf32>
    %95 = vector.extract_strided_slice %58 {offsets = [0, 64], sizes = [8, 32], strides = [1, 1]} : vector<8x256xf32> to vector<8x32xf32>
    %96 = vector.extract_strided_slice %58 {offsets = [0, 96], sizes = [8, 32], strides = [1, 1]} : vector<8x256xf32> to vector<8x32xf32>
    %97 = vector.extract_strided_slice %58 {offsets = [0, 128], sizes = [8, 32], strides = [1, 1]} : vector<8x256xf32> to vector<8x32xf32>
    %98 = vector.extract_strided_slice %58 {offsets = [0, 160], sizes = [8, 32], strides = [1, 1]} : vector<8x256xf32> to vector<8x32xf32>
    %99 = vector.extract_strided_slice %58 {offsets = [0, 192], sizes = [8, 32], strides = [1, 1]} : vector<8x256xf32> to vector<8x32xf32>
    %100 = vector.extract_strided_slice %58 {offsets = [0, 224], sizes = [8, 32], strides = [1, 1]} : vector<8x256xf32> to vector<8x32xf32>
    %101 = tpu.concatenate %94, %93, %96, %95, %98, %97, %100, %99 in 1 : vector<8x32xf32>, vector<8x32xf32>, vector<8x32xf32>, vector<8x32xf32>, vector<8x32xf32>, vector<8x32xf32>, vector<8x32xf32>, vector<8x32xf32> -> vector<8x256xf32>
    %102 = arith.addf %52, %101 : vector<8x256xf32>
    %103 = vector.extract_strided_slice %70 {offsets = [0, 0], sizes = [8, 32], strides = [1, 1]} : vector<8x256xf32> to vector<8x32xf32>
    %104 = vector.extract_strided_slice %70 {offsets = [0, 32], sizes = [8, 32], strides = [1, 1]} : vector<8x256xf32> to vector<8x32xf32>
    %105 = vector.extract_strided_slice %70 {offsets = [0, 64], sizes = [8, 32], strides = [1, 1]} : vector<8x256xf32> to vector<8x32xf32>
    %106 = vector.extract_strided_slice %70 {offsets = [0, 96], sizes = [8, 32], strides = [1, 1]} : vector<8x256xf32> to vector<8x32xf32>
    %107 = vector.extract_strided_slice %70 {offsets = [0, 128], sizes = [8, 32], strides = [1, 1]} : vector<8x256xf32> to vector<8x32xf32>
    %108 = vector.extract_strided_slice %70 {offsets = [0, 160], sizes = [8, 32], strides = [1, 1]} : vector<8x256xf32> to vector<8x32xf32>
    %109 = vector.extract_strided_slice %70 {offsets = [0, 192], sizes = [8, 32], strides = [1, 1]} : vector<8x256xf32> to vector<8x32xf32>
    %110 = vector.extract_strided_slice %70 {offsets = [0, 224], sizes = [8, 32], strides = [1, 1]} : vector<8x256xf32> to vector<8x32xf32>
    %111 = tpu.concatenate %104, %103, %106, %105, %108, %107, %110, %109 in 1 : vector<8x32xf32>, vector<8x32xf32>, vector<8x32xf32>, vector<8x32xf32>, vector<8x32xf32>, vector<8x32xf32>, vector<8x32xf32>, vector<8x32xf32> -> vector<8x256xf32>
    %112 = arith.addf %64, %111 : vector<8x256xf32>
    %113 = vector.extract_strided_slice %82 {offsets = [0, 0], sizes = [8, 32], strides = [1, 1]} : vector<8x256xf32> to vector<8x32xf32>
    %114 = vector.extract_strided_slice %82 {offsets = [0, 32], sizes = [8, 32], strides = [1, 1]} : vector<8x256xf32> to vector<8x32xf32>
    %115 = vector.extract_strided_slice %82 {offsets = [0, 64], sizes = [8, 32], strides = [1, 1]} : vector<8x256xf32> to vector<8x32xf32>
    %116 = vector.extract_strided_slice %82 {offsets = [0, 96], sizes = [8, 32], strides = [1, 1]} : vector<8x256xf32> to vector<8x32xf32>
    %117 = vector.extract_strided_slice %82 {offsets = [0, 128], sizes = [8, 32], strides = [1, 1]} : vector<8x256xf32> to vector<8x32xf32>
    %118 = vector.extract_strided_slice %82 {offsets = [0, 160], sizes = [8, 32], strides = [1, 1]} : vector<8x256xf32> to vector<8x32xf32>
    %119 = vector.extract_strided_slice %82 {offsets = [0, 192], sizes = [8, 32], strides = [1, 1]} : vector<8x256xf32> to vector<8x32xf32>
    %120 = vector.extract_strided_slice %82 {offsets = [0, 224], sizes = [8, 32], strides = [1, 1]} : vector<8x256xf32> to vector<8x32xf32>
    %121 = tpu.concatenate %114, %113, %116, %115, %118, %117, %120, %119 in 1 : vector<8x32xf32>, vector<8x32xf32>, vector<8x32xf32>, vector<8x32xf32>, vector<8x32xf32>, vector<8x32xf32>, vector<8x32xf32>, vector<8x32xf32> -> vector<8x256xf32>
    %122 = arith.addf %76, %121 : vector<8x256xf32>
    %123 = vector.extract_strided_slice %102 {offsets = [0, 0], sizes = [8, 64], strides = [1, 1]} : vector<8x256xf32> to vector<8x64xf32>
    %124 = vector.extract_strided_slice %102 {offsets = [0, 64], sizes = [8, 64], strides = [1, 1]} : vector<8x256xf32> to vector<8x64xf32>
    %125 = vector.extract_strided_slice %102 {offsets = [0, 128], sizes = [8, 64], strides = [1, 1]} : vector<8x256xf32> to vector<8x64xf32>
    %126 = vector.extract_strided_slice %102 {offsets = [0, 192], sizes = [8, 64], strides = [1, 1]} : vector<8x256xf32> to vector<8x64xf32>
    %127 = tpu.concatenate %124, %123, %126, %125 in 1 : vector<8x64xf32>, vector<8x64xf32>, vector<8x64xf32>, vector<8x64xf32> -> vector<8x256xf32>
    %128 = arith.addf %92, %127 : vector<8x256xf32>
    %129 = vector.extract_strided_slice %122 {offsets = [0, 0], sizes = [8, 64], strides = [1, 1]} : vector<8x256xf32> to vector<8x64xf32>
    %130 = vector.extract_strided_slice %122 {offsets = [0, 64], sizes = [8, 64], strides = [1, 1]} : vector<8x256xf32> to vector<8x64xf32>
    %131 = vector.extract_strided_slice %122 {offsets = [0, 128], sizes = [8, 64], strides = [1, 1]} : vector<8x256xf32> to vector<8x64xf32>
    %132 = vector.extract_strided_slice %122 {offsets = [0, 192], sizes = [8, 64], strides = [1, 1]} : vector<8x256xf32> to vector<8x64xf32>
    %133 = tpu.concatenate %130, %129, %132, %131 in 1 : vector<8x64xf32>, vector<8x64xf32>, vector<8x64xf32>, vector<8x64xf32> -> vector<8x256xf32>
    %134 = arith.addf %112, %133 : vector<8x256xf32>
    %135 = vector.extract_strided_slice %134 {offsets = [0, 0], sizes = [8, 128], strides = [1, 1]} : vector<8x256xf32> to vector<8x128xf32>
    %136 = vector.extract_strided_slice %134 {offsets = [0, 128], sizes = [8, 128], strides = [1, 1]} : vector<8x256xf32> to vector<8x128xf32>
    %137 = tpu.concatenate %136, %135 in 1 : vector<8x128xf32>, vector<8x128xf32> -> vector<8x256xf32>
    %138 = arith.addf %128, %137 : vector<8x256xf32>
    %139 = arith.addf %13, %138 : vector<8x256xf32>
    %cst_28 = arith.constant 0.707106769 : f32
    %140 = vector.broadcast %cst_28 : f32 to vector<8x256xf32>
    %141 = arith.mulf %139, %140 : vector<8x256xf32>
    %c1 = arith.constant 1 : index
    %c0_29 = arith.constant 0 : index
    %c0_30 = arith.constant 0 : index
    %142 = vector.load %arg5[%c1, %c0_29, %c0_30] : memref<4x256x256xf32, #tpu.memory_space<vmem>>, vector<1x256x256xf32>
    %143 = vector.shape_cast %142 : vector<1x256x256xf32> to vector<256x256xf32>
    %cst_31 = arith.constant dense<0.000000e+00> : vector<8x256xf32>
    %144 = tpu.matmul %141, %143, %cst_31 {dimension_numbers = #tpu.dot_dimension_numbers<[1], [0], [0], [1], [0, 0, 1, 1], [], []>} : vector<8x256xf32>, vector<256x256xf32>, vector<8x256xf32> -> vector<8x256xf32>
    %c1_32 = arith.constant 1 : index
    %c0_33 = arith.constant 0 : index
    %c0_34 = arith.constant 0 : index
    %145 = vector.load %arg6[%c1_32, %c0_33, %c0_34] : memref<4x1x256xf32, #tpu.memory_space<vmem>>, vector<1x1x256xf32>
    %146 = vector.shape_cast %145 : vector<1x1x256xf32> to vector<1x256xf32>
    %147 = vector.broadcast %146 : vector<1x256xf32> to vector<8x256xf32>
    %148 = arith.addf %144, %147 : vector<8x256xf32>
    %c1_35 = arith.constant 1 : index
    %c0_36 = arith.constant 0 : index
    %c0_37 = arith.constant 0 : index
    %149 = vector.load %arg7[%c1_35, %c0_36, %c0_37] : memref<4x256x256xf32, #tpu.memory_space<vmem>>, vector<1x256x256xf32>
    %150 = vector.shape_cast %149 : vector<1x256x256xf32> to vector<256x256xf32>
    %cst_38 = arith.constant dense<0.000000e+00> : vector<8x256xf32>
    %151 = tpu.matmul %141, %150, %cst_38 {dimension_numbers = #tpu.dot_dimension_numbers<[1], [0], [0], [1], [0, 0, 1, 1], [], []>} : vector<8x256xf32>, vector<256x256xf32>, vector<8x256xf32> -> vector<8x256xf32>
    %152 = arith.mulf %151, %151 : vector<8x256xf32>
    %cst_39 = arith.constant dense<0.000000e+00> : vector<8x256xf32>
    %153 = tpu.matmul %152, %6, %cst_39 {dimension_numbers = #tpu.dot_dimension_numbers<[1], [0], [0], [1], [0, 0, 1, 1], [], []>} : vector<8x256xf32>, vector<256x256xf32>, vector<8x256xf32> -> vector<8x256xf32>
    %154 = arith.mulf %153, %153 : vector<8x256xf32>
    %cst_40 = arith.constant 1.000000e-16 : f32
    %155 = vector.broadcast %cst_40 : f32 to vector<8x256xf32>
    %156 = arith.addf %154, %155 : vector<8x256xf32>
    %157 = math.sqrt %156 : vector<8x256xf32>
    %158 = math.sqrt %157 : vector<8x256xf32>
    %c1_41 = arith.constant 1 : index
    %c0_42 = arith.constant 0 : index
    %c0_43 = arith.constant 0 : index
    %159 = vector.load %arg8[%c1_41, %c0_42, %c0_43] : memref<4x1x256xf32, #tpu.memory_space<vmem>>, vector<1x1x256xf32>
    %160 = vector.shape_cast %159 : vector<1x1x256xf32> to vector<1x256xf32>
    %cst_44 = arith.constant 1.000000e+00 : f32
    %161 = vector.broadcast %cst_44 : f32 to vector<8x256xf32>
    %162 = arith.subf %158, %161 : vector<8x256xf32>
    %163 = vector.broadcast %160 : vector<1x256xf32> to vector<8x256xf32>
    %164 = arith.mulf %163, %162 : vector<8x256xf32>
    %cst_45 = arith.constant 1.000000e+00 : f32
    %165 = vector.broadcast %cst_45 : f32 to vector<8x256xf32>
    %166 = arith.addf %164, %165 : vector<8x256xf32>
    %167 = arith.divf %151, %166 : vector<8x256xf32>
    %c1_46 = arith.constant 1 : index
    %c0_47 = arith.constant 0 : index
    %c0_48 = arith.constant 0 : index
    %168 = vector.load %arg9[%c1_46, %c0_47, %c0_48] : memref<4x8x256xf32, #tpu.memory_space<vmem>>, vector<1x8x256xf32>
    %169 = vector.shape_cast %168 : vector<1x8x256xf32> to vector<8x256xf32>
    %170 = vector.extract_strided_slice %141 {offsets = [0, 0], sizes = [8, 32], strides = [1, 1]} : vector<8x256xf32> to vector<8x32xf32>
    %171 = tpu.concatenate %170, %170, %170, %170, %170, %170, %170, %170 in 1 : vector<8x32xf32>, vector<8x32xf32>, vector<8x32xf32>, vector<8x32xf32>, vector<8x32xf32>, vector<8x32xf32>, vector<8x32xf32>, vector<8x32xf32> -> vector<8x256xf32>
    %172 = vector.extract_strided_slice %169 {offsets = [0, 0], sizes = [1, 256], strides = [1, 1]} : vector<8x256xf32> to vector<1x256xf32>
    %173 = vector.broadcast %172 : vector<1x256xf32> to vector<8x256xf32>
    %174 = arith.mulf %171, %173 : vector<8x256xf32>
    %175 = arith.mulf %174, %167 : vector<8x256xf32>
    %176 = vector.extract_strided_slice %141 {offsets = [0, 32], sizes = [8, 32], strides = [1, 1]} : vector<8x256xf32> to vector<8x32xf32>
    %177 = tpu.concatenate %176, %176, %176, %176, %176, %176, %176, %176 in 1 : vector<8x32xf32>, vector<8x32xf32>, vector<8x32xf32>, vector<8x32xf32>, vector<8x32xf32>, vector<8x32xf32>, vector<8x32xf32>, vector<8x32xf32> -> vector<8x256xf32>
    %178 = vector.extract_strided_slice %169 {offsets = [1, 0], sizes = [1, 256], strides = [1, 1]} : vector<8x256xf32> to vector<1x256xf32>
    %179 = vector.broadcast %178 : vector<1x256xf32> to vector<8x256xf32>
    %180 = arith.mulf %177, %179 : vector<8x256xf32>
    %181 = arith.mulf %180, %167 : vector<8x256xf32>
    %182 = vector.extract_strided_slice %141 {offsets = [0, 64], sizes = [8, 32], strides = [1, 1]} : vector<8x256xf32> to vector<8x32xf32>
    %183 = tpu.concatenate %182, %182, %182, %182, %182, %182, %182, %182 in 1 : vector<8x32xf32>, vector<8x32xf32>, vector<8x32xf32>, vector<8x32xf32>, vector<8x32xf32>, vector<8x32xf32>, vector<8x32xf32>, vector<8x32xf32> -> vector<8x256xf32>
    %184 = vector.extract_strided_slice %169 {offsets = [2, 0], sizes = [1, 256], strides = [1, 1]} : vector<8x256xf32> to vector<1x256xf32>
    %185 = vector.broadcast %184 : vector<1x256xf32> to vector<8x256xf32>
    %186 = arith.mulf %183, %185 : vector<8x256xf32>
    %187 = arith.mulf %186, %167 : vector<8x256xf32>
    %188 = vector.extract_strided_slice %141 {offsets = [0, 96], sizes = [8, 32], strides = [1, 1]} : vector<8x256xf32> to vector<8x32xf32>
    %189 = tpu.concatenate %188, %188, %188, %188, %188, %188, %188, %188 in 1 : vector<8x32xf32>, vector<8x32xf32>, vector<8x32xf32>, vector<8x32xf32>, vector<8x32xf32>, vector<8x32xf32>, vector<8x32xf32>, vector<8x32xf32> -> vector<8x256xf32>
    %190 = vector.extract_strided_slice %169 {offsets = [3, 0], sizes = [1, 256], strides = [1, 1]} : vector<8x256xf32> to vector<1x256xf32>
    %191 = vector.broadcast %190 : vector<1x256xf32> to vector<8x256xf32>
    %192 = arith.mulf %189, %191 : vector<8x256xf32>
    %193 = arith.mulf %192, %167 : vector<8x256xf32>
    %194 = vector.extract_strided_slice %141 {offsets = [0, 128], sizes = [8, 32], strides = [1, 1]} : vector<8x256xf32> to vector<8x32xf32>
    %195 = tpu.concatenate %194, %194, %194, %194, %194, %194, %194, %194 in 1 : vector<8x32xf32>, vector<8x32xf32>, vector<8x32xf32>, vector<8x32xf32>, vector<8x32xf32>, vector<8x32xf32>, vector<8x32xf32>, vector<8x32xf32> -> vector<8x256xf32>
    %196 = vector.extract_strided_slice %169 {offsets = [4, 0], sizes = [1, 256], strides = [1, 1]} : vector<8x256xf32> to vector<1x256xf32>
    %197 = vector.broadcast %196 : vector<1x256xf32> to vector<8x256xf32>
    %198 = arith.mulf %195, %197 : vector<8x256xf32>
    %199 = arith.mulf %198, %167 : vector<8x256xf32>
    %200 = vector.extract_strided_slice %141 {offsets = [0, 160], sizes = [8, 32], strides = [1, 1]} : vector<8x256xf32> to vector<8x32xf32>
    %201 = tpu.concatenate %200, %200, %200, %200, %200, %200, %200, %200 in 1 : vector<8x32xf32>, vector<8x32xf32>, vector<8x32xf32>, vector<8x32xf32>, vector<8x32xf32>, vector<8x32xf32>, vector<8x32xf32>, vector<8x32xf32> -> vector<8x256xf32>
    %202 = vector.extract_strided_slice %169 {offsets = [5, 0], sizes = [1, 256], strides = [1, 1]} : vector<8x256xf32> to vector<1x256xf32>
    %203 = vector.broadcast %202 : vector<1x256xf32> to vector<8x256xf32>
    %204 = arith.mulf %201, %203 : vector<8x256xf32>
    %205 = arith.mulf %204, %167 : vector<8x256xf32>
    %206 = vector.extract_strided_slice %141 {offsets = [0, 192], sizes = [8, 32], strides = [1, 1]} : vector<8x256xf32> to vector<8x32xf32>
    %207 = tpu.concatenate %206, %206, %206, %206, %206, %206, %206, %206 in 1 : vector<8x32xf32>, vector<8x32xf32>, vector<8x32xf32>, vector<8x32xf32>, vector<8x32xf32>, vector<8x32xf32>, vector<8x32xf32>, vector<8x32xf32> -> vector<8x256xf32>
    %208 = vector.extract_strided_slice %169 {offsets = [6, 0], sizes = [1, 256], strides = [1, 1]} : vector<8x256xf32> to vector<1x256xf32>
    %209 = vector.broadcast %208 : vector<1x256xf32> to vector<8x256xf32>
    %210 = arith.mulf %207, %209 : vector<8x256xf32>
    %211 = arith.mulf %210, %167 : vector<8x256xf32>
    %212 = vector.extract_strided_slice %141 {offsets = [0, 224], sizes = [8, 32], strides = [1, 1]} : vector<8x256xf32> to vector<8x32xf32>
    %213 = tpu.concatenate %212, %212, %212, %212, %212, %212, %212, %212 in 1 : vector<8x32xf32>, vector<8x32xf32>, vector<8x32xf32>, vector<8x32xf32>, vector<8x32xf32>, vector<8x32xf32>, vector<8x32xf32>, vector<8x32xf32> -> vector<8x256xf32>
    %214 = vector.extract_strided_slice %169 {offsets = [7, 0], sizes = [1, 256], strides = [1, 1]} : vector<8x256xf32> to vector<1x256xf32>
    %215 = vector.broadcast %214 : vector<1x256xf32> to vector<8x256xf32>
    %216 = arith.mulf %213, %215 : vector<8x256xf32>
    %217 = arith.mulf %216, %167 : vector<8x256xf32>
    %218 = vector.extract_strided_slice %181 {offsets = [0, 0], sizes = [8, 32], strides = [1, 1]} : vector<8x256xf32> to vector<8x32xf32>
    %219 = vector.extract_strided_slice %181 {offsets = [0, 32], sizes = [8, 32], strides = [1, 1]} : vector<8x256xf32> to vector<8x32xf32>
    %220 = vector.extract_strided_slice %181 {offsets = [0, 64], sizes = [8, 32], strides = [1, 1]} : vector<8x256xf32> to vector<8x32xf32>
    %221 = vector.extract_strided_slice %181 {offsets = [0, 96], sizes = [8, 32], strides = [1, 1]} : vector<8x256xf32> to vector<8x32xf32>
    %222 = vector.extract_strided_slice %181 {offsets = [0, 128], sizes = [8, 32], strides = [1, 1]} : vector<8x256xf32> to vector<8x32xf32>
    %223 = vector.extract_strided_slice %181 {offsets = [0, 160], sizes = [8, 32], strides = [1, 1]} : vector<8x256xf32> to vector<8x32xf32>
    %224 = vector.extract_strided_slice %181 {offsets = [0, 192], sizes = [8, 32], strides = [1, 1]} : vector<8x256xf32> to vector<8x32xf32>
    %225 = vector.extract_strided_slice %181 {offsets = [0, 224], sizes = [8, 32], strides = [1, 1]} : vector<8x256xf32> to vector<8x32xf32>
    %226 = tpu.concatenate %219, %218, %221, %220, %223, %222, %225, %224 in 1 : vector<8x32xf32>, vector<8x32xf32>, vector<8x32xf32>, vector<8x32xf32>, vector<8x32xf32>, vector<8x32xf32>, vector<8x32xf32>, vector<8x32xf32> -> vector<8x256xf32>
    %227 = arith.addf %175, %226 : vector<8x256xf32>
    %228 = vector.extract_strided_slice %193 {offsets = [0, 0], sizes = [8, 32], strides = [1, 1]} : vector<8x256xf32> to vector<8x32xf32>
    %229 = vector.extract_strided_slice %193 {offsets = [0, 32], sizes = [8, 32], strides = [1, 1]} : vector<8x256xf32> to vector<8x32xf32>
    %230 = vector.extract_strided_slice %193 {offsets = [0, 64], sizes = [8, 32], strides = [1, 1]} : vector<8x256xf32> to vector<8x32xf32>
    %231 = vector.extract_strided_slice %193 {offsets = [0, 96], sizes = [8, 32], strides = [1, 1]} : vector<8x256xf32> to vector<8x32xf32>
    %232 = vector.extract_strided_slice %193 {offsets = [0, 128], sizes = [8, 32], strides = [1, 1]} : vector<8x256xf32> to vector<8x32xf32>
    %233 = vector.extract_strided_slice %193 {offsets = [0, 160], sizes = [8, 32], strides = [1, 1]} : vector<8x256xf32> to vector<8x32xf32>
    %234 = vector.extract_strided_slice %193 {offsets = [0, 192], sizes = [8, 32], strides = [1, 1]} : vector<8x256xf32> to vector<8x32xf32>
    %235 = vector.extract_strided_slice %193 {offsets = [0, 224], sizes = [8, 32], strides = [1, 1]} : vector<8x256xf32> to vector<8x32xf32>
    %236 = tpu.concatenate %229, %228, %231, %230, %233, %232, %235, %234 in 1 : vector<8x32xf32>, vector<8x32xf32>, vector<8x32xf32>, vector<8x32xf32>, vector<8x32xf32>, vector<8x32xf32>, vector<8x32xf32>, vector<8x32xf32> -> vector<8x256xf32>
    %237 = arith.addf %187, %236 : vector<8x256xf32>
    %238 = vector.extract_strided_slice %205 {offsets = [0, 0], sizes = [8, 32], strides = [1, 1]} : vector<8x256xf32> to vector<8x32xf32>
    %239 = vector.extract_strided_slice %205 {offsets = [0, 32], sizes = [8, 32], strides = [1, 1]} : vector<8x256xf32> to vector<8x32xf32>
    %240 = vector.extract_strided_slice %205 {offsets = [0, 64], sizes = [8, 32], strides = [1, 1]} : vector<8x256xf32> to vector<8x32xf32>
    %241 = vector.extract_strided_slice %205 {offsets = [0, 96], sizes = [8, 32], strides = [1, 1]} : vector<8x256xf32> to vector<8x32xf32>
    %242 = vector.extract_strided_slice %205 {offsets = [0, 128], sizes = [8, 32], strides = [1, 1]} : vector<8x256xf32> to vector<8x32xf32>
    %243 = vector.extract_strided_slice %205 {offsets = [0, 160], sizes = [8, 32], strides = [1, 1]} : vector<8x256xf32> to vector<8x32xf32>
    %244 = vector.extract_strided_slice %205 {offsets = [0, 192], sizes = [8, 32], strides = [1, 1]} : vector<8x256xf32> to vector<8x32xf32>
    %245 = vector.extract_strided_slice %205 {offsets = [0, 224], sizes = [8, 32], strides = [1, 1]} : vector<8x256xf32> to vector<8x32xf32>
    %246 = tpu.concatenate %239, %238, %241, %240, %243, %242, %245, %244 in 1 : vector<8x32xf32>, vector<8x32xf32>, vector<8x32xf32>, vector<8x32xf32>, vector<8x32xf32>, vector<8x32xf32>, vector<8x32xf32>, vector<8x32xf32> -> vector<8x256xf32>
    %247 = arith.addf %199, %246 : vector<8x256xf32>
    %248 = vector.extract_strided_slice %217 {offsets = [0, 0], sizes = [8, 32], strides = [1, 1]} : vector<8x256xf32> to vector<8x32xf32>
    %249 = vector.extract_strided_slice %217 {offsets = [0, 32], sizes = [8, 32], strides = [1, 1]} : vector<8x256xf32> to vector<8x32xf32>
    %250 = vector.extract_strided_slice %217 {offsets = [0, 64], sizes = [8, 32], strides = [1, 1]} : vector<8x256xf32> to vector<8x32xf32>
    %251 = vector.extract_strided_slice %217 {offsets = [0, 96], sizes = [8, 32], strides = [1, 1]} : vector<8x256xf32> to vector<8x32xf32>
    %252 = vector.extract_strided_slice %217 {offsets = [0, 128], sizes = [8, 32], strides = [1, 1]} : vector<8x256xf32> to vector<8x32xf32>
    %253 = vector.extract_strided_slice %217 {offsets = [0, 160], sizes = [8, 32], strides = [1, 1]} : vector<8x256xf32> to vector<8x32xf32>
    %254 = vector.extract_strided_slice %217 {offsets = [0, 192], sizes = [8, 32], strides = [1, 1]} : vector<8x256xf32> to vector<8x32xf32>
    %255 = vector.extract_strided_slice %217 {offsets = [0, 224], sizes = [8, 32], strides = [1, 1]} : vector<8x256xf32> to vector<8x32xf32>
    %256 = tpu.concatenate %249, %248, %251, %250, %253, %252, %255, %254 in 1 : vector<8x32xf32>, vector<8x32xf32>, vector<8x32xf32>, vector<8x32xf32>, vector<8x32xf32>, vector<8x32xf32>, vector<8x32xf32>, vector<8x32xf32> -> vector<8x256xf32>
    %257 = arith.addf %211, %256 : vector<8x256xf32>
    %258 = vector.extract_strided_slice %237 {offsets = [0, 0], sizes = [8, 64], strides = [1, 1]} : vector<8x256xf32> to vector<8x64xf32>
    %259 = vector.extract_strided_slice %237 {offsets = [0, 64], sizes = [8, 64], strides = [1, 1]} : vector<8x256xf32> to vector<8x64xf32>
    %260 = vector.extract_strided_slice %237 {offsets = [0, 128], sizes = [8, 64], strides = [1, 1]} : vector<8x256xf32> to vector<8x64xf32>
    %261 = vector.extract_strided_slice %237 {offsets = [0, 192], sizes = [8, 64], strides = [1, 1]} : vector<8x256xf32> to vector<8x64xf32>
    %262 = tpu.concatenate %259, %258, %261, %260 in 1 : vector<8x64xf32>, vector<8x64xf32>, vector<8x64xf32>, vector<8x64xf32> -> vector<8x256xf32>
    %263 = arith.addf %227, %262 : vector<8x256xf32>
    %264 = vector.extract_strided_slice %257 {offsets = [0, 0], sizes = [8, 64], strides = [1, 1]} : vector<8x256xf32> to vector<8x64xf32>
    %265 = vector.extract_strided_slice %257 {offsets = [0, 64], sizes = [8, 64], strides = [1, 1]} : vector<8x256xf32> to vector<8x64xf32>
    %266 = vector.extract_strided_slice %257 {offsets = [0, 128], sizes = [8, 64], strides = [1, 1]} : vector<8x256xf32> to vector<8x64xf32>
    %267 = vector.extract_strided_slice %257 {offsets = [0, 192], sizes = [8, 64], strides = [1, 1]} : vector<8x256xf32> to vector<8x64xf32>
    %268 = tpu.concatenate %265, %264, %267, %266 in 1 : vector<8x64xf32>, vector<8x64xf32>, vector<8x64xf32>, vector<8x64xf32> -> vector<8x256xf32>
    %269 = arith.addf %247, %268 : vector<8x256xf32>
    %270 = vector.extract_strided_slice %269 {offsets = [0, 0], sizes = [8, 128], strides = [1, 1]} : vector<8x256xf32> to vector<8x128xf32>
    %271 = vector.extract_strided_slice %269 {offsets = [0, 128], sizes = [8, 128], strides = [1, 1]} : vector<8x256xf32> to vector<8x128xf32>
    %272 = tpu.concatenate %271, %270 in 1 : vector<8x128xf32>, vector<8x128xf32> -> vector<8x256xf32>
    %273 = arith.addf %263, %272 : vector<8x256xf32>
    %274 = arith.addf %148, %273 : vector<8x256xf32>
    %cst_49 = arith.constant 0.707106769 : f32
    %275 = vector.broadcast %cst_49 : f32 to vector<8x256xf32>
    %276 = arith.mulf %274, %275 : vector<8x256xf32>
    %c2 = arith.constant 2 : index
    %c0_50 = arith.constant 0 : index
    %c0_51 = arith.constant 0 : index
    %277 = vector.load %arg5[%c2, %c0_50, %c0_51] : memref<4x256x256xf32, #tpu.memory_space<vmem>>, vector<1x256x256xf32>
    %278 = vector.shape_cast %277 : vector<1x256x256xf32> to vector<256x256xf32>
    %cst_52 = arith.constant dense<0.000000e+00> : vector<8x256xf32>
    %279 = tpu.matmul %276, %278, %cst_52 {dimension_numbers = #tpu.dot_dimension_numbers<[1], [0], [0], [1], [0, 0, 1, 1], [], []>} : vector<8x256xf32>, vector<256x256xf32>, vector<8x256xf32> -> vector<8x256xf32>
    %c2_53 = arith.constant 2 : index
    %c0_54 = arith.constant 0 : index
    %c0_55 = arith.constant 0 : index
    %280 = vector.load %arg6[%c2_53, %c0_54, %c0_55] : memref<4x1x256xf32, #tpu.memory_space<vmem>>, vector<1x1x256xf32>
    %281 = vector.shape_cast %280 : vector<1x1x256xf32> to vector<1x256xf32>
    %282 = vector.broadcast %281 : vector<1x256xf32> to vector<8x256xf32>
    %283 = arith.addf %279, %282 : vector<8x256xf32>
    %c2_56 = arith.constant 2 : index
    %c0_57 = arith.constant 0 : index
    %c0_58 = arith.constant 0 : index
    %284 = vector.load %arg7[%c2_56, %c0_57, %c0_58] : memref<4x256x256xf32, #tpu.memory_space<vmem>>, vector<1x256x256xf32>
    %285 = vector.shape_cast %284 : vector<1x256x256xf32> to vector<256x256xf32>
    %cst_59 = arith.constant dense<0.000000e+00> : vector<8x256xf32>
    %286 = tpu.matmul %276, %285, %cst_59 {dimension_numbers = #tpu.dot_dimension_numbers<[1], [0], [0], [1], [0, 0, 1, 1], [], []>} : vector<8x256xf32>, vector<256x256xf32>, vector<8x256xf32> -> vector<8x256xf32>
    %287 = arith.mulf %286, %286 : vector<8x256xf32>
    %cst_60 = arith.constant dense<0.000000e+00> : vector<8x256xf32>
    %288 = tpu.matmul %287, %6, %cst_60 {dimension_numbers = #tpu.dot_dimension_numbers<[1], [0], [0], [1], [0, 0, 1, 1], [], []>} : vector<8x256xf32>, vector<256x256xf32>, vector<8x256xf32> -> vector<8x256xf32>
    %289 = arith.mulf %288, %288 : vector<8x256xf32>
    %cst_61 = arith.constant 1.000000e-16 : f32
    %290 = vector.broadcast %cst_61 : f32 to vector<8x256xf32>
    %291 = arith.addf %289, %290 : vector<8x256xf32>
    %292 = math.sqrt %291 : vector<8x256xf32>
    %293 = math.sqrt %292 : vector<8x256xf32>
    %c2_62 = arith.constant 2 : index
    %c0_63 = arith.constant 0 : index
    %c0_64 = arith.constant 0 : index
    %294 = vector.load %arg8[%c2_62, %c0_63, %c0_64] : memref<4x1x256xf32, #tpu.memory_space<vmem>>, vector<1x1x256xf32>
    %295 = vector.shape_cast %294 : vector<1x1x256xf32> to vector<1x256xf32>
    %cst_65 = arith.constant 1.000000e+00 : f32
    %296 = vector.broadcast %cst_65 : f32 to vector<8x256xf32>
    %297 = arith.subf %293, %296 : vector<8x256xf32>
    %298 = vector.broadcast %295 : vector<1x256xf32> to vector<8x256xf32>
    %299 = arith.mulf %298, %297 : vector<8x256xf32>
    %cst_66 = arith.constant 1.000000e+00 : f32
    %300 = vector.broadcast %cst_66 : f32 to vector<8x256xf32>
    %301 = arith.addf %299, %300 : vector<8x256xf32>
    %302 = arith.divf %286, %301 : vector<8x256xf32>
    %c2_67 = arith.constant 2 : index
    %c0_68 = arith.constant 0 : index
    %c0_69 = arith.constant 0 : index
    %303 = vector.load %arg9[%c2_67, %c0_68, %c0_69] : memref<4x8x256xf32, #tpu.memory_space<vmem>>, vector<1x8x256xf32>
    %304 = vector.shape_cast %303 : vector<1x8x256xf32> to vector<8x256xf32>
    %305 = vector.extract_strided_slice %276 {offsets = [0, 0], sizes = [8, 32], strides = [1, 1]} : vector<8x256xf32> to vector<8x32xf32>
    %306 = tpu.concatenate %305, %305, %305, %305, %305, %305, %305, %305 in 1 : vector<8x32xf32>, vector<8x32xf32>, vector<8x32xf32>, vector<8x32xf32>, vector<8x32xf32>, vector<8x32xf32>, vector<8x32xf32>, vector<8x32xf32> -> vector<8x256xf32>
    %307 = vector.extract_strided_slice %304 {offsets = [0, 0], sizes = [1, 256], strides = [1, 1]} : vector<8x256xf32> to vector<1x256xf32>
    %308 = vector.broadcast %307 : vector<1x256xf32> to vector<8x256xf32>
    %309 = arith.mulf %306, %308 : vector<8x256xf32>
    %310 = arith.mulf %309, %302 : vector<8x256xf32>
    %311 = vector.extract_strided_slice %276 {offsets = [0, 32], sizes = [8, 32], strides = [1, 1]} : vector<8x256xf32> to vector<8x32xf32>
    %312 = tpu.concatenate %311, %311, %311, %311, %311, %311, %311, %311 in 1 : vector<8x32xf32>, vector<8x32xf32>, vector<8x32xf32>, vector<8x32xf32>, vector<8x32xf32>, vector<8x32xf32>, vector<8x32xf32>, vector<8x32xf32> -> vector<8x256xf32>
    %313 = vector.extract_strided_slice %304 {offsets = [1, 0], sizes = [1, 256], strides = [1, 1]} : vector<8x256xf32> to vector<1x256xf32>
    %314 = vector.broadcast %313 : vector<1x256xf32> to vector<8x256xf32>
    %315 = arith.mulf %312, %314 : vector<8x256xf32>
    %316 = arith.mulf %315, %302 : vector<8x256xf32>
    %317 = vector.extract_strided_slice %276 {offsets = [0, 64], sizes = [8, 32], strides = [1, 1]} : vector<8x256xf32> to vector<8x32xf32>
    %318 = tpu.concatenate %317, %317, %317, %317, %317, %317, %317, %317 in 1 : vector<8x32xf32>, vector<8x32xf32>, vector<8x32xf32>, vector<8x32xf32>, vector<8x32xf32>, vector<8x32xf32>, vector<8x32xf32>, vector<8x32xf32> -> vector<8x256xf32>
    %319 = vector.extract_strided_slice %304 {offsets = [2, 0], sizes = [1, 256], strides = [1, 1]} : vector<8x256xf32> to vector<1x256xf32>
    %320 = vector.broadcast %319 : vector<1x256xf32> to vector<8x256xf32>
    %321 = arith.mulf %318, %320 : vector<8x256xf32>
    %322 = arith.mulf %321, %302 : vector<8x256xf32>
    %323 = vector.extract_strided_slice %276 {offsets = [0, 96], sizes = [8, 32], strides = [1, 1]} : vector<8x256xf32> to vector<8x32xf32>
    %324 = tpu.concatenate %323, %323, %323, %323, %323, %323, %323, %323 in 1 : vector<8x32xf32>, vector<8x32xf32>, vector<8x32xf32>, vector<8x32xf32>, vector<8x32xf32>, vector<8x32xf32>, vector<8x32xf32>, vector<8x32xf32> -> vector<8x256xf32>
    %325 = vector.extract_strided_slice %304 {offsets = [3, 0], sizes = [1, 256], strides = [1, 1]} : vector<8x256xf32> to vector<1x256xf32>
    %326 = vector.broadcast %325 : vector<1x256xf32> to vector<8x256xf32>
    %327 = arith.mulf %324, %326 : vector<8x256xf32>
    %328 = arith.mulf %327, %302 : vector<8x256xf32>
    %329 = vector.extract_strided_slice %276 {offsets = [0, 128], sizes = [8, 32], strides = [1, 1]} : vector<8x256xf32> to vector<8x32xf32>
    %330 = tpu.concatenate %329, %329, %329, %329, %329, %329, %329, %329 in 1 : vector<8x32xf32>, vector<8x32xf32>, vector<8x32xf32>, vector<8x32xf32>, vector<8x32xf32>, vector<8x32xf32>, vector<8x32xf32>, vector<8x32xf32> -> vector<8x256xf32>
    %331 = vector.extract_strided_slice %304 {offsets = [4, 0], sizes = [1, 256], strides = [1, 1]} : vector<8x256xf32> to vector<1x256xf32>
    %332 = vector.broadcast %331 : vector<1x256xf32> to vector<8x256xf32>
    %333 = arith.mulf %330, %332 : vector<8x256xf32>
    %334 = arith.mulf %333, %302 : vector<8x256xf32>
    %335 = vector.extract_strided_slice %276 {offsets = [0, 160], sizes = [8, 32], strides = [1, 1]} : vector<8x256xf32> to vector<8x32xf32>
    %336 = tpu.concatenate %335, %335, %335, %335, %335, %335, %335, %335 in 1 : vector<8x32xf32>, vector<8x32xf32>, vector<8x32xf32>, vector<8x32xf32>, vector<8x32xf32>, vector<8x32xf32>, vector<8x32xf32>, vector<8x32xf32> -> vector<8x256xf32>
    %337 = vector.extract_strided_slice %304 {offsets = [5, 0], sizes = [1, 256], strides = [1, 1]} : vector<8x256xf32> to vector<1x256xf32>
    %338 = vector.broadcast %337 : vector<1x256xf32> to vector<8x256xf32>
    %339 = arith.mulf %336, %338 : vector<8x256xf32>
    %340 = arith.mulf %339, %302 : vector<8x256xf32>
    %341 = vector.extract_strided_slice %276 {offsets = [0, 192], sizes = [8, 32], strides = [1, 1]} : vector<8x256xf32> to vector<8x32xf32>
    %342 = tpu.concatenate %341, %341, %341, %341, %341, %341, %341, %341 in 1 : vector<8x32xf32>, vector<8x32xf32>, vector<8x32xf32>, vector<8x32xf32>, vector<8x32xf32>, vector<8x32xf32>, vector<8x32xf32>, vector<8x32xf32> -> vector<8x256xf32>
    %343 = vector.extract_strided_slice %304 {offsets = [6, 0], sizes = [1, 256], strides = [1, 1]} : vector<8x256xf32> to vector<1x256xf32>
    %344 = vector.broadcast %343 : vector<1x256xf32> to vector<8x256xf32>
    %345 = arith.mulf %342, %344 : vector<8x256xf32>
    %346 = arith.mulf %345, %302 : vector<8x256xf32>
    %347 = vector.extract_strided_slice %276 {offsets = [0, 224], sizes = [8, 32], strides = [1, 1]} : vector<8x256xf32> to vector<8x32xf32>
    %348 = tpu.concatenate %347, %347, %347, %347, %347, %347, %347, %347 in 1 : vector<8x32xf32>, vector<8x32xf32>, vector<8x32xf32>, vector<8x32xf32>, vector<8x32xf32>, vector<8x32xf32>, vector<8x32xf32>, vector<8x32xf32> -> vector<8x256xf32>
    %349 = vector.extract_strided_slice %304 {offsets = [7, 0], sizes = [1, 256], strides = [1, 1]} : vector<8x256xf32> to vector<1x256xf32>
    %350 = vector.broadcast %349 : vector<1x256xf32> to vector<8x256xf32>
    %351 = arith.mulf %348, %350 : vector<8x256xf32>
    %352 = arith.mulf %351, %302 : vector<8x256xf32>
    %353 = vector.extract_strided_slice %316 {offsets = [0, 0], sizes = [8, 32], strides = [1, 1]} : vector<8x256xf32> to vector<8x32xf32>
    %354 = vector.extract_strided_slice %316 {offsets = [0, 32], sizes = [8, 32], strides = [1, 1]} : vector<8x256xf32> to vector<8x32xf32>
    %355 = vector.extract_strided_slice %316 {offsets = [0, 64], sizes = [8, 32], strides = [1, 1]} : vector<8x256xf32> to vector<8x32xf32>
    %356 = vector.extract_strided_slice %316 {offsets = [0, 96], sizes = [8, 32], strides = [1, 1]} : vector<8x256xf32> to vector<8x32xf32>
    %357 = vector.extract_strided_slice %316 {offsets = [0, 128], sizes = [8, 32], strides = [1, 1]} : vector<8x256xf32> to vector<8x32xf32>
    %358 = vector.extract_strided_slice %316 {offsets = [0, 160], sizes = [8, 32], strides = [1, 1]} : vector<8x256xf32> to vector<8x32xf32>
    %359 = vector.extract_strided_slice %316 {offsets = [0, 192], sizes = [8, 32], strides = [1, 1]} : vector<8x256xf32> to vector<8x32xf32>
    %360 = vector.extract_strided_slice %316 {offsets = [0, 224], sizes = [8, 32], strides = [1, 1]} : vector<8x256xf32> to vector<8x32xf32>
    %361 = tpu.concatenate %354, %353, %356, %355, %358, %357, %360, %359 in 1 : vector<8x32xf32>, vector<8x32xf32>, vector<8x32xf32>, vector<8x32xf32>, vector<8x32xf32>, vector<8x32xf32>, vector<8x32xf32>, vector<8x32xf32> -> vector<8x256xf32>
    %362 = arith.addf %310, %361 : vector<8x256xf32>
    %363 = vector.extract_strided_slice %328 {offsets = [0, 0], sizes = [8, 32], strides = [1, 1]} : vector<8x256xf32> to vector<8x32xf32>
    %364 = vector.extract_strided_slice %328 {offsets = [0, 32], sizes = [8, 32], strides = [1, 1]} : vector<8x256xf32> to vector<8x32xf32>
    %365 = vector.extract_strided_slice %328 {offsets = [0, 64], sizes = [8, 32], strides = [1, 1]} : vector<8x256xf32> to vector<8x32xf32>
    %366 = vector.extract_strided_slice %328 {offsets = [0, 96], sizes = [8, 32], strides = [1, 1]} : vector<8x256xf32> to vector<8x32xf32>
    %367 = vector.extract_strided_slice %328 {offsets = [0, 128], sizes = [8, 32], strides = [1, 1]} : vector<8x256xf32> to vector<8x32xf32>
    %368 = vector.extract_strided_slice %328 {offsets = [0, 160], sizes = [8, 32], strides = [1, 1]} : vector<8x256xf32> to vector<8x32xf32>
    %369 = vector.extract_strided_slice %328 {offsets = [0, 192], sizes = [8, 32], strides = [1, 1]} : vector<8x256xf32> to vector<8x32xf32>
    %370 = vector.extract_strided_slice %328 {offsets = [0, 224], sizes = [8, 32], strides = [1, 1]} : vector<8x256xf32> to vector<8x32xf32>
    %371 = tpu.concatenate %364, %363, %366, %365, %368, %367, %370, %369 in 1 : vector<8x32xf32>, vector<8x32xf32>, vector<8x32xf32>, vector<8x32xf32>, vector<8x32xf32>, vector<8x32xf32>, vector<8x32xf32>, vector<8x32xf32> -> vector<8x256xf32>
    %372 = arith.addf %322, %371 : vector<8x256xf32>
    %373 = vector.extract_strided_slice %340 {offsets = [0, 0], sizes = [8, 32], strides = [1, 1]} : vector<8x256xf32> to vector<8x32xf32>
    %374 = vector.extract_strided_slice %340 {offsets = [0, 32], sizes = [8, 32], strides = [1, 1]} : vector<8x256xf32> to vector<8x32xf32>
    %375 = vector.extract_strided_slice %340 {offsets = [0, 64], sizes = [8, 32], strides = [1, 1]} : vector<8x256xf32> to vector<8x32xf32>
    %376 = vector.extract_strided_slice %340 {offsets = [0, 96], sizes = [8, 32], strides = [1, 1]} : vector<8x256xf32> to vector<8x32xf32>
    %377 = vector.extract_strided_slice %340 {offsets = [0, 128], sizes = [8, 32], strides = [1, 1]} : vector<8x256xf32> to vector<8x32xf32>
    %378 = vector.extract_strided_slice %340 {offsets = [0, 160], sizes = [8, 32], strides = [1, 1]} : vector<8x256xf32> to vector<8x32xf32>
    %379 = vector.extract_strided_slice %340 {offsets = [0, 192], sizes = [8, 32], strides = [1, 1]} : vector<8x256xf32> to vector<8x32xf32>
    %380 = vector.extract_strided_slice %340 {offsets = [0, 224], sizes = [8, 32], strides = [1, 1]} : vector<8x256xf32> to vector<8x32xf32>
    %381 = tpu.concatenate %374, %373, %376, %375, %378, %377, %380, %379 in 1 : vector<8x32xf32>, vector<8x32xf32>, vector<8x32xf32>, vector<8x32xf32>, vector<8x32xf32>, vector<8x32xf32>, vector<8x32xf32>, vector<8x32xf32> -> vector<8x256xf32>
    %382 = arith.addf %334, %381 : vector<8x256xf32>
    %383 = vector.extract_strided_slice %352 {offsets = [0, 0], sizes = [8, 32], strides = [1, 1]} : vector<8x256xf32> to vector<8x32xf32>
    %384 = vector.extract_strided_slice %352 {offsets = [0, 32], sizes = [8, 32], strides = [1, 1]} : vector<8x256xf32> to vector<8x32xf32>
    %385 = vector.extract_strided_slice %352 {offsets = [0, 64], sizes = [8, 32], strides = [1, 1]} : vector<8x256xf32> to vector<8x32xf32>
    %386 = vector.extract_strided_slice %352 {offsets = [0, 96], sizes = [8, 32], strides = [1, 1]} : vector<8x256xf32> to vector<8x32xf32>
    %387 = vector.extract_strided_slice %352 {offsets = [0, 128], sizes = [8, 32], strides = [1, 1]} : vector<8x256xf32> to vector<8x32xf32>
    %388 = vector.extract_strided_slice %352 {offsets = [0, 160], sizes = [8, 32], strides = [1, 1]} : vector<8x256xf32> to vector<8x32xf32>
    %389 = vector.extract_strided_slice %352 {offsets = [0, 192], sizes = [8, 32], strides = [1, 1]} : vector<8x256xf32> to vector<8x32xf32>
    %390 = vector.extract_strided_slice %352 {offsets = [0, 224], sizes = [8, 32], strides = [1, 1]} : vector<8x256xf32> to vector<8x32xf32>
    %391 = tpu.concatenate %384, %383, %386, %385, %388, %387, %390, %389 in 1 : vector<8x32xf32>, vector<8x32xf32>, vector<8x32xf32>, vector<8x32xf32>, vector<8x32xf32>, vector<8x32xf32>, vector<8x32xf32>, vector<8x32xf32> -> vector<8x256xf32>
    %392 = arith.addf %346, %391 : vector<8x256xf32>
    %393 = vector.extract_strided_slice %372 {offsets = [0, 0], sizes = [8, 64], strides = [1, 1]} : vector<8x256xf32> to vector<8x64xf32>
    %394 = vector.extract_strided_slice %372 {offsets = [0, 64], sizes = [8, 64], strides = [1, 1]} : vector<8x256xf32> to vector<8x64xf32>
    %395 = vector.extract_strided_slice %372 {offsets = [0, 128], sizes = [8, 64], strides = [1, 1]} : vector<8x256xf32> to vector<8x64xf32>
    %396 = vector.extract_strided_slice %372 {offsets = [0, 192], sizes = [8, 64], strides = [1, 1]} : vector<8x256xf32> to vector<8x64xf32>
    %397 = tpu.concatenate %394, %393, %396, %395 in 1 : vector<8x64xf32>, vector<8x64xf32>, vector<8x64xf32>, vector<8x64xf32> -> vector<8x256xf32>
    %398 = arith.addf %362, %397 : vector<8x256xf32>
    %399 = vector.extract_strided_slice %392 {offsets = [0, 0], sizes = [8, 64], strides = [1, 1]} : vector<8x256xf32> to vector<8x64xf32>
    %400 = vector.extract_strided_slice %392 {offsets = [0, 64], sizes = [8, 64], strides = [1, 1]} : vector<8x256xf32> to vector<8x64xf32>
    %401 = vector.extract_strided_slice %392 {offsets = [0, 128], sizes = [8, 64], strides = [1, 1]} : vector<8x256xf32> to vector<8x64xf32>
    %402 = vector.extract_strided_slice %392 {offsets = [0, 192], sizes = [8, 64], strides = [1, 1]} : vector<8x256xf32> to vector<8x64xf32>
    %403 = tpu.concatenate %400, %399, %402, %401 in 1 : vector<8x64xf32>, vector<8x64xf32>, vector<8x64xf32>, vector<8x64xf32> -> vector<8x256xf32>
    %404 = arith.addf %382, %403 : vector<8x256xf32>
    %405 = vector.extract_strided_slice %404 {offsets = [0, 0], sizes = [8, 128], strides = [1, 1]} : vector<8x256xf32> to vector<8x128xf32>
    %406 = vector.extract_strided_slice %404 {offsets = [0, 128], sizes = [8, 128], strides = [1, 1]} : vector<8x256xf32> to vector<8x128xf32>
    %407 = tpu.concatenate %406, %405 in 1 : vector<8x128xf32>, vector<8x128xf32> -> vector<8x256xf32>
    %408 = arith.addf %398, %407 : vector<8x256xf32>
    %409 = arith.addf %283, %408 : vector<8x256xf32>
    %cst_70 = arith.constant 0.707106769 : f32
    %410 = vector.broadcast %cst_70 : f32 to vector<8x256xf32>
    %411 = arith.mulf %409, %410 : vector<8x256xf32>
    %c3 = arith.constant 3 : index
    %c0_71 = arith.constant 0 : index
    %c0_72 = arith.constant 0 : index
    %412 = vector.load %arg5[%c3, %c0_71, %c0_72] : memref<4x256x256xf32, #tpu.memory_space<vmem>>, vector<1x256x256xf32>
    %413 = vector.shape_cast %412 : vector<1x256x256xf32> to vector<256x256xf32>
    %cst_73 = arith.constant dense<0.000000e+00> : vector<8x256xf32>
    %414 = tpu.matmul %411, %413, %cst_73 {dimension_numbers = #tpu.dot_dimension_numbers<[1], [0], [0], [1], [0, 0, 1, 1], [], []>} : vector<8x256xf32>, vector<256x256xf32>, vector<8x256xf32> -> vector<8x256xf32>
    %c3_74 = arith.constant 3 : index
    %c0_75 = arith.constant 0 : index
    %c0_76 = arith.constant 0 : index
    %415 = vector.load %arg6[%c3_74, %c0_75, %c0_76] : memref<4x1x256xf32, #tpu.memory_space<vmem>>, vector<1x1x256xf32>
    %416 = vector.shape_cast %415 : vector<1x1x256xf32> to vector<1x256xf32>
    %417 = vector.broadcast %416 : vector<1x256xf32> to vector<8x256xf32>
    %418 = arith.addf %414, %417 : vector<8x256xf32>
    %c3_77 = arith.constant 3 : index
    %c0_78 = arith.constant 0 : index
    %c0_79 = arith.constant 0 : index
    %419 = vector.load %arg7[%c3_77, %c0_78, %c0_79] : memref<4x256x256xf32, #tpu.memory_space<vmem>>, vector<1x256x256xf32>
    %420 = vector.shape_cast %419 : vector<1x256x256xf32> to vector<256x256xf32>
    %cst_80 = arith.constant dense<0.000000e+00> : vector<8x256xf32>
    %421 = tpu.matmul %411, %420, %cst_80 {dimension_numbers = #tpu.dot_dimension_numbers<[1], [0], [0], [1], [0, 0, 1, 1], [], []>} : vector<8x256xf32>, vector<256x256xf32>, vector<8x256xf32> -> vector<8x256xf32>
    %422 = arith.mulf %421, %421 : vector<8x256xf32>
    %cst_81 = arith.constant dense<0.000000e+00> : vector<8x256xf32>
    %423 = tpu.matmul %422, %6, %cst_81 {dimension_numbers = #tpu.dot_dimension_numbers<[1], [0], [0], [1], [0, 0, 1, 1], [], []>} : vector<8x256xf32>, vector<256x256xf32>, vector<8x256xf32> -> vector<8x256xf32>
    %424 = arith.mulf %423, %423 : vector<8x256xf32>
    %cst_82 = arith.constant 1.000000e-16 : f32
    %425 = vector.broadcast %cst_82 : f32 to vector<8x256xf32>
    %426 = arith.addf %424, %425 : vector<8x256xf32>
    %427 = math.sqrt %426 : vector<8x256xf32>
    %428 = math.sqrt %427 : vector<8x256xf32>
    %c3_83 = arith.constant 3 : index
    %c0_84 = arith.constant 0 : index
    %c0_85 = arith.constant 0 : index
    %429 = vector.load %arg8[%c3_83, %c0_84, %c0_85] : memref<4x1x256xf32, #tpu.memory_space<vmem>>, vector<1x1x256xf32>
    %430 = vector.shape_cast %429 : vector<1x1x256xf32> to vector<1x256xf32>
    %cst_86 = arith.constant 1.000000e+00 : f32
    %431 = vector.broadcast %cst_86 : f32 to vector<8x256xf32>
    %432 = arith.subf %428, %431 : vector<8x256xf32>
    %433 = vector.broadcast %430 : vector<1x256xf32> to vector<8x256xf32>
    %434 = arith.mulf %433, %432 : vector<8x256xf32>
    %cst_87 = arith.constant 1.000000e+00 : f32
    %435 = vector.broadcast %cst_87 : f32 to vector<8x256xf32>
    %436 = arith.addf %434, %435 : vector<8x256xf32>
    %437 = arith.divf %421, %436 : vector<8x256xf32>
    %c3_88 = arith.constant 3 : index
    %c0_89 = arith.constant 0 : index
    %c0_90 = arith.constant 0 : index
    %438 = vector.load %arg9[%c3_88, %c0_89, %c0_90] : memref<4x8x256xf32, #tpu.memory_space<vmem>>, vector<1x8x256xf32>
    %439 = vector.shape_cast %438 : vector<1x8x256xf32> to vector<8x256xf32>
    %440 = vector.extract_strided_slice %411 {offsets = [0, 0], sizes = [8, 32], strides = [1, 1]} : vector<8x256xf32> to vector<8x32xf32>
    %441 = tpu.concatenate %440, %440, %440, %440, %440, %440, %440, %440 in 1 : vector<8x32xf32>, vector<8x32xf32>, vector<8x32xf32>, vector<8x32xf32>, vector<8x32xf32>, vector<8x32xf32>, vector<8x32xf32>, vector<8x32xf32> -> vector<8x256xf32>
    %442 = vector.extract_strided_slice %439 {offsets = [0, 0], sizes = [1, 256], strides = [1, 1]} : vector<8x256xf32> to vector<1x256xf32>
    %443 = vector.broadcast %442 : vector<1x256xf32> to vector<8x256xf32>
    %444 = arith.mulf %441, %443 : vector<8x256xf32>
    %445 = arith.mulf %444, %437 : vector<8x256xf32>
    %446 = vector.extract_strided_slice %411 {offsets = [0, 32], sizes = [8, 32], strides = [1, 1]} : vector<8x256xf32> to vector<8x32xf32>
    %447 = tpu.concatenate %446, %446, %446, %446, %446, %446, %446, %446 in 1 : vector<8x32xf32>, vector<8x32xf32>, vector<8x32xf32>, vector<8x32xf32>, vector<8x32xf32>, vector<8x32xf32>, vector<8x32xf32>, vector<8x32xf32> -> vector<8x256xf32>
    %448 = vector.extract_strided_slice %439 {offsets = [1, 0], sizes = [1, 256], strides = [1, 1]} : vector<8x256xf32> to vector<1x256xf32>
    %449 = vector.broadcast %448 : vector<1x256xf32> to vector<8x256xf32>
    %450 = arith.mulf %447, %449 : vector<8x256xf32>
    %451 = arith.mulf %450, %437 : vector<8x256xf32>
    %452 = vector.extract_strided_slice %411 {offsets = [0, 64], sizes = [8, 32], strides = [1, 1]} : vector<8x256xf32> to vector<8x32xf32>
    %453 = tpu.concatenate %452, %452, %452, %452, %452, %452, %452, %452 in 1 : vector<8x32xf32>, vector<8x32xf32>, vector<8x32xf32>, vector<8x32xf32>, vector<8x32xf32>, vector<8x32xf32>, vector<8x32xf32>, vector<8x32xf32> -> vector<8x256xf32>
    %454 = vector.extract_strided_slice %439 {offsets = [2, 0], sizes = [1, 256], strides = [1, 1]} : vector<8x256xf32> to vector<1x256xf32>
    %455 = vector.broadcast %454 : vector<1x256xf32> to vector<8x256xf32>
    %456 = arith.mulf %453, %455 : vector<8x256xf32>
    %457 = arith.mulf %456, %437 : vector<8x256xf32>
    %458 = vector.extract_strided_slice %411 {offsets = [0, 96], sizes = [8, 32], strides = [1, 1]} : vector<8x256xf32> to vector<8x32xf32>
    %459 = tpu.concatenate %458, %458, %458, %458, %458, %458, %458, %458 in 1 : vector<8x32xf32>, vector<8x32xf32>, vector<8x32xf32>, vector<8x32xf32>, vector<8x32xf32>, vector<8x32xf32>, vector<8x32xf32>, vector<8x32xf32> -> vector<8x256xf32>
    %460 = vector.extract_strided_slice %439 {offsets = [3, 0], sizes = [1, 256], strides = [1, 1]} : vector<8x256xf32> to vector<1x256xf32>
    %461 = vector.broadcast %460 : vector<1x256xf32> to vector<8x256xf32>
    %462 = arith.mulf %459, %461 : vector<8x256xf32>
    %463 = arith.mulf %462, %437 : vector<8x256xf32>
    %464 = vector.extract_strided_slice %411 {offsets = [0, 128], sizes = [8, 32], strides = [1, 1]} : vector<8x256xf32> to vector<8x32xf32>
    %465 = tpu.concatenate %464, %464, %464, %464, %464, %464, %464, %464 in 1 : vector<8x32xf32>, vector<8x32xf32>, vector<8x32xf32>, vector<8x32xf32>, vector<8x32xf32>, vector<8x32xf32>, vector<8x32xf32>, vector<8x32xf32> -> vector<8x256xf32>
    %466 = vector.extract_strided_slice %439 {offsets = [4, 0], sizes = [1, 256], strides = [1, 1]} : vector<8x256xf32> to vector<1x256xf32>
    %467 = vector.broadcast %466 : vector<1x256xf32> to vector<8x256xf32>
    %468 = arith.mulf %465, %467 : vector<8x256xf32>
    %469 = arith.mulf %468, %437 : vector<8x256xf32>
    %470 = vector.extract_strided_slice %411 {offsets = [0, 160], sizes = [8, 32], strides = [1, 1]} : vector<8x256xf32> to vector<8x32xf32>
    %471 = tpu.concatenate %470, %470, %470, %470, %470, %470, %470, %470 in 1 : vector<8x32xf32>, vector<8x32xf32>, vector<8x32xf32>, vector<8x32xf32>, vector<8x32xf32>, vector<8x32xf32>, vector<8x32xf32>, vector<8x32xf32> -> vector<8x256xf32>
    %472 = vector.extract_strided_slice %439 {offsets = [5, 0], sizes = [1, 256], strides = [1, 1]} : vector<8x256xf32> to vector<1x256xf32>
    %473 = vector.broadcast %472 : vector<1x256xf32> to vector<8x256xf32>
    %474 = arith.mulf %471, %473 : vector<8x256xf32>
    %475 = arith.mulf %474, %437 : vector<8x256xf32>
    %476 = vector.extract_strided_slice %411 {offsets = [0, 192], sizes = [8, 32], strides = [1, 1]} : vector<8x256xf32> to vector<8x32xf32>
    %477 = tpu.concatenate %476, %476, %476, %476, %476, %476, %476, %476 in 1 : vector<8x32xf32>, vector<8x32xf32>, vector<8x32xf32>, vector<8x32xf32>, vector<8x32xf32>, vector<8x32xf32>, vector<8x32xf32>, vector<8x32xf32> -> vector<8x256xf32>
    %478 = vector.extract_strided_slice %439 {offsets = [6, 0], sizes = [1, 256], strides = [1, 1]} : vector<8x256xf32> to vector<1x256xf32>
    %479 = vector.broadcast %478 : vector<1x256xf32> to vector<8x256xf32>
    %480 = arith.mulf %477, %479 : vector<8x256xf32>
    %481 = arith.mulf %480, %437 : vector<8x256xf32>
    %482 = vector.extract_strided_slice %411 {offsets = [0, 224], sizes = [8, 32], strides = [1, 1]} : vector<8x256xf32> to vector<8x32xf32>
    %483 = tpu.concatenate %482, %482, %482, %482, %482, %482, %482, %482 in 1 : vector<8x32xf32>, vector<8x32xf32>, vector<8x32xf32>, vector<8x32xf32>, vector<8x32xf32>, vector<8x32xf32>, vector<8x32xf32>, vector<8x32xf32> -> vector<8x256xf32>
    %484 = vector.extract_strided_slice %439 {offsets = [7, 0], sizes = [1, 256], strides = [1, 1]} : vector<8x256xf32> to vector<1x256xf32>
    %485 = vector.broadcast %484 : vector<1x256xf32> to vector<8x256xf32>
    %486 = arith.mulf %483, %485 : vector<8x256xf32>
    %487 = arith.mulf %486, %437 : vector<8x256xf32>
    %488 = vector.extract_strided_slice %451 {offsets = [0, 0], sizes = [8, 32], strides = [1, 1]} : vector<8x256xf32> to vector<8x32xf32>
    %489 = vector.extract_strided_slice %451 {offsets = [0, 32], sizes = [8, 32], strides = [1, 1]} : vector<8x256xf32> to vector<8x32xf32>
    %490 = vector.extract_strided_slice %451 {offsets = [0, 64], sizes = [8, 32], strides = [1, 1]} : vector<8x256xf32> to vector<8x32xf32>
    %491 = vector.extract_strided_slice %451 {offsets = [0, 96], sizes = [8, 32], strides = [1, 1]} : vector<8x256xf32> to vector<8x32xf32>
    %492 = vector.extract_strided_slice %451 {offsets = [0, 128], sizes = [8, 32], strides = [1, 1]} : vector<8x256xf32> to vector<8x32xf32>
    %493 = vector.extract_strided_slice %451 {offsets = [0, 160], sizes = [8, 32], strides = [1, 1]} : vector<8x256xf32> to vector<8x32xf32>
    %494 = vector.extract_strided_slice %451 {offsets = [0, 192], sizes = [8, 32], strides = [1, 1]} : vector<8x256xf32> to vector<8x32xf32>
    %495 = vector.extract_strided_slice %451 {offsets = [0, 224], sizes = [8, 32], strides = [1, 1]} : vector<8x256xf32> to vector<8x32xf32>
    %496 = tpu.concatenate %489, %488, %491, %490, %493, %492, %495, %494 in 1 : vector<8x32xf32>, vector<8x32xf32>, vector<8x32xf32>, vector<8x32xf32>, vector<8x32xf32>, vector<8x32xf32>, vector<8x32xf32>, vector<8x32xf32> -> vector<8x256xf32>
    %497 = arith.addf %445, %496 : vector<8x256xf32>
    %498 = vector.extract_strided_slice %463 {offsets = [0, 0], sizes = [8, 32], strides = [1, 1]} : vector<8x256xf32> to vector<8x32xf32>
    %499 = vector.extract_strided_slice %463 {offsets = [0, 32], sizes = [8, 32], strides = [1, 1]} : vector<8x256xf32> to vector<8x32xf32>
    %500 = vector.extract_strided_slice %463 {offsets = [0, 64], sizes = [8, 32], strides = [1, 1]} : vector<8x256xf32> to vector<8x32xf32>
    %501 = vector.extract_strided_slice %463 {offsets = [0, 96], sizes = [8, 32], strides = [1, 1]} : vector<8x256xf32> to vector<8x32xf32>
    %502 = vector.extract_strided_slice %463 {offsets = [0, 128], sizes = [8, 32], strides = [1, 1]} : vector<8x256xf32> to vector<8x32xf32>
    %503 = vector.extract_strided_slice %463 {offsets = [0, 160], sizes = [8, 32], strides = [1, 1]} : vector<8x256xf32> to vector<8x32xf32>
    %504 = vector.extract_strided_slice %463 {offsets = [0, 192], sizes = [8, 32], strides = [1, 1]} : vector<8x256xf32> to vector<8x32xf32>
    %505 = vector.extract_strided_slice %463 {offsets = [0, 224], sizes = [8, 32], strides = [1, 1]} : vector<8x256xf32> to vector<8x32xf32>
    %506 = tpu.concatenate %499, %498, %501, %500, %503, %502, %505, %504 in 1 : vector<8x32xf32>, vector<8x32xf32>, vector<8x32xf32>, vector<8x32xf32>, vector<8x32xf32>, vector<8x32xf32>, vector<8x32xf32>, vector<8x32xf32> -> vector<8x256xf32>
    %507 = arith.addf %457, %506 : vector<8x256xf32>
    %508 = vector.extract_strided_slice %475 {offsets = [0, 0], sizes = [8, 32], strides = [1, 1]} : vector<8x256xf32> to vector<8x32xf32>
    %509 = vector.extract_strided_slice %475 {offsets = [0, 32], sizes = [8, 32], strides = [1, 1]} : vector<8x256xf32> to vector<8x32xf32>
    %510 = vector.extract_strided_slice %475 {offsets = [0, 64], sizes = [8, 32], strides = [1, 1]} : vector<8x256xf32> to vector<8x32xf32>
    %511 = vector.extract_strided_slice %475 {offsets = [0, 96], sizes = [8, 32], strides = [1, 1]} : vector<8x256xf32> to vector<8x32xf32>
    %512 = vector.extract_strided_slice %475 {offsets = [0, 128], sizes = [8, 32], strides = [1, 1]} : vector<8x256xf32> to vector<8x32xf32>
    %513 = vector.extract_strided_slice %475 {offsets = [0, 160], sizes = [8, 32], strides = [1, 1]} : vector<8x256xf32> to vector<8x32xf32>
    %514 = vector.extract_strided_slice %475 {offsets = [0, 192], sizes = [8, 32], strides = [1, 1]} : vector<8x256xf32> to vector<8x32xf32>
    %515 = vector.extract_strided_slice %475 {offsets = [0, 224], sizes = [8, 32], strides = [1, 1]} : vector<8x256xf32> to vector<8x32xf32>
    %516 = tpu.concatenate %509, %508, %511, %510, %513, %512, %515, %514 in 1 : vector<8x32xf32>, vector<8x32xf32>, vector<8x32xf32>, vector<8x32xf32>, vector<8x32xf32>, vector<8x32xf32>, vector<8x32xf32>, vector<8x32xf32> -> vector<8x256xf32>
    %517 = arith.addf %469, %516 : vector<8x256xf32>
    %518 = vector.extract_strided_slice %487 {offsets = [0, 0], sizes = [8, 32], strides = [1, 1]} : vector<8x256xf32> to vector<8x32xf32>
    %519 = vector.extract_strided_slice %487 {offsets = [0, 32], sizes = [8, 32], strides = [1, 1]} : vector<8x256xf32> to vector<8x32xf32>
    %520 = vector.extract_strided_slice %487 {offsets = [0, 64], sizes = [8, 32], strides = [1, 1]} : vector<8x256xf32> to vector<8x32xf32>
    %521 = vector.extract_strided_slice %487 {offsets = [0, 96], sizes = [8, 32], strides = [1, 1]} : vector<8x256xf32> to vector<8x32xf32>
    %522 = vector.extract_strided_slice %487 {offsets = [0, 128], sizes = [8, 32], strides = [1, 1]} : vector<8x256xf32> to vector<8x32xf32>
    %523 = vector.extract_strided_slice %487 {offsets = [0, 160], sizes = [8, 32], strides = [1, 1]} : vector<8x256xf32> to vector<8x32xf32>
    %524 = vector.extract_strided_slice %487 {offsets = [0, 192], sizes = [8, 32], strides = [1, 1]} : vector<8x256xf32> to vector<8x32xf32>
    %525 = vector.extract_strided_slice %487 {offsets = [0, 224], sizes = [8, 32], strides = [1, 1]} : vector<8x256xf32> to vector<8x32xf32>
    %526 = tpu.concatenate %519, %518, %521, %520, %523, %522, %525, %524 in 1 : vector<8x32xf32>, vector<8x32xf32>, vector<8x32xf32>, vector<8x32xf32>, vector<8x32xf32>, vector<8x32xf32>, vector<8x32xf32>, vector<8x32xf32> -> vector<8x256xf32>
    %527 = arith.addf %481, %526 : vector<8x256xf32>
    %528 = vector.extract_strided_slice %507 {offsets = [0, 0], sizes = [8, 64], strides = [1, 1]} : vector<8x256xf32> to vector<8x64xf32>
    %529 = vector.extract_strided_slice %507 {offsets = [0, 64], sizes = [8, 64], strides = [1, 1]} : vector<8x256xf32> to vector<8x64xf32>
    %530 = vector.extract_strided_slice %507 {offsets = [0, 128], sizes = [8, 64], strides = [1, 1]} : vector<8x256xf32> to vector<8x64xf32>
    %531 = vector.extract_strided_slice %507 {offsets = [0, 192], sizes = [8, 64], strides = [1, 1]} : vector<8x256xf32> to vector<8x64xf32>
    %532 = tpu.concatenate %529, %528, %531, %530 in 1 : vector<8x64xf32>, vector<8x64xf32>, vector<8x64xf32>, vector<8x64xf32> -> vector<8x256xf32>
    %533 = arith.addf %497, %532 : vector<8x256xf32>
    %534 = vector.extract_strided_slice %527 {offsets = [0, 0], sizes = [8, 64], strides = [1, 1]} : vector<8x256xf32> to vector<8x64xf32>
    %535 = vector.extract_strided_slice %527 {offsets = [0, 64], sizes = [8, 64], strides = [1, 1]} : vector<8x256xf32> to vector<8x64xf32>
    %536 = vector.extract_strided_slice %527 {offsets = [0, 128], sizes = [8, 64], strides = [1, 1]} : vector<8x256xf32> to vector<8x64xf32>
    %537 = vector.extract_strided_slice %527 {offsets = [0, 192], sizes = [8, 64], strides = [1, 1]} : vector<8x256xf32> to vector<8x64xf32>
    %538 = tpu.concatenate %535, %534, %537, %536 in 1 : vector<8x64xf32>, vector<8x64xf32>, vector<8x64xf32>, vector<8x64xf32> -> vector<8x256xf32>
    %539 = arith.addf %517, %538 : vector<8x256xf32>
    %540 = vector.extract_strided_slice %539 {offsets = [0, 0], sizes = [8, 128], strides = [1, 1]} : vector<8x256xf32> to vector<8x128xf32>
    %541 = vector.extract_strided_slice %539 {offsets = [0, 128], sizes = [8, 128], strides = [1, 1]} : vector<8x256xf32> to vector<8x128xf32>
    %542 = tpu.concatenate %541, %540 in 1 : vector<8x128xf32>, vector<8x128xf32> -> vector<8x256xf32>
    %543 = arith.addf %533, %542 : vector<8x256xf32>
    %544 = arith.addf %418, %543 : vector<8x256xf32>
    %cst_91 = arith.constant 0.707106769 : f32
    %545 = vector.broadcast %cst_91 : f32 to vector<8x256xf32>
    %546 = arith.mulf %544, %545 : vector<8x256xf32>
    %547 = arith.mulf %546, %546 : vector<8x256xf32>
    %c0_92 = arith.constant 0 : index
    %c0_93 = arith.constant 0 : index
    %548 = vector.load %arg11[%c0_92, %c0_93] : memref<256x32xf32, #tpu.memory_space<vmem>>, vector<256x32xf32>
    %cst_94 = arith.constant dense<0.000000e+00> : vector<8x32xf32>
    %549 = tpu.matmul %547, %548, %cst_94 {dimension_numbers = #tpu.dot_dimension_numbers<[1], [0], [0], [1], [0, 0, 1, 1], [], []>} : vector<8x256xf32>, vector<256x32xf32>, vector<8x32xf32> -> vector<8x32xf32>
    %550 = math.sqrt %549 : vector<8x32xf32>
    %c0_95 = arith.constant 0 : index
    %c0_96 = arith.constant 0 : index
    %551 = vector.load %arg12[%c0_95, %c0_96] : memref<32x32xf32, #tpu.memory_space<vmem>>, vector<32x32xf32>
    %cst_97 = arith.constant dense<0.000000e+00> : vector<8x32xf32>
    %552 = tpu.matmul %550, %551, %cst_97 {dimension_numbers = #tpu.dot_dimension_numbers<[1], [0], [0], [1], [0, 0, 1, 1], [], []>} : vector<8x32xf32>, vector<32x32xf32>, vector<8x32xf32> -> vector<8x32xf32>
    %c0_98 = arith.constant 0 : index
    %c0_99 = arith.constant 0 : index
    %553 = vector.load %arg13[%c0_98, %c0_99] : memref<1x32xf32, #tpu.memory_space<vmem>>, vector<1x32xf32>
    %554 = vector.broadcast %553 : vector<1x32xf32> to vector<8x32xf32>
    %555 = arith.addf %552, %554 : vector<8x32xf32>
    %556 = arith.negf %555 : vector<8x32xf32>
    %557 = math.exp %556 : vector<8x32xf32>
    %cst_100 = arith.constant 1.000000e+00 : f32
    %558 = vector.broadcast %cst_100 : f32 to vector<8x32xf32>
    %559 = arith.addf %558, %557 : vector<8x32xf32>
    %560 = arith.divf %558, %559 : vector<8x32xf32>
    %561 = arith.mulf %555, %560 : vector<8x32xf32>
    %c0_101 = arith.constant 0 : index
    %c0_102 = arith.constant 0 : index
    %562 = vector.load %arg14[%c0_101, %c0_102] : memref<1x32xf32, #tpu.memory_space<vmem>>, vector<1x32xf32>
    %cst_103 = arith.constant dense<0.000000e+00> : vector<1x8xf32>
    %563 = tpu.matmul %562, %561, %cst_103 {dimension_numbers = #tpu.dot_dimension_numbers<[1], [1], [0], [0], [0, 0, 1, 0], [], []>} : vector<1x32xf32>, vector<8x32xf32>, vector<1x8xf32> -> vector<1x8xf32>
    %c0_104 = arith.constant 0 : index
    %c0_105 = arith.constant 0 : index
    %564 = vector.load %arg15[%c0_104, %c0_105] : memref<1x1xf32, #tpu.memory_space<vmem>>, vector<1x1xf32>
    %565 = vector.broadcast %564 : vector<1x1xf32> to vector<1x8xf32>
    %566 = arith.addf %563, %565 : vector<1x8xf32>
    %c0_106 = arith.constant 0 : index
    %c0_107 = arith.constant 0 : index
    %c0_108 = arith.constant 0 : index
    %567 = vector.load %arg2[%c0_106, %c0_107, %c0_108] : memref<1x1x8xf32, #tpu.memory_space<vmem>>, vector<1x1x8xf32>
    %568 = vector.shape_cast %567 : vector<1x1x8xf32> to vector<1x8xf32>
    %569 = arith.subf %566, %568 : vector<1x8xf32>
    %570 = arith.mulf %569, %569 : vector<1x8xf32>
    %c0_109 = arith.constant 0 : index
    %c0_110 = arith.constant 0 : index
    %c0_111 = arith.constant 0 : index
    %571 = vector.load %arg16[%c0_109, %c0_110, %c0_111] : memref<1x1x8xf32, #tpu.memory_space<vmem>>, vector<1x1x8xf32>
    %572 = vector.shape_cast %571 : vector<1x1x8xf32> to vector<1x8xf32>
    %573 = vector.shape_cast %570 : vector<1x8xf32> to vector<1x1x8xf32>
    tpu.vector_store %arg16[%c0_109, %c0_110, %c0_111], %573 {strides = array<i32>} : memref<1x1x8xf32, #tpu.memory_space<vmem>>, vector<1x1x8xf32>,
    return
  }
  func.func @transform_0(%arg0: i32) -> (i32, i32) {
    %c0_i32 = arith.constant 0 : i32
    %c0_i32_0 = arith.constant 0 : i32
    return %arg0, %c0_i32 : i32, i32
  }
  func.func @transform_1(%arg0: i32) -> (i32, i32, i32) {
    %c0_i32 = arith.constant 0 : i32
    %c0_i32_0 = arith.constant 0 : i32
    %c0_i32_1 = arith.constant 0 : i32
    return %arg0, %c0_i32, %c0_i32_0 : i32, i32, i32
  }
  func.func @transform_2(%arg0: i32) -> (i32, i32) {
    %c0_i32 = arith.constant 0 : i32
    %c0_i32_0 = arith.constant 0 : i32
    %c0_i32_1 = arith.constant 0 : i32
    return %c0_i32, %c0_i32_0 : i32, i32
  }
  func.func @transform_3(%arg0: i32) -> (i32, i32) {
    %c0_i32 = arith.constant 0 : i32
    %c0_i32_0 = arith.constant 0 : i32
    %c0_i32_1 = arith.constant 0 : i32
    return %c0_i32, %c0_i32_0 : i32, i32
  }
  func.func @transform_4(%arg0: i32) -> (i32, i32, i32) {
    %c0_i32 = arith.constant 0 : i32
    %c0_i32_0 = arith.constant 0 : i32
    %c0_i32_1 = arith.constant 0 : i32
    %c0_i32_2 = arith.constant 0 : i32
    return %c0_i32, %c0_i32_0, %c0_i32_1 : i32, i32, i32
  }
  func.func @transform_5(%arg0: i32) -> (i32, i32, i32) {
    %c0_i32 = arith.constant 0 : i32
    %c0_i32_0 = arith.constant 0 : i32
    %c0_i32_1 = arith.constant 0 : i32
    %c0_i32_2 = arith.constant 0 : i32
    return %c0_i32, %c0_i32_0, %c0_i32_1 : i32, i32, i32
  }
  func.func @transform_6(%arg0: i32) -> (i32, i32, i32) {
    %c0_i32 = arith.constant 0 : i32
    %c0_i32_0 = arith.constant 0 : i32
    %c0_i32_1 = arith.constant 0 : i32
    %c0_i32_2 = arith.constant 0 : i32
    return %c0_i32, %c0_i32_0, %c0_i32_1 : i32, i32, i32
  }
  func.func @transform_7(%arg0: i32) -> (i32, i32, i32) {
    %c0_i32 = arith.constant 0 : i32
    %c0_i32_0 = arith.constant 0 : i32
    %c0_i32_1 = arith.constant 0 : i32
    %c0_i32_2 = arith.constant 0 : i32
    return %c0_i32, %c0_i32_0, %c0_i32_1 : i32, i32, i32
  }
  func.func @transform_8(%arg0: i32) -> (i32, i32, i32) {
    %c0_i32 = arith.constant 0 : i32
    %c0_i32_0 = arith.constant 0 : i32
    %c0_i32_1 = arith.constant 0 : i32
    %c0_i32_2 = arith.constant 0 : i32
    return %c0_i32, %c0_i32_0, %c0_i32_1 : i32, i32, i32
  }
  func.func @transform_9(%arg0: i32) -> (i32, i32) {
    %c0_i32 = arith.constant 0 : i32
    %c0_i32_0 = arith.constant 0 : i32
    %c0_i32_1 = arith.constant 0 : i32
    return %c0_i32, %c0_i32_0 : i32, i32
  }
  func.func @transform_10(%arg0: i32) -> (i32, i32) {
    %c0_i32 = arith.constant 0 : i32
    %c0_i32_0 = arith.constant 0 : i32
    %c0_i32_1 = arith.constant 0 : i32
    return %c0_i32, %c0_i32_0 : i32, i32
  }
  func.func @transform_11(%arg0: i32) -> (i32, i32) {
    %c0_i32 = arith.constant 0 : i32
    %c0_i32_0 = arith.constant 0 : i32
    %c0_i32_1 = arith.constant 0 : i32
    return %c0_i32, %c0_i32_0 : i32, i32
  }
  func.func @transform_12(%arg0: i32) -> (i32, i32) {
    %c0_i32 = arith.constant 0 : i32
    %c0_i32_0 = arith.constant 0 : i32
    %c0_i32_1 = arith.constant 0 : i32
    return %c0_i32, %c0_i32_0 : i32, i32
  }
  func.func @transform_13(%arg0: i32) -> (i32, i32) {
    %c0_i32 = arith.constant 0 : i32
    %c0_i32_0 = arith.constant 0 : i32
    %c0_i32_1 = arith.constant 0 : i32
    return %c0_i32, %c0_i32_0 : i32, i32
  }
  func.func @transform_14(%arg0: i32) -> (i32, i32) {
    %c0_i32 = arith.constant 0 : i32
    %c0_i32_0 = arith.constant 0 : i32
    %c0_i32_1 = arith.constant 0 : i32
    return %c0_i32, %c0_i32_0 : i32, i32
  }
  func.func @transform_15(%arg0: i32) -> (i32, i32, i32) {
    %c0_i32 = arith.constant 0 : i32
    %c0_i32_0 = arith.constant 0 : i32
    %c0_i32_1 = arith.constant 0 : i32
    return %arg0, %c0_i32, %c0_i32_0 : i32, i32, i32
  }
}

</mosaic_0001>

<bundles_post_ra>
// kernel: tpu_custom_call.1
= control target key start
LH: loop header
LB: loop body
LE: loop exit
PB: predicated region body
PF: predicated region fallthrough
CT: control target
= control target key end

     0   :  { %s5171_s0 = inlined_call_operand.hbm [shape: f32[8,128], index: 0, kind: input, shape index: {}]   ;;  %s5172_s1 = inlined_call_operand.vmem [shape: f32[1,1,8], index: 1, kind: input, shape index: {}]   ;;  %s5173_s2 = inlined_call_operand.vmem [shape: f32[128,256], index: 2, kind: input, shape index: {}]   ;;  %s5174_s3 = inlined_call_operand.vmem [shape: f32[1,256], index: 3, kind: input, shape index: {}]   ;;  %s5175_s4 = inlined_call_operand.hbm [shape: f32[4,256,256], index: 4, kind: input, shape index: {}]   ;;  %s5176_s5 = inlined_call_operand.vmem [shape: f32[4,1,256], index: 5, kind: input, shape index: {}]   ;;  %s5177_s6 = inlined_call_operand.hbm [shape: f32[4,256,256], index: 6, kind: input, shape index: {}]   ;;  %s5178_s7 = inlined_call_operand.hbm [shape: f32[4,1,256], index: 7, kind: input, shape index: {}]   ;;  %s5179_s8 = inlined_call_operand.vmem [shape: f32[4,8,256], index: 8, kind: input, shape index: {}]   ;;  %s5180_s9 = inlined_call_operand.hbm [shape: f32[256,256], index: 9, kind: input, shape index: {}]   ;;  %s5181_s10 = inlined_call_operand.vmem [shape: f32[256,32], index: 10, kind: input, shape index: {}]   ;;  %s5182_s11 = inlined_call_operand.hbm [shape: f32[32,32], index: 11, kind: input, shape index: {}]   ;;  %s5183_s12 = inlined_call_operand.vmem [shape: f32[1,32], index: 12, kind: input, shape index: {}]   ;;  %s5184_s13 = inlined_call_operand.vmem [shape: f32[1,32], index: 13, kind: input, shape index: {}]   ;;  %s5185_s14 = inlined_call_operand.<no memory space> [shape: f32[1,1], index: 14, kind: input, shape index: {}]   ;;  %s5186_s15 = inlined_call_operand.hbm [shape: f32[1,1,8], index: 15, kind: output, shape index: {}]  }
   0x1   :  { %v20_v0 = vstv %s5185_s14 }
   0x2   :  { %21 = vst [vmem:[#allocation2] sm:$0x1] %v20_v0 }
   0x3   :  { %22 = vsyncpa [#allocation4], 0 }
   0x4   :  { %23 = vsyncpa [#allocation7], 0 }
   0x5   :  { %24 = vsyncpa [#allocation10], 0 }
   0x6   :  { %25 = vsyncpa [#allocation13], 0 }
   0x7   :  { %26 = vsyncpa [#allocation5], 0  ;;  %s3798_s20 = smov [#allocation6]  }
   0x8   :  { %s48_s21 = sshll.u32 %s3798_s20, 4  ;;  %s49_s21 = int_to_ptr.vmem [resolvable:$true] %s48_s21 }
   0x9   :  { %s3656_s22 = scalar_lea.vmem %s49_s21, 32768  ;;  %p3661_p1 = scmp.lt.s32.totalorder %s49_s21, %s49_s21 }
   0xa   :  { %p3657_p0 = scmp.ne.s32.totalorder %s49_s21, %s3656_s22  ;;  %p3662_p2 = scmp.lt.s32.totalorder %s3656_s22, %s3656_s22 }
   0xc   :  { %p3663_p3 = por %p3662_p2, %p3661_p1 }
   0xe   :  { %p3664_p4 = pnand %p3663_p3, %p3657_p0 }
  0x10   :  { %3667 = shalt.err (!%p3664_p4)
}
  0x11   :  { %s3799_s23 = smov 256   ;;  %s3800_s24 = smov 16  }
  0x12   :  { %54 = dma.hbm_to_vmem [thread:$0]  %s5175_s4, 32768, %s49_s21, [#allocation7], %s3799_s23, %s3799_s23, %s3800_s24  }
  0x13   :  { %s3801_s26 = smov [#allocation9]  }
  0x14   :  { %s74_s27 = sshll.u32 %s3801_s26, 4  ;;  %s75_s27 = int_to_ptr.vmem [resolvable:$true] %s74_s27 }
  0x15   :  { %s3676_s28 = scalar_lea.vmem %s75_s27, 128  ;;  %p3681_p6 = scmp.lt.s32.totalorder %s75_s27, %s75_s27 }
  0x16   :  { %p3677_p5 = scmp.ne.s32.totalorder %s75_s27, %s3676_s28  ;;  %p3682_p7 = scmp.lt.s32.totalorder %s3676_s28, %s3676_s28 }
  0x18   :  { %p3683_p8 = por %p3682_p7, %p3681_p6 }
  0x1a   :  { %p3684_p9 = pnand %p3683_p8, %p3677_p5 }
  0x1c   :  { %3687 = shalt.err (!%p3684_p9)
}
  0x1d   :  { %s3802_s29 = smov 32   ;;  %s3803_s30 = smov 2  }
  0x1e   :  { %80 = dma.hbm_to_vmem [thread:$0]  %s5178_s7, 128, %s75_s27, [#allocation10], %s3802_s29, %s3802_s29, %s3803_s30  }
  0x1f   :  { %s3804_s18 = smov [#allocation3]   ;;  %s3805_s19 = smov [#allocation8]  }
  0x20   :  { %s33_s4 = sshll.u32 %s3804_s18, 4  ;;  %s62_s20 = sshll.u32 %s3805_s19, 4  ;;  %s34_s4 = int_to_ptr.vmem [resolvable:$true] %s33_s4  ;;  %s63_s20 = int_to_ptr.vmem [resolvable:$true] %s62_s20 }
  0x21   :  { %s3696_s21 = scalar_lea.vmem %s34_s4, 128  ;;  %p3701_p11 = scmp.lt.s32.totalorder %s34_s4, %s34_s4 }
  0x22   :  { %p3697_p10 = scmp.ne.s32.totalorder %s34_s4, %s3696_s21  ;;  %p3702_p12 = scmp.lt.s32.totalorder %s3696_s21, %s3696_s21 }
  0x24   :  { %p3703_p13 = por %p3702_p12, %p3701_p11 }
  0x26   :  { %p3704_p0 = pnand %p3703_p13, %p3697_p10 }
  0x28   :  { %3707 = shalt.err (!%p3704_p0)
}
  0x29   :  { %36 = dma.hbm_to_vmem [thread:$0]  %s5171_s0, 128, %s34_s4, [#allocation4]  }
  0x2a   :  { %s3716_s25 = scalar_lea.vmem %s63_s20, 32768  ;;  %p3721_p2 = scmp.lt.s32.totalorder %s63_s20, %s63_s20 }
  0x2b   :  { %p3717_p1 = scmp.ne.s32.totalorder %s63_s20, %s3716_s25  ;;  %p3722_p3 = scmp.lt.s32.totalorder %s3716_s25, %s3716_s25 }
  0x2d   :  { %p3723_p4 = por %p3722_p3, %p3721_p2 }
  0x2f   :  { %p3724_p5 = pnand %p3723_p4, %p3717_p1 }
  0x31   :  { %3727 = shalt.err (!%p3724_p5)
}
  0x32   :  { %68 = dma.hbm_to_vmem [thread:$0]  %s5177_s6, 32768, %s63_s20, [#allocation7], %s3799_s23, %s3799_s23, %s3800_s24  }
  0x33   :  { %s3806_s27 = smov [#allocation11]   ;;  %s3807_s30 = smov [#allocation12]  }
  0x34   :  { %s88_s28 = sshll.u32 %s3806_s27, 4  ;;  %s102_s16 = sshll.u32 %s3807_s30, 4  ;;  %s89_s28 = int_to_ptr.vmem [resolvable:$true] %s88_s28  ;;  %s103_s16 = int_to_ptr.vmem [resolvable:$true] %s102_s16 }
  0x35   :  { %s3736_s0 = scalar_lea.vmem %s89_s28, 8192  ;;  %p3741_p7 = scmp.lt.s32.totalorder %s89_s28, %s89_s28 }
  0x36   :  { %p3737_p6 = scmp.ne.s32.totalorder %s89_s28, %s3736_s0  ;;  %p3742_p8 = scmp.lt.s32.totalorder %s3736_s0, %s3736_s0 }
  0x38   :  { %p3743_p9 = por %p3742_p8, %p3741_p7 }
  0x3a   :  { %p3744_p10 = pnand %p3743_p9, %p3737_p6 }
  0x3c   :  { %3747 = shalt.err (!%p3744_p10)
}
  0x3d   :  { %94 = dma.hbm_to_vmem [thread:$0]  %s5180_s9, 8192, %s89_s28, [#allocation10], %s3799_s23, %s3799_s23, %s3800_s24  }
  0x3e   :  { %s3756_s6 = scalar_lea.vmem %s103_s16, 512  ;;  %p3761_p12 = scmp.lt.s32.totalorder %s103_s16, %s103_s16 }
  0x3f   :  { %p3757_p11 = scmp.ne.s32.totalorder %s103_s16, %s3756_s6  ;;  %p3762_p13 = scmp.lt.s32.totalorder %s3756_s6, %s3756_s6 }
  0x41   :  { %p3763_p0 = por %p3762_p13, %p3761_p12 }
  0x43   :  { %p3764_p1 = pnand %p3763_p0, %p3757_p11 }
  0x45   :  { %3767 = shalt.err (!%p3764_p1)
}
  0x46   :  { %s3808_s4 = smov 128   ;;  %s3809_s19 = smov 8  }
  0x47   :  { %108 = dma.hbm_to_vmem [thread:$0]  %s5182_s11, 512, %s103_s16, [#allocation13], %s3808_s4, %s3808_s4, %s3809_s19  }
  0x48   :  { %3788 = dma.done.wait [#allocation4], 128  }
  0x49   :  { %3789 = vsyncadd [#allocation4], 4294967168 }
  0x4a   :  { %3790 = dma.done.wait [#allocation7], 65536  }
  0x4b   :  { %3791 = vsyncadd [#allocation7], 4294901760 }
  0x4c   :  { %3792 = dma.done.wait [#allocation10], 8320  }
  0x4d   :  { %3793 = vsyncadd [#allocation10], 4294958976 }
  0x4e   :  { %3794 = dma.done.wait [#allocation13], 512  }
  0x4f   :  { %3795 = vsyncadd [#allocation13], 4294966784  ;;  %v3810_v1 = vmov 0.0   ;;  %v165_v2 = vld [vmem:[%s5173_s2 + $0xf8] sm:$0xff]  ;;  %v164_v3 = vld [vmem:[%s5173_s2 + $0xf0] sm:$0xff]  ;;  %s3812_s24 = smov 96  }
  0x50   :  { %242 = vmatprep.mubr.f32.mxu0 %v3810_v1  ;;  %v163_v4 = vld [vmem:[%s5173_s2 + $0xe8] sm:$0xff]  ;;  %178 = vmatprep.subr.mxu0 %v165_v2  ;;  %v162_v5 = vld [vmem:[%s5173_s2 + $0xe0] sm:$0xff]  ;;  %v161_v6 = vld [vmem:[%s5173_s2 + $0xd8] sm:$0xff]  ;;  %vm734_vm8 = vcmask 261120   ;;  %vm736_vm9 = vcmask 523264   ;;  %vm738_vm10 = vcmask 785408  }
  0x51   :  { %179 = vmatpush1.msra.mxu0 %v164_v3  ;;  %v160_v7 = vld [vmem:[%s5173_s2 + $0xd0] sm:$0xff]  ;;  %v159_v8 = vld [vmem:[%s5173_s2 + $0xc8] sm:$0xff]  ;;  %v158_v9 = vld [vmem:[%s5173_s2 + $0xc0] sm:$0xff]  ;;  %s3815_s23 = smov [#allocation14]  }
  0x52   :  { %180 = vmatprep.subr.mxu0 %v163_v4  ;;  %v157_v10 = vld [vmem:[%s5173_s2 + $0xb8] sm:$0xff]  ;;  %v156_v11 = vld [vmem:[%s5173_s2 + $0xb0] sm:$0xff]  ;;  %v155_v12 = vld [vmem:[%s5173_s2 + $0xa8] sm:$0xff]  ;;  %s3291_s22 = sshll.u32 %s3815_s23, 4  ;;  %s3292_s22 = int_to_ptr.vmem [resolvable:$true] %s3291_s22 }
  0x53   :  { %181 = vmatpush1.msra.mxu0 %v162_v5  ;;  %v154_v13 = vld [vmem:[%s5173_s2 + $0xa0] sm:$0xff]  ;;  %v153_v14 = vld [vmem:[%s5173_s2 + $0x98] sm:$0xff]  ;;  %v152_v15 = vld [vmem:[%s5173_s2 + $0x90] sm:$0xff]  ;;  %p3773_p3 = scmp.lt.s32.totalorder %s3292_s22, %s3292_s22 }
  0x54   :  { %182 = vmatprep.subr.mxu0 %v161_v6  ;;  %v344_v16 = vld [vmem:[#allocation6 + $0xf8] sm:$0xff]  ;;  %v343_v17 = vld [vmem:[#allocation6 + $0xf0] sm:$0xff]  ;;  %v342_v19 = vld [vmem:[#allocation6 + $0xe8] sm:$0xff] }
  0x55   :  { %183 = vmatpush1.msra.mxu0 %v160_v7  ;;  %v151_v18 = vld [vmem:[%s5173_s2 + $0x88] sm:$0xff]  ;;  %389 = vmatprep.subr.mxu1 %v344_v16  ;;  %v150_v20 = vld [vmem:[%s5173_s2 + $0x80] sm:$0xff]  ;;  %v149_v23 = vld [vmem:[%s5173_s2 + $0x78] sm:$0xff] }
  0x56   :  { %184 = vmatprep.subr.mxu0 %v159_v8  ;;  %390 = vmatpush1.msra.mxu1 %v343_v17  ;;  %v341_v21 = vld [vmem:[#allocation6 + $0xe0] sm:$0xff]  ;;  %v340_v22 = vld [vmem:[#allocation6 + $0xd8] sm:$0xff]  ;;  %v339_v24 = vld [vmem:[#allocation6 + $0xd0] sm:$0xff] }
  0x57   :  { %185 = vmatpush1.msra.mxu0 %v158_v9  ;;  %391 = vmatprep.subr.mxu1 %v342_v19  ;;  %v148_v25 = vld [vmem:[%s5173_s2 + $0x70] sm:$0xff]  ;;  %v147_v27 = vld [vmem:[%s5173_s2 + $0x68] sm:$0xff]  ;;  %v146_v29 = vld [vmem:[%s5173_s2 + $0x60] sm:$0xff] }
  0x58   :  { %186 = vmatprep.subr.mxu0 %v157_v10  ;;  %392 = vmatpush1.msra.mxu1 %v341_v21  ;;  %v338_v26 = vld [vmem:[#allocation6 + $0xc8] sm:$0xff]  ;;  %v337_v28 = vld [vmem:[#allocation6 + $0xc0] sm:$0xff]  ;;  %v336_v30 = vld [vmem:[#allocation6 + $0xb8] sm:$0xff] }
  0x59   :  { %187 = vmatpush1.msra.mxu0 %v156_v11  ;;  %393 = vmatprep.subr.mxu1 %v340_v22  ;;  %v145_v31 = vld [vmem:[%s5173_s2 + $0x58] sm:$0xff]  ;;  %v144_v33 = vld [vmem:[%s5173_s2 + $0x50] sm:$0xff]  ;;  %v143_v35 = vld [vmem:[%s5173_s2 + $0x48] sm:$0xff] }
  0x5a   :  { %188 = vmatprep.subr.mxu0 %v155_v12  ;;  %394 = vmatpush1.msra.mxu1 %v339_v24  ;;  %v335_v32 = vld [vmem:[#allocation6 + $0xb0] sm:$0xff]  ;;  %v334_v34 = vld [vmem:[#allocation6 + $0xa8] sm:$0xff]  ;;  %v333_v36 = vld [vmem:[#allocation6 + $0xa0] sm:$0xff] }
  0x5b   :  { %189 = vmatpush1.msra.mxu0 %v154_v13  ;;  %395 = vmatprep.subr.mxu1 %v338_v26  ;;  %v142_v37 = vld [vmem:[%s5173_s2 + $0x40] sm:$0xff]  ;;  %v141_v39 = vld [vmem:[%s5173_s2 + $0x38] sm:$0xff]  ;;  %v140_v41 = vld [vmem:[%s5173_s2 + $0x30] sm:$0xff] }
  0x5c   :  { %190 = vmatprep.subr.mxu0 %v153_v14  ;;  %396 = vmatpush1.msra.mxu1 %v337_v28  ;;  %v332_v38 = vld [vmem:[#allocation6 + $0x98] sm:$0xff]  ;;  %v331_v40 = vld [vmem:[#allocation6 + $0x90] sm:$0xff]  ;;  %v330_v42 = vld [vmem:[#allocation6 + $0x88] sm:$0xff] }
  0x5d   :  { %191 = vmatpush1.msra.mxu0 %v152_v15  ;;  %397 = vmatprep.subr.mxu1 %v336_v30  ;;  %v139_v43 = vld [vmem:[%s5173_s2 + $0x28] sm:$0xff]  ;;  %v138_v45 = vld [vmem:[%s5173_s2 + $0x20] sm:$0xff]  ;;  %v137_v47 = vld [vmem:[%s5173_s2 + $0x18] sm:$0xff] }
  0x5e   :  { %192 = vmatprep.subr.mxu0 %v151_v18  ;;  %398 = vmatpush1.msra.mxu1 %v335_v32  ;;  %v329_v44 = vld [vmem:[#allocation6 + $0x80] sm:$0xff]  ;;  %v328_v46 = vld [vmem:[#allocation6 + $0x78] sm:$0xff]  ;;  %v327_v48 = vld [vmem:[#allocation6 + $0x70] sm:$0xff] }
  0x5f   :  { %193 = vmatpush1.msra.mxu0 %v150_v20  ;;  %399 = vmatprep.subr.mxu1 %v334_v34  ;;  %v136_v49 = vld [vmem:[%s5173_s2 + $0x10] sm:$0xff]  ;;  %v135_v51 = vld [vmem:[%s5173_s2 + $0x8] sm:$0xff]  ;;  %v134_v53 = vld [vmem:[%s5173_s2] sm:$0xff] }
  0x60   :  { %194 = vmatprep.subr.mxu0 %v149_v23  ;;  %400 = vmatpush1.msra.mxu1 %v333_v36  ;;  %v326_v50 = vld [vmem:[#allocation6 + $0x68] sm:$0xff]  ;;  %v325_v52 = vld [vmem:[#allocation6 + $0x60] sm:$0xff]  ;;  %v324_v54 = vld [vmem:[#allocation6 + $0x58] sm:$0xff] }
  0x61   :  { %195 = vmatpush1.msra.mxu0 %v148_v25  ;;  %401 = vmatprep.subr.mxu1 %v332_v38  ;;  %v133_v55 = vld [vmem:[#allocation3] sm:$0xff]  ;;  %v490_v57 = vld [vmem:[#allocation8 + $0xf0] sm:$0xff]  ;;  %v489_v59 = vld [vmem:[#allocation8 + $0xe8] sm:$0xff] }
  0x62   :  { %196 = vmatprep.subr.mxu0 %v147_v27  ;;  %402 = vmatpush1.msra.mxu1 %v331_v40  ;;  %v491_v56 = vld [vmem:[#allocation8 + $0xf8] sm:$0xff]  ;;  %v323_v58 = vld [vmem:[#allocation6 + $0x50] sm:$0xff]  ;;  %v322_v60 = vld [vmem:[#allocation6 + $0x48] sm:$0xff] }
  0x63   :  { %197 = vmatpush1.msra.mxu0 %v146_v29  ;;  %403 = vmatprep.subr.mxu1 %v330_v42  ;;  %v488_v61 = vld [vmem:[#allocation8 + $0xe0] sm:$0xff]  ;;  %v487_v63 = vld [vmem:[#allocation8 + $0xd8] sm:$0xff]  ;;  %v486_v2 = vld [vmem:[#allocation8 + $0xd0] sm:$0xff] }
  0x64   :  { %198 = vmatprep.subr.mxu0 %v145_v31  ;;  %404 = vmatpush1.msra.mxu1 %v329_v44  ;;  %v321_v62 = vld [vmem:[#allocation6 + $0x40] sm:$0xff]  ;;  %v320_v0 = vld [vmem:[#allocation6 + $0x38] sm:$0xff]  ;;  %v319_v3 = vld [vmem:[#allocation6 + $0x30] sm:$0xff] }
  0x65   :  { %199 = vmatpush1.msra.mxu0 %v144_v33  ;;  %405 = vmatprep.subr.mxu1 %v328_v46  ;;  %v485_v4 = vld [vmem:[#allocation8 + $0xc8] sm:$0xff]  ;;  %v484_v6 = vld [vmem:[#allocation8 + $0xc0] sm:$0xff]  ;;  %v483_v8 = vld [vmem:[#allocation8 + $0xb8] sm:$0xff] }
  0x66   :  { %200 = vmatprep.subr.mxu0 %v143_v35  ;;  %406 = vmatpush1.msra.mxu1 %v327_v48  ;;  %v318_v5 = vld [vmem:[#allocation6 + $0x28] sm:$0xff]  ;;  %v317_v7 = vld [vmem:[#allocation6 + $0x20] sm:$0xff]  ;;  %v316_v9 = vld [vmem:[#allocation6 + $0x18] sm:$0xff] }
  0x67   :  { %201 = vmatpush1.msra.mxu0 %v142_v37  ;;  %407 = vmatprep.subr.mxu1 %v326_v50  ;;  %v482_v10 = vld [vmem:[#allocation8 + $0xb0] sm:$0xff]  ;;  %v481_v12 = vld [vmem:[#allocation8 + $0xa8] sm:$0xff]  ;;  %v480_v14 = vld [vmem:[#allocation8 + $0xa0] sm:$0xff] }
  0x68   :  { %202 = vmatprep.subr.mxu0 %v141_v39  ;;  %408 = vmatpush1.msra.mxu1 %v325_v52  ;;  %v315_v11 = vld [vmem:[#allocation6 + $0x10] sm:$0xff]  ;;  %v314_v13 = vld [vmem:[#allocation6 + $0x8] sm:$0xff]  ;;  %v313_v15 = vld [vmem:[#allocation6] sm:$0xff] }
  0x69   :  { %203 = vmatpush1.msra.mxu0 %v140_v41  ;;  %409 = vmatprep.subr.mxu1 %v324_v54  ;;  %v479_v16 = vld [vmem:[#allocation8 + $0x98] sm:$0xff]  ;;  %v478_v18 = vld [vmem:[#allocation8 + $0x90] sm:$0xff]  ;;  %v477_v20 = vld [vmem:[#allocation8 + $0x88] sm:$0xff] }
  0x6a   :  { %204 = vmatprep.subr.mxu0 %v139_v43  ;;  %410 = vmatpush1.msra.mxu1 %v323_v58  ;;  %v376_v17 = vld [vmem:[#allocation6 + $0x1f8] sm:$0xff]  ;;  %v375_v19 = vld [vmem:[#allocation6 + $0x1f0] sm:$0xff]  ;;  %v374_v21 = vld [vmem:[#allocation6 + $0x1e8] sm:$0xff] }
  0x6b   :  { %205 = vmatpush1.msra.mxu0 %v138_v45  ;;  %411 = vmatprep.subr.mxu1 %v322_v60  ;;  %v476_v22 = vld [vmem:[#allocation8 + $0x80] sm:$0xff]  ;;  %v475_v24 = vld [vmem:[#allocation8 + $0x78] sm:$0xff]  ;;  %v474_v26 = vld [vmem:[#allocation8 + $0x70] sm:$0xff] }
  0x6c   :  { %206 = vmatprep.subr.mxu0 %v137_v47  ;;  %412 = vmatpush1.msra.mxu1 %v321_v62  ;;  %v373_v23 = vld [vmem:[#allocation6 + $0x1e0] sm:$0xff]  ;;  %v372_v25 = vld [vmem:[#allocation6 + $0x1d8] sm:$0xff]  ;;  %v371_v27 = vld [vmem:[#allocation6 + $0x1d0] sm:$0xff] }
  0x6d   :  { %207 = vmatpush1.msra.mxu0 %v136_v49  ;;  %413 = vmatprep.subr.mxu1 %v320_v0  ;;  %v473_v28 = vld [vmem:[#allocation8 + $0x68] sm:$0xff]  ;;  %v472_v30 = vld [vmem:[#allocation8 + $0x60] sm:$0xff]  ;;  %v471_v32 = vld [vmem:[#allocation8 + $0x58] sm:$0xff] }
  0x6e   :  { %208 = vmatprep.subr.mxu0 %v135_v51  ;;  %414 = vmatpush1.msra.mxu1 %v319_v3  ;;  %v370_v29 = vld [vmem:[#allocation6 + $0x1c8] sm:$0xff]  ;;  %v369_v31 = vld [vmem:[#allocation6 + $0x1c0] sm:$0xff]  ;;  %v368_v33 = vld [vmem:[#allocation6 + $0x1b8] sm:$0xff] }
  0x6f   :  { %209 = vmatpush1.msra.mxu0 %v134_v53  ;;  %415 = vmatprep.subr.mxu1 %v318_v5  ;;  %v470_v34 = vld [vmem:[#allocation8 + $0x50] sm:$0xff]  ;;  %v469_v36 = vld [vmem:[#allocation8 + $0x48] sm:$0xff]  ;;  %v468_v38 = vld [vmem:[#allocation8 + $0x40] sm:$0xff] }
  0x70   :  { %243 = vmatmul.mubr.f32.vlgmr.msra.gmra.mxu0 %v133_v55  ;;  %524 = vmatprep.subr.mxu0 %v491_v56  ;;  %v367_v35 = vld [vmem:[#allocation6 + $0x1b0] sm:$0xff]  ;;  %v366_v37 = vld [vmem:[#allocation6 + $0x1a8] sm:$0xff]  ;;  %v365_v39 = vld [vmem:[#allocation6 + $0x1a0] sm:$0xff] }
  0x71   :  { %525 = vmatpush1.msra.mxu0 %v490_v57  ;;  %416 = vmatpush1.msra.mxu1 %v317_v7  ;;  %v467_v40 = vld [vmem:[#allocation8 + $0x38] sm:$0xff]  ;;  %v466_v42 = vld [vmem:[#allocation8 + $0x30] sm:$0xff]  ;;  %v465_v44 = vld [vmem:[#allocation8 + $0x28] sm:$0xff] }
  0x72   :  { %526 = vmatprep.subr.mxu0 %v489_v59  ;;  %417 = vmatprep.subr.mxu1 %v316_v9  ;;  %v364_v41 = vld [vmem:[#allocation6 + $0x198] sm:$0xff]  ;;  %v363_v43 = vld [vmem:[#allocation6 + $0x190] sm:$0xff]  ;;  %v362_v45 = vld [vmem:[#allocation6 + $0x188] sm:$0xff] }
  0x73   :  { %527 = vmatpush1.msra.mxu0 %v488_v61  ;;  %418 = vmatpush1.msra.mxu1 %v315_v11  ;;  %v464_v46 = vld [vmem:[#allocation8 + $0x20] sm:$0xff]  ;;  %v463_v48 = vld [vmem:[#allocation8 + $0x18] sm:$0xff]  ;;  %v462_v50 = vld [vmem:[#allocation8 + $0x10] sm:$0xff] }
  0x74   :  { %528 = vmatprep.subr.mxu0 %v487_v63  ;;  %419 = vmatprep.subr.mxu1 %v314_v13  ;;  %v361_v47 = vld [vmem:[#allocation6 + $0x180] sm:$0xff]  ;;  %v360_v49 = vld [vmem:[#allocation6 + $0x178] sm:$0xff]  ;;  %v359_v51 = vld [vmem:[#allocation6 + $0x170] sm:$0xff] }
  0x75   :  { %529 = vmatpush1.msra.mxu0 %v486_v2  ;;  %420 = vmatpush1.msra.mxu1 %v313_v15  ;;  %v461_v52 = vld [vmem:[#allocation8 + $0x8] sm:$0xff]  ;;  %v460_v54 = vld [vmem:[#allocation8] sm:$0xff]  ;;  %v523_v56 = vld [vmem:[#allocation8 + $0x1f8] sm:$0xff] }
  0x76   :  { %530 = vmatprep.subr.mxu0 %v485_v4  ;;  %421 = vmatprep.subr.mxu1 %v376_v17  ;;  %v358_v53 = vld [vmem:[#allocation6 + $0x168] sm:$0xff]  ;;  %v357_v55 = vld [vmem:[#allocation6 + $0x160] sm:$0xff]  ;;  %v356_v57 = vld [vmem:[#allocation6 + $0x158] sm:$0xff] }
  0x77   :  { %531 = vmatpush1.msra.mxu0 %v484_v6  ;;  %422 = vmatpush2.msra.mxu1 %v375_v19  ;;  %v522_v58 = vld [vmem:[#allocation8 + $0x1f0] sm:$0xff]  ;;  %v521_v60 = vld [vmem:[#allocation8 + $0x1e8] sm:$0xff]  ;;  %v520_v62 = vld [vmem:[#allocation8 + $0x1e0] sm:$0xff] }
  0x78   :  { %532 = vmatprep.subr.mxu0 %v483_v8  ;;  %423 = vmatprep.subr.mxu1 %v374_v21  ;;  %v355_v59 = vld [vmem:[#allocation6 + $0x150] sm:$0xff]  ;;  %v354_v61 = vld [vmem:[#allocation6 + $0x148] sm:$0xff]  ;;  %v353_v63 = vld [vmem:[#allocation6 + $0x140] sm:$0xff] }
  0x79   :  { %533 = vmatpush1.msra.mxu0 %v482_v10  ;;  %424 = vmatpush2.msra.mxu1 %v373_v23  ;;  %v519_v0 = vld [vmem:[#allocation8 + $0x1d8] sm:$0xff]  ;;  %v518_v3 = vld [vmem:[#allocation8 + $0x1d0] sm:$0xff]  ;;  %v517_v5 = vld [vmem:[#allocation8 + $0x1c8] sm:$0xff] }
  0x7a   :  { %534 = vmatprep.subr.mxu0 %v481_v12  ;;  %425 = vmatprep.subr.mxu1 %v372_v25  ;;  %v352_v2 = vld [vmem:[#allocation6 + $0x138] sm:$0xff]  ;;  %v351_v4 = vld [vmem:[#allocation6 + $0x130] sm:$0xff]  ;;  %v516_v6 = vld [vmem:[#allocation8 + $0x1c0] sm:$0xff] }
  0x7b   :  { %535 = vmatpush1.msra.mxu0 %v480_v14  ;;  %426 = vmatpush2.msra.mxu1 %v371_v27  ;;  %v515_v7 = vld [vmem:[#allocation8 + $0x1b8] sm:$0xff]  ;;  %v514_v8 = vld [vmem:[#allocation8 + $0x1b0] sm:$0xff]  ;;  %v513_v9 = vld [vmem:[#allocation8 + $0x1a8] sm:$0xff] }
  0x7c   :  { %536 = vmatprep.subr.mxu0 %v479_v16  ;;  %427 = vmatprep.subr.mxu1 %v370_v29  ;;  %v512_v10 = vld [vmem:[#allocation8 + $0x1a0] sm:$0xff]  ;;  %v511_v11 = vld [vmem:[#allocation8 + $0x198] sm:$0xff]  ;;  %v510_v12 = vld [vmem:[#allocation8 + $0x190] sm:$0xff] }
  0x7d   :  { %537 = vmatpush1.msra.mxu0 %v478_v18  ;;  %428 = vmatpush2.msra.mxu1 %v369_v31  ;;  %v509_v13 = vld [vmem:[#allocation8 + $0x188] sm:$0xff]  ;;  %v508_v14 = vld [vmem:[#allocation8 + $0x180] sm:$0xff]  ;;  %v507_v15 = vld [vmem:[#allocation8 + $0x178] sm:$0xff] }
  0x7e   :  { %538 = vmatprep.subr.mxu0 %v477_v20  ;;  %429 = vmatprep.subr.mxu1 %v368_v33  ;;  %v506_v16 = vld [vmem:[#allocation8 + $0x170] sm:$0xff]  ;;  %v505_v17 = vld [vmem:[#allocation8 + $0x168] sm:$0xff]  ;;  %v504_v18 = vld [vmem:[#allocation8 + $0x160] sm:$0xff] }
  0x7f   :  { %539 = vmatpush1.msra.mxu0 %v476_v22  ;;  %430 = vmatpush2.msra.mxu1 %v367_v35  ;;  %v503_v19 = vld [vmem:[#allocation8 + $0x158] sm:$0xff]  ;;  %v502_v20 = vld [vmem:[#allocation8 + $0x150] sm:$0xff]  ;;  %v501_v21 = vld [vmem:[#allocation8 + $0x148] sm:$0xff] }
  0x80   :  { %540 = vmatprep.subr.mxu0 %v475_v24  ;;  %431 = vmatprep.subr.mxu1 %v366_v37  ;;  %v500_v22 = vld [vmem:[#allocation8 + $0x140] sm:$0xff]  ;;  %v499_v23 = vld [vmem:[#allocation8 + $0x138] sm:$0xff]  ;;  %v498_v24 = vld [vmem:[#allocation8 + $0x130] sm:$0xff]  ;;  %v168_v37 = vlaneseq }
  0x81   :  { %541 = vmatpush1.msra.mxu0 %v474_v26  ;;  %432 = vmatpush2.msra.mxu1 %v365_v39  ;;  %v350_v25 = vld [vmem:[#allocation6 + $0x128] sm:$0xff]  ;;  %v349_v27 = vld [vmem:[#allocation6 + $0x120] sm:$0xff]  ;;  %v348_v29 = vld [vmem:[#allocation6 + $0x118] sm:$0xff] }
  0x82   :  { %542 = vmatprep.subr.mxu0 %v473_v28  ;;  %433 = vmatprep.subr.mxu1 %v364_v41  ;;  %v497_v26 = vld [vmem:[#allocation8 + $0x128] sm:$0xff]  ;;  %v496_v28 = vld [vmem:[#allocation8 + $0x120] sm:$0xff]  ;;  %v347_v31 = vld [vmem:[#allocation6 + $0x110] sm:$0xff] }
  0x83   :  { %543 = vmatpush1.msra.mxu0 %v472_v30  ;;  %434 = vmatpush2.msra.mxu1 %v363_v43  ;;  %v495_v30 = vld [vmem:[#allocation8 + $0x118] sm:$0xff]  ;;  %v346_v33 = vld [vmem:[#allocation6 + $0x108] sm:$0xff]  ;;  %v345_v35 = vld [vmem:[#allocation6 + $0x100] sm:$0xff] }
  0x84   :  { %544 = vmatprep.subr.mxu0 %v471_v32  ;;  %435 = vmatprep.subr.mxu1 %v362_v45  ;;  %v494_v32 = vld [vmem:[#allocation8 + $0x110] sm:$0xff] }
  0x85   :  { %545 = vmatpush1.msra.mxu0 %v470_v34  ;;  %436 = vmatpush2.msra.mxu1 %v361_v47  ;;  %v493_v34 = vld [vmem:[#allocation8 + $0x108] sm:$0xff] }
  0x86   :  { %546 = vmatprep.subr.mxu0 %v469_v36  ;;  %437 = vmatprep.subr.mxu1 %v360_v49  ;;  %v492_v36 = vld [vmem:[#allocation8 + $0x100] sm:$0xff]  ;;  %v279_v49 = vld [vmem:[#allocation11 + $0xf0] sm:$0xff] }
  0x87   :  { %547 = vmatpush1.msra.mxu0 %v468_v38  ;;  %438 = vmatpush2.msra.mxu1 %v359_v51  ;;  %v4025_v38 = vshrl.u32 %v168_v37, 7  ;;  %v277_v51 = vld [vmem:[#allocation11 + $0xe0] sm:$0xff]  ;;  %v292_v37 = vld [vmem:[#allocation11 + $0x158] sm:$0xff] }
  0x88   :  { %548 = vmatprep.subr.mxu0 %v467_v40  ;;  %439 = vmatprep.subr.mxu1 %v358_v53  ;;  %v166_v40 = vld [vmem:[%s5174_s3] sm:$0x3]  ;;  %s3811_s3 = smov 64  }
  0x89   :  { %549 = vmatpush1.msra.mxu0 %v466_v42  ;;  %440 = vmatpush2.msra.mxu1 %v357_v55  ;;  %v4028_v39 = vsub.s32 0, %v4025_v38  ;;  %v4034_v41 = vsub.s32 1, %v4025_v38  ;;  %v275_v53 = vld [vmem:[#allocation11 + $0xd0] sm:$0xff]  ;;  %v273_v55 = vld [vmem:[#allocation11 + $0xc0] sm:$0xff] }
  0x8a   :  { %550 = vmatprep.subr.mxu0 %v465_v44  ;;  %441 = vmatprep.subr.mxu1 %v356_v57  ;;  %v271_v57 = vld [vmem:[#allocation11 + $0xb0] sm:$0xff] }
  0x8b   :  { %551 = vmatpush1.msra.mxu0 %v464_v46  ;;  %442 = vmatpush2.msra.mxu1 %v355_v59  ;;  %v171_v42 = vrot.slane %v166_v40, %v4028_v39  ;;  %v175_v43 = vrot.slane %v166_v40, %v4034_v41  ;;  %v280_v46 = vld [vmem:[#allocation11 + $0xf8] sm:$0xff]  ;;  %v269_v59 = vld [vmem:[#allocation11 + $0xa0] sm:$0xff]  ;;  %v291_v40 = vld [vmem:[#allocation11 + $0x150] sm:$0xff] }
  0x8c   :  { %552 = vmatprep.subr.mxu0 %v463_v48  ;;  %443 = vmatprep.subr.mxu1 %v354_v61  ;;  %v267_v61 = vld [vmem:[#allocation11 + $0x90] sm:$0xff] }
  0x8d   :  { %553 = vmatpush1.msra.mxu0 %v462_v50  ;;  %444 = vmatpush2.msra.mxu1 %v353_v63  ;;  %v278_v50 = vld [vmem:[#allocation11 + $0xe8] sm:$0xff]  ;;  %v265_v63 = vld [vmem:[#allocation11 + $0x80] sm:$0xff] }
  0x8e   :  { %554 = vmatprep.subr.mxu0 %v461_v52  ;;  %445 = vmatprep.subr.mxu1 %v352_v2  ;;  %v276_v52 = vld [vmem:[#allocation11 + $0xd8] sm:$0xff]  ;;  %v263_v2 = vld [vmem:[#allocation11 + $0x70] sm:$0xff] }
  0x8f   :  { %555 = vmatpush1.msra.mxu0 %v460_v54  ;;  %446 = vmatpush2.msra.mxu1 %v351_v4  ;;  %v274_v54 = vld [vmem:[#allocation11 + $0xc8] sm:$0xff]  ;;  %v261_v4 = vld [vmem:[#allocation11 + $0x60] sm:$0xff] }
  0x90   :  { %556 = vmatprep.subr.mxu0 %v523_v56  ;;  %447 = vmatprep.subr.mxu1 %v350_v25  ;;  %v272_v56 = vld [vmem:[#allocation11 + $0xb8] sm:$0xff] }
  0x91   :  { %557 = vmatpush2.msra.mxu0 %v522_v58  ;;  %448 = vmatpush2.msra.mxu1 %v349_v27  ;;  %v270_v58 = vld [vmem:[#allocation11 + $0xa8] sm:$0xff]  ;;  %v304_v25 = vld [vmem:[#allocation11 + $0x1b8] sm:$0xff] }
  0x92   :  { %558 = vmatprep.subr.mxu0 %v521_v60  ;;  %449 = vmatprep.subr.mxu1 %v348_v29  ;;  %v268_v60 = vld [vmem:[#allocation11 + $0x98] sm:$0xff]  ;;  %v302_v27 = vld [vmem:[#allocation11 + $0x1a8] sm:$0xff] }
  0x93   :  { %559 = vmatpush2.msra.mxu0 %v520_v62  ;;  %450 = vmatpush2.msra.mxu1 %v347_v31  ;;  %v266_v62 = vld [vmem:[#allocation11 + $0x88] sm:$0xff]  ;;  %v300_v29 = vld [vmem:[#allocation11 + $0x198] sm:$0xff] }
  0x94   :  { %560 = vmatprep.subr.mxu0 %v519_v0  ;;  %451 = vmatprep.subr.mxu1 %v346_v33  ;;  %v264_v0 = vld [vmem:[#allocation11 + $0x78] sm:$0xff]  ;;  %v298_v31 = vld [vmem:[#allocation11 + $0x188] sm:$0xff] }
  0x95   :  { %561 = vmatpush2.msra.mxu0 %v518_v3  ;;  %452 = vmatpush2.msra.mxu1 %v345_v35  ;;  %v262_v3 = vld [vmem:[#allocation11 + $0x68] sm:$0xff]  ;;  %v296_v33 = vld [vmem:[#allocation11 + $0x178] sm:$0xff] }
  0x96   :  { %562 = vmatprep.subr.mxu0 %v517_v5  ;;  %597 = vmatprep.subr.mxu1 %v280_v46  ;;  %v260_v5 = vld [vmem:[#allocation11 + $0x58] sm:$0xff]  ;;  %v294_v35 = vld [vmem:[#allocation11 + $0x168] sm:$0xff]  ;;  %v287_v46 = vld [vmem:[#allocation11 + $0x130] sm:$0xff] }
  0x97   :  { %563 = vmatpush2.msra.mxu0 %v516_v6  ;;  %v259_v6 = vld [vmem:[#allocation11 + $0x50] sm:$0xff] }
  0x98   :  { %564 = vmatprep.subr.mxu0 %v515_v7  ;;  %v258_v7 = vld [vmem:[#allocation11 + $0x48] sm:$0xff] }
  0x99   :  { %565 = vmatpush2.msra.mxu0 %v514_v8  ;;  %v257_v8 = vld [vmem:[#allocation11 + $0x40] sm:$0xff] }
  0x9a   :  { %566 = vmatprep.subr.mxu0 %v513_v9  ;;  %v256_v9 = vld [vmem:[#allocation11 + $0x38] sm:$0xff] }
  0x9b   :  { %567 = vmatpush2.msra.mxu0 %v512_v10  ;;  %v255_v10 = vld [vmem:[#allocation11 + $0x30] sm:$0xff] }
  0x9c   :  { %568 = vmatprep.subr.mxu0 %v511_v11  ;;  %v254_v11 = vld [vmem:[#allocation11 + $0x28] sm:$0xff] }
  0x9d   :  { %569 = vmatpush2.msra.mxu0 %v510_v12  ;;  %v253_v12 = vld [vmem:[#allocation11 + $0x20] sm:$0xff] }
  0x9e   :  { %570 = vmatprep.subr.mxu0 %v509_v13  ;;  %v252_v13 = vld [vmem:[#allocation11 + $0x18] sm:$0xff] }
  0x9f   :  { %571 = vmatpush2.msra.mxu0 %v508_v14  ;;  %v251_v14 = vld [vmem:[#allocation11 + $0x10] sm:$0xff] }
  0xa0   :  { %572 = vmatprep.subr.mxu0 %v507_v15  ;;  %v250_v15 = vld [vmem:[#allocation11 + $0x8] sm:$0xff] }
  0xa1   :  { %573 = vmatpush2.msra.mxu0 %v506_v16  ;;  %v249_v16 = vld [vmem:[#allocation11] sm:$0xff] }
  0xa2   :  { %574 = vmatprep.subr.mxu0 %v505_v17  ;;  %v312_v17 = vld [vmem:[#allocation11 + $0x1f8] sm:$0xff] }
  0xa3   :  { %575 = vmatpush2.msra.mxu0 %v504_v18  ;;  %v311_v18 = vld [vmem:[#allocation11 + $0x1f0] sm:$0xff] }
  0xa4   :  { %576 = vmatprep.subr.mxu0 %v503_v19  ;;  %v310_v19 = vld [vmem:[#allocation11 + $0x1e8] sm:$0xff] }
  0xa5   :  { %577 = vmatpush2.msra.mxu0 %v502_v20  ;;  %v309_v20 = vld [vmem:[#allocation11 + $0x1e0] sm:$0xff] }
  0xa6   :  { %578 = vmatprep.subr.mxu0 %v501_v21  ;;  %v308_v21 = vld [vmem:[#allocation11 + $0x1d8] sm:$0xff] }
  0xa7   :  { %579 = vmatpush2.msra.mxu0 %v500_v22  ;;  %v307_v22 = vld [vmem:[#allocation11 + $0x1d0] sm:$0xff] }
  0xa8   :  { %580 = vmatprep.subr.mxu0 %v499_v23  ;;  %v306_v23 = vld [vmem:[#allocation11 + $0x1c8] sm:$0xff] }
  0xa9   :  { %581 = vmatpush2.msra.mxu0 %v498_v24  ;;  %v305_v24 = vld [vmem:[#allocation11 + $0x1c0] sm:$0xff] }
  0xaa   :  { %582 = vmatprep.subr.mxu0 %v497_v26  ;;  %v303_v26 = vld [vmem:[#allocation11 + $0x1b0] sm:$0xff] }
  0xab   :  { %583 = vmatpush2.msra.mxu0 %v496_v28  ;;  %v301_v28 = vld [vmem:[#allocation11 + $0x1a0] sm:$0xff] }
  0xac   :  { %584 = vmatprep.subr.mxu0 %v495_v30  ;;  %v299_v30 = vld [vmem:[#allocation11 + $0x190] sm:$0xff] }
  0xad   :  { %585 = vmatpush2.msra.mxu0 %v494_v32  ;;  %v297_v32 = vld [vmem:[#allocation11 + $0x180] sm:$0xff] }
  0xae   :  { %586 = vmatprep.subr.mxu0 %v493_v34  ;;  %v295_v34 = vld [vmem:[#allocation11 + $0x170] sm:$0xff] }
  0xaf   :  { %587 = vmatpush2.msra.mxu0 %v492_v36  ;;  %v293_v36 = vld [vmem:[#allocation11 + $0x160] sm:$0xff] }
 0x130   :  { %v244_v44 = vpop.f32.mrf.mxu0 }
 0x131   :  { %v4038_v45 = vadd.f32 %v244_v44, %v171_v42  ;;  %v290_v42 = vld [vmem:[#allocation11 + $0x148] sm:$0xff]  ;;  %v288_v44 = vld [vmem:[#allocation11 + $0x138] sm:$0xff] }
 0x132   :  { %v246_v47 = vpop.f32.mrf.mxu0 }
 0x133   :  { %v4040_v48 = vadd.f32 %v246_v47, %v175_v43  ;;  %725 = vrot.lane.b32.xlu0 %v4038_v45, %s3802_s29  ;;  %v289_v43 = vld [vmem:[#allocation11 + $0x140] sm:$0xff]  ;;  %v286_v47 = vld [vmem:[#allocation11 + $0x128] sm:$0xff] }
 0x135   :  { %798 = vrot.lane.b32.xlu1 %v4040_v48, %s3802_s29  ;;  %453 = vmatprep.mubr.f32.mxu1 %v4040_v48 }
 0x136   :  { %588 = vmatprep.mubr.f32.mxu0 %v4040_v48  ;;  %454 = vmatmul.mubr.f32.vlgmr.msra.gmra.mxu1 %v4038_v45 }
 0x137   :  { %589 = vmatmul.mubr.f32.vlgmr.msra.gmra.mxu0 %v4038_v45  ;;  %728 = vrot.lane.b32.xlu0 %v4038_v45, %s3811_s3 }
 0x138   :  { %598 = vmatpush1.msra.mxu1 %v279_v49  ;;  %v285_v49 = vld [vmem:[#allocation11 + $0x120] sm:$0xff] }
 0x139   :  { %801 = vrot.lane.b32.xlu1 %v4040_v48, %s3811_s3  ;;  %599 = vmatprep.subr.mxu1 %v278_v50  ;;  %v284_v50 = vld [vmem:[#allocation11 + $0x118] sm:$0xff] }
 0x13a   :  { %600 = vmatpush1.msra.mxu1 %v277_v51  ;;  %v283_v51 = vld [vmem:[#allocation11 + $0x110] sm:$0xff] }
 0x13b   :  { %731 = vrot.lane.b32.xlu0 %v4038_v45, %s3812_s24  ;;  %601 = vmatprep.subr.mxu1 %v276_v52  ;;  %v282_v52 = vld [vmem:[#allocation11 + $0x108] sm:$0xff] }
 0x13c   :  { %602 = vmatpush1.msra.mxu1 %v275_v53  ;;  %v281_v53 = vld [vmem:[#allocation11 + $0x100] sm:$0xff] }
 0x13d   :  { %804 = vrot.lane.b32.xlu1 %v4040_v48, %s3812_s24  ;;  %603 = vmatprep.subr.mxu1 %v274_v54 }
 0x13e   :  { %604 = vmatpush1.msra.mxu1 %v273_v55 }
 0x13f   :  { %605 = vmatprep.subr.mxu1 %v272_v56 }
 0x140   :  { %606 = vmatpush1.msra.mxu1 %v271_v57 }
 0x141   :  { %607 = vmatprep.subr.mxu1 %v270_v58 }
 0x142   :  { %608 = vmatpush1.msra.mxu1 %v269_v59 }
 0x143   :  { %609 = vmatprep.subr.mxu1 %v268_v60 }
 0x144   :  { %610 = vmatpush1.msra.mxu1 %v267_v61 }
 0x145   :  { %611 = vmatprep.subr.mxu1 %v266_v62 }
 0x146   :  { %612 = vmatpush1.msra.mxu1 %v265_v63 }
 0x147   :  { %613 = vmatprep.subr.mxu1 %v264_v0 }
 0x148   :  { %614 = vmatpush1.msra.mxu1 %v263_v2 }
 0x149   :  { %615 = vmatprep.subr.mxu1 %v262_v3 }
 0x14a   :  { %616 = vmatpush1.msra.mxu1 %v261_v4 }
 0x14b   :  { %617 = vmatprep.subr.mxu1 %v260_v5 }
 0x14c   :  { %618 = vmatpush1.msra.mxu1 %v259_v6 }
 0x14d   :  { %619 = vmatprep.subr.mxu1 %v258_v7 }
 0x14e   :  { %620 = vmatpush1.msra.mxu1 %v257_v8 }
 0x14f   :  { %621 = vmatprep.subr.mxu1 %v256_v9 }
 0x150   :  { %622 = vmatpush1.msra.mxu1 %v255_v10 }
 0x151   :  { %623 = vmatprep.subr.mxu1 %v254_v11 }
 0x152   :  { %624 = vmatpush1.msra.mxu1 %v253_v12 }
 0x153   :  { %625 = vmatprep.subr.mxu1 %v252_v13 }
 0x154   :  { %626 = vmatpush1.msra.mxu1 %v251_v14  ;;  %v700_v14 = vld [vmem:[#allocation9] sm:$0x3] }
 0x155   :  { %627 = vmatprep.subr.mxu1 %v250_v15 }
 0x156   :  { %628 = vmatpush1.msra.mxu1 %v249_v16 }
 0x157   :  { %629 = vmatprep.subr.mxu1 %v312_v17 }
 0x158   :  { %630 = vmatpush2.msra.mxu1 %v311_v18 }
 0x159   :  { %631 = vmatprep.subr.mxu1 %v310_v19 }
 0x15a   :  { %632 = vmatpush2.msra.mxu1 %v309_v20 }
 0x15b   :  { %633 = vmatprep.subr.mxu1 %v308_v21  ;;  %v707_v21 = vrot.slane %v700_v14, %v4028_v39 }
 0x15c   :  { %634 = vmatpush2.msra.mxu1 %v307_v22 }
 0x15d   :  { %635 = vmatprep.subr.mxu1 %v306_v23 }
 0x15e   :  { %636 = vmatpush2.msra.mxu1 %v305_v24 }
 0x15f   :  { %637 = vmatprep.subr.mxu1 %v304_v25 }
 0x160   :  { %638 = vmatpush2.msra.mxu1 %v303_v26 }
 0x161   :  { %639 = vmatprep.subr.mxu1 %v302_v27  ;;  %v711_v27 = vrot.slane %v700_v14, %v4034_v41 }
 0x162   :  { %640 = vmatpush2.msra.mxu1 %v301_v28 }
 0x163   :  { %641 = vmatprep.subr.mxu1 %v300_v29 }
 0x164   :  { %642 = vmatpush2.msra.mxu1 %v299_v30 }
 0x165   :  { %643 = vmatprep.subr.mxu1 %v298_v31 }
 0x166   :  { %644 = vmatpush2.msra.mxu1 %v297_v32 }
 0x167   :  { %645 = vmatprep.subr.mxu1 %v296_v33 }
 0x168   :  { %646 = vmatpush2.msra.mxu1 %v295_v34 }
 0x169   :  { %647 = vmatprep.subr.mxu1 %v294_v35 }
 0x16a   :  { %648 = vmatpush2.msra.mxu1 %v293_v36 }
 0x16b   :  { %649 = vmatprep.subr.mxu1 %v292_v37 }
 0x16c   :  { %650 = vmatpush2.msra.mxu1 %v291_v40  ;;  %v4085_v40 = vsub.s32 7, %v4025_v38 }
 0x16d   :  { %651 = vmatprep.subr.mxu1 %v290_v42  ;;  %v4088_v42 = vsub.s32 3, %v4025_v38 }
 0x16e   :  { %652 = vmatpush2.msra.mxu1 %v289_v43  ;;  %v4093_v43 = vld [vmem:[%s5179_s8] sm:$0xff] }
 0x16f   :  { %653 = vmatprep.subr.mxu1 %v288_v44  ;;  %v4096_v44 = vsub.s32 6, %v4025_v38 }
 0x170   :  { %654 = vmatpush2.msra.mxu1 %v287_v46  ;;  %v4099_v46 = vsub.s32 2, %v4025_v38 }
 0x171   :  { %655 = vmatprep.subr.mxu1 %v286_v47 }
 0x172   :  { %656 = vmatpush2.msra.mxu1 %v285_v49 }
 0x173   :  { %657 = vmatprep.subr.mxu1 %v284_v50  ;;  %v4110_v50 = vld [vmem:[%s5179_s8 + $0x8] sm:$0xff] }
 0x174   :  { %658 = vmatpush2.msra.mxu1 %v283_v51  ;;  %v4113_v51 = vsub.s32 4, %v4025_v38 }
 0x175   :  { %659 = vmatprep.subr.mxu1 %v282_v52 }
 0x176   :  { %660 = vmatpush2.msra.mxu1 %v281_v53  ;;  %v858_v53 = vrot.slane %v4093_v43, %v4085_v40 }
 0x1a5   :  { %v4070_v16 = vpop.permute.xlu0 %725 }
 0x1a7   :  { %v4072_v17 = vpop.permute.xlu1 %798 }
 0x1a9   :  { %v4076_v30 = vpop.permute.xlu0 %728 }
 0x1ab   :  { %v4078_v31 = vpop.permute.xlu1 %801 }
 0x1ac   :  { %v852_v52 = vsel %vm734_vm8, %v4072_v17, %v4078_v31 }
 0x1ad   :  { %v4080_v36 = vpop.permute.xlu0 %731 }
 0x1ae   :  { %v767_v47 = vsel %vm734_vm8, %v4076_v30, %v4080_v36 }
 0x1af   :  { %v4082_v37 = vpop.permute.xlu1 %804 }
 0x1b0   :  { %v837_v49 = vsel %vm734_vm8, %v4078_v31, %v4082_v37 }
 0x1f6   :  { %v4066_v58 = vpop.f32.mrf.mxu1 }
 0x1f7   :  { %v4058_v54 = vpop.f32.mrf.mxu0 }
 0x1f8   :  { %v595_v57 = vmul.f32 %v4058_v54, %v4058_v54  ;;  %v4068_v59 = vpop.f32.mrf.mxu1 }
 0x1f9   :  { %v4060_v55 = vpop.f32.mrf.mxu0 }
 0x1fa   :  { %v596_v56 = vmul.f32 %v4060_v55, %v4060_v55 }
 0x1fc   :  { %661 = vmatprep.mubr.f32.mxu1 %v596_v56  ;;  %v788_v56 = vrot.slane %v4093_v43, %v4088_v42 }
 0x1fd   :  { %662 = vmatmul.mubr.f32.vlgmr.msra.gmra.mxu1 %v595_v57  ;;  %v853_v57 = vsel %vm736_vm9, %v852_v52, %v4082_v37 }
 0x2bd   :  { %v663_v60 = vpop.f32.mrf.mxu1 }
 0x2be   :  { %v668_v61 = vmul.f32 %v663_v60, %v663_v60  ;;  %v843_v60 = vrot.slane %v4093_v43, %v4096_v44 }
 0x2bf   :  { %v665_v62 = vpop.f32.mrf.mxu1 }
 0x2c0   :  { %v670_v63 = vadd.f32 1e-16, %v668_v61  ;;  %v669_v0 = vmul.f32 %v665_v62, %v665_v62  ;;  %v777_v61 = vrot.slane %v4110_v50, %v4099_v46  ;;  %v773_v62 = vrot.slane %v4093_v43, %v4099_v46 }
 0x2c2   :  { %3402 = vrsqrt.f32 %v670_v63  ;;  %v671_v2 = vadd.f32 1e-16, %v669_v0  ;;  %vm674_vm0 = vcmp.eq.f32.partialorder %v670_v63, inf  ;;  %v677_v5 = vand.u32 2147483648, %v670_v63 }
 0x2c3   :  { %vm676_vm1 = vcmp.eq.f32.partialorder %v670_v63, 0.0  ;;  %v768_v0 = vsel %vm736_vm9, %v767_v47, %v4038_v45 }
 0x2c4   :  { %3404 = vrsqrt.f32 %v671_v2  ;;  %vm681_vm2 = vcmp.eq.f32.partialorder %v671_v2, inf  ;;  %v684_v10 = vand.u32 2147483648, %v671_v2  ;;  %vm683_vm3 = vcmp.eq.f32.partialorder %v671_v2, 0.0 }
 0x2cf   :  { %v3403_v3 = vpop.eup %3402 }
 0x2d0   :  { %v673_v4 = vmul.f32 %v3403_v3, %v670_v63  ;;  %v747_v3 = vrot.slane %v4110_v50, %v4028_v39 }
 0x2d1   :  { %v3405_v6 = vpop.eup %3404 }
 0x2d2   :  { %v675_v7 = vsel %vm674_vm0, %v670_v63, %v673_v4  ;;  %v680_v9 = vmul.f32 %v3405_v6, %v671_v2  ;;  %v782_v63 = vsel %vm734_vm8, %v4070_v16, %v4076_v30  ;;  %v735_v4 = vsel %vm734_vm8, %v4038_v45, %v4070_v16 }
 0x2d3   :  { %v678_v8 = vsel %vm676_vm1, %v677_v5, %v675_v7  ;;  %v807_v5 = vsel %vm734_vm8, %v4040_v48, %v4072_v17  ;;  %v783_v6 = vsel %vm736_vm9, %v782_v63, %v4080_v36  ;;  %v813_v7 = vrot.slane %v4093_v43, %v4113_v51 }
 0x2d4   :  { %3406 = vrsqrt.f32 %v678_v8  ;;  %v682_v11 = vsel %vm681_vm2, %v671_v2, %v680_v9  ;;  %vm688_vm4 = vcmp.eq.f32.partialorder %v678_v8, inf  ;;  %v691_v18 = vand.u32 2147483648, %v678_v8 }
 0x2d5   :  { %v685_v12 = vsel %vm683_vm3, %v684_v10, %v682_v11  ;;  %vm690_vm5 = vcmp.eq.f32.partialorder %v678_v8, 0.0  ;;  %v838_v2 = vsel %vm736_vm9, %v837_v49, %v4040_v48  ;;  %v808_v9 = vsel %vm736_vm9, %v807_v5, %v4078_v31 }
 0x2d6   :  { %3408 = vrsqrt.f32 %v685_v12  ;;  %vm695_vm6 = vcmp.eq.f32.partialorder %v685_v12, inf  ;;  %v698_v25 = vand.u32 2147483648, %v685_v12  ;;  %vm697_vm7 = vcmp.eq.f32.partialorder %v685_v12, 0.0 }
 0x2d7   :  { %v854_v10 = vsel %vm738_vm10, %v853_v57, %v4040_v48  ;;  %v743_v11 = vrot.slane %v4093_v43, %v4028_v39  ;;  %v809_v14 = vsel %vm738_vm10, %v808_v9, %v4082_v37 }
 0x2e1   :  { %v3407_v13 = vpop.eup %3406 }
 0x2e2   :  { %v687_v15 = vmul.f32 %v3407_v13, %v678_v8  ;;  %v769_v13 = vsel %vm738_vm10, %v768_v0, %v4070_v16  ;;  %v822_v0 = vsel %vm734_vm8, %v4082_v37, %v4040_v48  ;;  %v752_v48 = vsel %vm734_vm8, %v4080_v36, %v4038_v45 }
 0x2e3   :  { %v3409_v19 = vpop.eup %3408 }
 0x2e4   :  { %v689_v20 = vsel %vm688_vm4, %v678_v8, %v687_v15  ;;  %v694_v23 = vmul.f32 %v3409_v19, %v685_v12  ;;  %v737_v8 = vsel %vm736_vm9, %v735_v4, %v4076_v30  ;;  %v784_v19 = vsel %vm738_vm10, %v783_v6, %v4038_v45 }
 0x2e5   :  { %v692_v22 = vsel %vm690_vm5, %v691_v18, %v689_v20  ;;  %v739_v15 = vsel %vm738_vm10, %v737_v8, %v4080_v36  ;;  %v792_v20 = vrot.slane %v4110_v50, %v4088_v42  ;;  %v4207_v4 = vsub.s32 5, %v4025_v38 }
 0x2e6   :  { %v3303_v24 = vadd.f32 -1.0, %v692_v22  ;;  %v696_v26 = vsel %vm695_vm6, %v685_v12, %v694_v23  ;;  %v839_v12 = vsel %vm738_vm10, %v838_v2, %v4072_v17  ;;  %v863_v22 = vmul.f32 %v858_v53, %v854_v10 }
 0x2e7   :  { %v699_v29 = vsel %vm697_vm7, %v698_v25, %v696_v26  ;;  %v847_v23 = vrot.slane %v4110_v50, %v4096_v44  ;;  %v848_v25 = vmul.f32 %v843_v60, %v839_v12  ;;  %v778_v26 = vmul.f32 %v773_v62, %v769_v13 }
 0x2e8   :  { %v714_v28 = vmul.f32 %v3303_v24, %v707_v21  ;;  %v3304_v32 = vadd.f32 -1.0, %v699_v29  ;;  %v817_v24 = vrot.slane %v4110_v50, %v4113_v51  ;;  %v794_v2 = vmul.f32 %v792_v20, %v784_v19  ;;  %v1009_v20 = vld [vmem:[#allocation6 + $0x2d8] sm:$0xff] }
 0x2e9   :  { %v849_v53 = vmul.f32 %v847_v23, %v839_v12  ;;  %v823_v6 = vsel %vm736_vm9, %v822_v0, %v4072_v17  ;;  %v753_v17 = vsel %vm736_vm9, %v752_v48, %v4070_v16  ;;  %v758_v36 = vrot.slane %v4093_v43, %v4034_v41  ;;  %v1162_v12 = vld [vmem:[#allocation8 + $0x2f8] sm:$0xff]  ;;  %v1152_v0 = vld [vmem:[#allocation8 + $0x2a8] sm:$0xff]  ;;  %v1149_v48 = vld [vmem:[#allocation8 + $0x290] sm:$0xff] }
 0x2ea   :  { %v716_v33 = vadd.f32 1.0, %v714_v28  ;;  %v715_v34 = vmul.f32 %v3304_v32, %v711_v27  ;;  %v818_v27 = vmul.f32 %v813_v7, %v809_v14  ;;  %v749_v28 = vmul.f32 %v747_v3, %v739_v15  ;;  %1195 = vmatprep.subr.mxu1 %v1162_v12  ;;  %v993_v12 = vld [vmem:[#allocation6 + $0x258] sm:$0xff] }
 0x2eb   :  { %v819_v57 = vmul.f32 %v817_v24, %v809_v14  ;;  %v862_v3 = vrot.slane %v4110_v50, %v4085_v40  ;;  %v828_v7 = vrot.slane %v4093_v43, %v4207_v4  ;;  %v824_v38 = vsel %vm738_vm10, %v823_v6, %v4078_v31  ;;  %v1161_v14 = vld [vmem:[#allocation8 + $0x2f0] sm:$0xff]  ;;  %v1160_v43 = vld [vmem:[#allocation8 + $0x2e8] sm:$0xff]  ;;  %v1150_v6 = vld [vmem:[#allocation8 + $0x298] sm:$0xff] }
 0x2ec   :  { %3410 = vrcp.f32 %v716_v33  ;;  %v717_v35 = vadd.f32 1.0, %v715_v34  ;;  %v793_v33 = vmul.f32 %v788_v56, %v784_v19  ;;  %v779_v34 = vmul.f32 %v777_v61, %v769_v13  ;;  %v1012_v13 = vld [vmem:[#allocation6 + $0x2f0] sm:$0xff]  ;;  %1196 = vmatpush1.msra.mxu1 %v1161_v14  ;;  %v1159_v19 = vld [vmem:[#allocation8 + $0x2e0] sm:$0xff] }
 0x2ed   :  { %v864_v37 = vmul.f32 %v862_v3, %v854_v10  ;;  %v833_v45 = vmul.f32 %v828_v7, %v824_v38  ;;  %v754_v9 = vsel %vm738_vm10, %v753_v17, %v4076_v30  ;;  %v762_v16 = vrot.slane %v4110_v50, %v4034_v41  ;;  %v1010_v30 = vld [vmem:[#allocation6 + $0x2e0] sm:$0xff]  ;;  %1197 = vmatprep.subr.mxu1 %v1160_v43  ;;  %v1148_v7 = vld [vmem:[#allocation8 + $0x288] sm:$0xff]  ;;  %v997_v17 = vld [vmem:[#allocation6 + $0x278] sm:$0xff] }
 0x2ee   :  { %3412 = vrcp.f32 %v717_v35  ;;  %v748_v35 = vmul.f32 %v743_v11, %v739_v15  ;;  %v763_v31 = vmul.f32 %v758_v36, %v754_v9  ;;  %v1013_v11 = vld [vmem:[#allocation6 + $0x2f8] sm:$0xff]  ;;  %v1011_v15 = vld [vmem:[#allocation6 + $0x2e8] sm:$0xff]  ;;  %v832_v24 = vrot.slane %v4110_v50, %v4207_v4  ;;  %1198 = vmatpush1.msra.mxu1 %v1159_v19  ;;  %v1151_v3 = vld [vmem:[#allocation8 + $0x2a0] sm:$0xff] }
 0x2ef   :  { %1059 = vmatprep.subr.mxu0 %v1013_v11  ;;  %v764_v23 = vmul.f32 %v762_v16, %v754_v9  ;;  %v1005_v50 = vld [vmem:[#allocation6 + $0x2b8] sm:$0xff]  ;;  %v996_v36 = vld [vmem:[#allocation6 + $0x270] sm:$0xff]  ;;  %v994_v16 = vld [vmem:[#allocation6 + $0x260] sm:$0xff] }
 0x2f0   :  { %1060 = vmatpush1.msra.mxu0 %v1012_v13  ;;  %v1145_v9 = vld [vmem:[#allocation8 + $0x270] sm:$0xff]  ;;  %v1143_v11 = vld [vmem:[#allocation8 + $0x260] sm:$0xff]  ;;  %v1142_v13 = vld [vmem:[#allocation8 + $0x258] sm:$0xff] }
 0x2f1   :  { %1061 = vmatprep.subr.mxu0 %v1011_v15  ;;  %v992_v14 = vld [vmem:[#allocation6 + $0x250] sm:$0xff]  ;;  %v991_v43 = vld [vmem:[#allocation6 + $0x248] sm:$0xff]  ;;  %v1139_v19 = vld [vmem:[#allocation8 + $0x240] sm:$0xff] }
 0x2f2   :  { %1062 = vmatpush1.msra.mxu0 %v1010_v30  ;;  %v1141_v15 = vld [vmem:[#allocation8 + $0x250] sm:$0xff]  ;;  %v990_v30 = vld [vmem:[#allocation6 + $0x240] sm:$0xff] }
 0x2f3   :  { %1063 = vmatprep.subr.mxu0 %v1009_v20  ;;  %v989_v20 = vld [vmem:[#allocation6 + $0x238] sm:$0xff] }
 0x2f9   :  { %v3411_v18 = vpop.eup %3410 }
 0x2fa   :  { %v719_v21 = vmul.f32 %v3411_v18, %v4058_v54 }
 0x2fb   :  { %v3413_v29 = vpop.eup %3412 }
 0x2fc   :  { %v865_v32 = vmul.f32 %v863_v22, %v719_v21  ;;  %v4175_v47 = vmul.f32 %v3413_v29, %v4060_v55  ;;  %v4177_v54 = vmul.f32 %v848_v25, %v719_v21  ;;  %v4179_v49 = vmul.f32 %v778_v26, %v719_v21  ;;  %v1158_v22 = vld [vmem:[#allocation8 + $0x2d8] sm:$0xff]  ;;  %v1008_v25 = vld [vmem:[#allocation6 + $0x2d0] sm:$0xff]  ;;  %v1006_v29 = vld [vmem:[#allocation6 + $0x2c0] sm:$0xff] }
 0x2fd   :  { %v4181_v52 = vmul.f32 %v818_v27, %v719_v21  ;;  %v4185_v60 = vmul.f32 %v748_v35, %v719_v21  ;;  %v795_v56 = vmul.f32 %v793_v33, %v719_v21  ;;  %v835_v10 = vmul.f32 %v833_v45, %v719_v21  ;;  %v1157_v26 = vld [vmem:[#allocation8 + $0x2d0] sm:$0xff]  ;;  %1199 = vmatprep.subr.mxu1 %v1158_v22  ;;  %v1007_v27 = vld [vmem:[#allocation6 + $0x2c8] sm:$0xff]  ;;  %v1146_v45 = vld [vmem:[#allocation8 + $0x278] sm:$0xff] }
 0x2fe   :  { %937 = vrot.lane.b32.xlu1 %v865_v32, %s3802_s29  ;;  %934 = vrot.lane.b32.xlu0 %v865_v32, %s3812_s24  ;;  %v4188_v61 = vmul.f32 %v779_v34, %v4175_v47  ;;  %v4191_v55 = vmul.f32 %v849_v53, %v4175_v47  ;;  %v4194_v62 = vmul.f32 %v749_v28, %v4175_v47  ;;  %v1156_v28 = vld [vmem:[#allocation8 + $0x2c8] sm:$0xff]  ;;  %v1155_v32 = vld [vmem:[#allocation8 + $0x2c0] sm:$0xff]  ;;  %v1154_v34 = vld [vmem:[#allocation8 + $0x2b8] sm:$0xff] }
 0x2ff   :  { %v4197_v63 = vmul.f32 %v819_v57, %v4175_v47  ;;  %v796_v5 = vmul.f32 %v794_v2, %v4175_v47  ;;  %v866_v8 = vmul.f32 %v864_v37, %v4175_v47  ;;  %v765_v18 = vmul.f32 %v763_v31, %v719_v21  ;;  %1064 = vmatpush1.msra.mxu0 %v1008_v25  ;;  %v1004_v53 = vld [vmem:[#allocation6 + $0x2b0] sm:$0xff]  ;;  %v1002_v2 = vld [vmem:[#allocation6 + $0x2a0] sm:$0xff]  ;;  %v999_v37 = vld [vmem:[#allocation6 + $0x288] sm:$0xff] }
 0x300   :  { %v766_v21 = vmul.f32 %v764_v23, %v4175_v47  ;;  %1200 = vmatpush1.msra.mxu1 %v1157_v26  ;;  %v834_v33 = vmul.f32 %v832_v24, %v824_v38  ;;  %1065 = vmatprep.subr.mxu0 %v1007_v27  ;;  %v1153_v57 = vld [vmem:[#allocation8 + $0x2b0] sm:$0xff]  ;;  %v998_v38 = vld [vmem:[#allocation6 + $0x280] sm:$0xff]  ;;  %v1144_v31 = vld [vmem:[#allocation8 + $0x268] sm:$0xff] }
 0x301   :  { %1201 = vmatprep.subr.mxu1 %v1156_v28  ;;  %1066 = vmatpush1.msra.mxu0 %v1006_v29  ;;  %v1138_v22 = vld [vmem:[#allocation8 + $0x238] sm:$0xff]  ;;  %v988_v23 = vld [vmem:[#allocation6 + $0x230] sm:$0xff]  ;;  %v987_v25 = vld [vmem:[#allocation6 + $0x228] sm:$0xff] }
 0x302   :  { %893 = vrot.lane.b32.xlu1 %v795_v56, %s3802_s29  ;;  %890 = vrot.lane.b32.xlu0 %v795_v56, %s3812_s24  ;;  %v836_v35 = vmul.f32 %v834_v33, %v4175_v47  ;;  %v1003_v56 = vld [vmem:[#allocation6 + $0x2a8] sm:$0xff]  ;;  %v1000_v47 = vld [vmem:[#allocation6 + $0x290] sm:$0xff]  ;;  %v1135_v27 = vld [vmem:[#allocation8 + $0x220] sm:$0xff] }
 0x303   :  { %1202 = vmatpush1.msra.mxu1 %v1155_v32  ;;  %1067 = vmatprep.subr.mxu0 %v1005_v50  ;;  %v1137_v24 = vld [vmem:[#allocation8 + $0x230] sm:$0xff]  ;;  %v1136_v26 = vld [vmem:[#allocation8 + $0x228] sm:$0xff]  ;;  %v985_v28 = vld [vmem:[#allocation6 + $0x218] sm:$0xff] }
 0x304   :  { %1203 = vmatprep.subr.mxu1 %v1154_v34  ;;  %1068 = vmatpush1.msra.mxu0 %v1004_v53  ;;  %v1134_v29 = vld [vmem:[#allocation8 + $0x218] sm:$0xff]  ;;  %v984_v32 = vld [vmem:[#allocation6 + $0x210] sm:$0xff]  ;;  %v983_v50 = vld [vmem:[#allocation6 + $0x208] sm:$0xff] }
 0x305   :  { %1204 = vmatpush1.msra.mxu1 %v1153_v57  ;;  %1069 = vmatprep.subr.mxu0 %v1003_v56  ;;  %v1133_v33 = vld [vmem:[#allocation8 + $0x210] sm:$0xff]  ;;  %v1132_v34 = vld [vmem:[#allocation8 + $0x208] sm:$0xff]  ;;  %v1131_v53 = vld [vmem:[#allocation8 + $0x200] sm:$0xff] }
 0x306   :  { %900 = vrot.lane.b32.xlu1 %v796_v5, %s3802_s29  ;;  %897 = vrot.lane.b32.xlu0 %v796_v5, %s3812_s24  ;;  %v1001_v5 = vld [vmem:[#allocation6 + $0x298] sm:$0xff] }
 0x307   :  { %1205 = vmatprep.subr.mxu1 %v1152_v0  ;;  %1070 = vmatpush1.msra.mxu0 %v1002_v2  ;;  %v1045_v57 = vld [vmem:[#allocation6 + $0x3f8] sm:$0xff]  ;;  %v1044_v0 = vld [vmem:[#allocation6 + $0x3f0] sm:$0xff] }
 0x308   :  { %1206 = vmatpush1.msra.mxu1 %v1151_v3  ;;  %1071 = vmatprep.subr.mxu0 %v1001_v5  ;;  %v1194_v56 = vld [vmem:[#allocation8 + $0x3f8] sm:$0xff]  ;;  %v1193_v2 = vld [vmem:[#allocation8 + $0x3f0] sm:$0xff]  ;;  %v1043_v3 = vld [vmem:[#allocation6 + $0x3e8] sm:$0xff] }
 0x309   :  { %1207 = vmatprep.subr.mxu1 %v1150_v6  ;;  %1072 = vmatpush1.msra.mxu0 %v1000_v47  ;;  %v1192_v5 = vld [vmem:[#allocation8 + $0x3e8] sm:$0xff]  ;;  %v1042_v6 = vld [vmem:[#allocation6 + $0x3e0] sm:$0xff] }
 0x30a   :  { %944 = vrot.lane.b32.xlu1 %v866_v8, %s3802_s29  ;;  %941 = vrot.lane.b32.xlu0 %v866_v8, %s3812_s24  ;;  %v1147_v8 = vld [vmem:[#allocation8 + $0x280] sm:$0xff] }
 0x30b   :  { %1208 = vmatpush1.msra.mxu1 %v1149_v48  ;;  %1073 = vmatprep.subr.mxu0 %v999_v37  ;;  %v1191_v47 = vld [vmem:[#allocation8 + $0x3e0] sm:$0xff]  ;;  %v1041_v48 = vld [vmem:[#allocation6 + $0x3d8] sm:$0xff] }
 0x30c   :  { %1209 = vmatprep.subr.mxu1 %v1148_v7  ;;  %1074 = vmatpush1.msra.mxu0 %v998_v38  ;;  %v1190_v37 = vld [vmem:[#allocation8 + $0x3d8] sm:$0xff]  ;;  %v1040_v7 = vld [vmem:[#allocation6 + $0x3d0] sm:$0xff] }
 0x30d   :  { %1210 = vmatpush1.msra.mxu1 %v1147_v8  ;;  %1075 = vmatprep.subr.mxu0 %v997_v17  ;;  %v1189_v38 = vld [vmem:[#allocation8 + $0x3d0] sm:$0xff]  ;;  %v1039_v8 = vld [vmem:[#allocation6 + $0x3c8] sm:$0xff] }
 0x30e   :  { %915 = vrot.lane.b32.xlu1 %v835_v10, %s3802_s29  ;;  %912 = vrot.lane.b32.xlu0 %v835_v10, %s3812_s24  ;;  %v995_v10 = vld [vmem:[#allocation6 + $0x268] sm:$0xff] }
 0x30f   :  { %1211 = vmatprep.subr.mxu1 %v1146_v45  ;;  %1076 = vmatpush1.msra.mxu0 %v996_v36  ;;  %v1188_v17 = vld [vmem:[#allocation8 + $0x3c8] sm:$0xff]  ;;  %v1038_v45 = vld [vmem:[#allocation6 + $0x3c0] sm:$0xff] }
 0x310   :  { %1212 = vmatpush1.msra.mxu1 %v1145_v9  ;;  %1077 = vmatprep.subr.mxu0 %v995_v10  ;;  %v1187_v36 = vld [vmem:[#allocation8 + $0x3c0] sm:$0xff]  ;;  %v1037_v9 = vld [vmem:[#allocation6 + $0x3b8] sm:$0xff] }
 0x311   :  { %1213 = vmatprep.subr.mxu1 %v1144_v31  ;;  %1078 = vmatpush1.msra.mxu0 %v994_v16  ;;  %v1186_v10 = vld [vmem:[#allocation8 + $0x3b8] sm:$0xff]  ;;  %v1036_v31 = vld [vmem:[#allocation6 + $0x3b0] sm:$0xff] }
 0x312   :  { %871 = vrot.lane.b32.xlu1 %v765_v18, %s3802_s29  ;;  %868 = vrot.lane.b32.xlu0 %v765_v18, %s3812_s24  ;;  %v1140_v18 = vld [vmem:[#allocation8 + $0x248] sm:$0xff]  ;;  %v1185_v16 = vld [vmem:[#allocation8 + $0x3b0] sm:$0xff] }
 0x313   :  { %1214 = vmatpush1.msra.mxu1 %v1143_v11  ;;  %1079 = vmatprep.subr.mxu0 %v993_v12  ;;  %v1035_v11 = vld [vmem:[#allocation6 + $0x3a8] sm:$0xff] }
 0x314   :  { %1215 = vmatprep.subr.mxu1 %v1142_v13  ;;  %1080 = vmatpush1.msra.mxu0 %v992_v14  ;;  %v1184_v12 = vld [vmem:[#allocation8 + $0x3a8] sm:$0xff]  ;;  %v1034_v13 = vld [vmem:[#allocation6 + $0x3a0] sm:$0xff] }
 0x315   :  { %1216 = vmatpush1.msra.mxu1 %v1141_v15  ;;  %1081 = vmatprep.subr.mxu0 %v991_v43  ;;  %v1183_v14 = vld [vmem:[#allocation8 + $0x3a0] sm:$0xff]  ;;  %v1033_v15 = vld [vmem:[#allocation6 + $0x398] sm:$0xff] }
 0x316   :  { %878 = vrot.lane.b32.xlu1 %v766_v21, %s3802_s29  ;;  %875 = vrot.lane.b32.xlu0 %v766_v21, %s3812_s24  ;;  %v986_v21 = vld [vmem:[#allocation6 + $0x220] sm:$0xff]  ;;  %v1182_v43 = vld [vmem:[#allocation8 + $0x398] sm:$0xff] }
 0x317   :  { %1217 = vmatprep.subr.mxu1 %v1140_v18  ;;  %1082 = vmatpush1.msra.mxu0 %v990_v30  ;;  %v1032_v18 = vld [vmem:[#allocation6 + $0x390] sm:$0xff] }
 0x318   :  { %1218 = vmatpush1.msra.mxu1 %v1139_v19  ;;  %1083 = vmatprep.subr.mxu0 %v989_v20  ;;  %v1181_v30 = vld [vmem:[#allocation8 + $0x390] sm:$0xff]  ;;  %v1031_v19 = vld [vmem:[#allocation6 + $0x388] sm:$0xff] }
 0x319   :  { %1219 = vmatprep.subr.mxu1 %v1138_v22  ;;  %1084 = vmatpush1.msra.mxu0 %v988_v23  ;;  %v1180_v20 = vld [vmem:[#allocation8 + $0x388] sm:$0xff]  ;;  %v1030_v22 = vld [vmem:[#allocation6 + $0x380] sm:$0xff] }
 0x31a   :  { %922 = vrot.lane.b32.xlu1 %v836_v35, %s3802_s29  ;;  %919 = vrot.lane.b32.xlu0 %v836_v35, %s3812_s24  ;;  %v982_v35 = vld [vmem:[#allocation6 + $0x200] sm:$0xff] }
 0x31b   :  { %1220 = vmatpush1.msra.mxu1 %v1137_v24  ;;  %1085 = vmatprep.subr.mxu0 %v987_v25  ;;  %v1179_v23 = vld [vmem:[#allocation8 + $0x380] sm:$0xff]  ;;  %v1029_v24 = vld [vmem:[#allocation6 + $0x378] sm:$0xff] }
 0x31c   :  { %1221 = vmatprep.subr.mxu1 %v1136_v26  ;;  %1086 = vmatpush1.msra.mxu0 %v986_v21  ;;  %v1178_v25 = vld [vmem:[#allocation8 + $0x378] sm:$0xff]  ;;  %v1028_v26 = vld [vmem:[#allocation6 + $0x370] sm:$0xff] }
 0x31d   :  { %1222 = vmatpush1.msra.mxu1 %v1135_v27  ;;  %1087 = vmatprep.subr.mxu0 %v985_v28  ;;  %v1177_v21 = vld [vmem:[#allocation8 + $0x370] sm:$0xff]  ;;  %v1027_v27 = vld [vmem:[#allocation6 + $0x368] sm:$0xff] }
 0x31e   :  { %1223 = vmatprep.subr.mxu1 %v1134_v29  ;;  %1088 = vmatpush1.msra.mxu0 %v984_v32  ;;  %v1176_v28 = vld [vmem:[#allocation8 + $0x368] sm:$0xff]  ;;  %v1026_v29 = vld [vmem:[#allocation6 + $0x360] sm:$0xff] }
 0x31f   :  { %1224 = vmatpush1.msra.mxu1 %v1133_v33  ;;  %1089 = vmatprep.subr.mxu0 %v983_v50  ;;  %v1175_v32 = vld [vmem:[#allocation8 + $0x360] sm:$0xff] }
 0x320   :  { %1225 = vmatprep.subr.mxu1 %v1132_v34  ;;  %1090 = vmatpush1.msra.mxu0 %v982_v35 }
 0x321   :  { %1226 = vmatpush1.msra.mxu1 %v1131_v53  ;;  %1091 = vmatprep.subr.mxu0 %v1045_v57 }
 0x322   :  { %1227 = vmatprep.subr.mxu1 %v1194_v56  ;;  %1092 = vmatpush2.msra.mxu0 %v1044_v0 }
 0x323   :  { %1228 = vmatpush2.msra.mxu1 %v1193_v2  ;;  %1093 = vmatprep.subr.mxu0 %v1043_v3  ;;  %v1025_v2 = vld [vmem:[#allocation6 + $0x358] sm:$0xff] }
 0x324   :  { %1229 = vmatprep.subr.mxu1 %v1192_v5  ;;  %1094 = vmatpush2.msra.mxu0 %v1042_v6  ;;  %v1174_v3 = vld [vmem:[#allocation8 + $0x358] sm:$0xff]  ;;  %v1024_v5 = vld [vmem:[#allocation6 + $0x350] sm:$0xff] }
 0x325   :  { %1230 = vmatpush2.msra.mxu1 %v1191_v47  ;;  %1095 = vmatprep.subr.mxu0 %v1041_v48  ;;  %v1173_v6 = vld [vmem:[#allocation8 + $0x350] sm:$0xff]  ;;  %v1023_v47 = vld [vmem:[#allocation6 + $0x348] sm:$0xff] }
 0x326   :  { %1231 = vmatprep.subr.mxu1 %v1190_v37  ;;  %1096 = vmatpush2.msra.mxu0 %v1040_v7  ;;  %v1172_v48 = vld [vmem:[#allocation8 + $0x348] sm:$0xff]  ;;  %v1022_v7 = vld [vmem:[#allocation6 + $0x340] sm:$0xff] }
 0x327   :  { %1232 = vmatpush2.msra.mxu1 %v1189_v38  ;;  %1097 = vmatprep.subr.mxu0 %v1039_v8  ;;  %v1171_v38 = vld [vmem:[#allocation8 + $0x340] sm:$0xff] }
 0x328   :  { %1233 = vmatprep.subr.mxu1 %v1188_v17  ;;  %1098 = vmatpush2.msra.mxu0 %v1038_v45  ;;  %v1170_v45 = vld [vmem:[#allocation8 + $0x338] sm:$0xff] }
 0x329   :  { %1234 = vmatpush2.msra.mxu1 %v1187_v36  ;;  %1099 = vmatprep.subr.mxu0 %v1037_v9  ;;  %v1020_v9 = vld [vmem:[#allocation6 + $0x330] sm:$0xff] }
 0x32a   :  { %1235 = vmatprep.subr.mxu1 %v1186_v10  ;;  %1100 = vmatpush2.msra.mxu0 %v1036_v31  ;;  %v1169_v10 = vld [vmem:[#allocation8 + $0x330] sm:$0xff] }
 0x32b   :  { %1236 = vmatpush2.msra.mxu1 %v1185_v16  ;;  %1101 = vmatprep.subr.mxu0 %v1035_v11  ;;  %v1019_v11 = vld [vmem:[#allocation6 + $0x328] sm:$0xff] }
 0x32c   :  { %1237 = vmatprep.subr.mxu1 %v1184_v12  ;;  %1102 = vmatpush2.msra.mxu0 %v1034_v13  ;;  %v1168_v12 = vld [vmem:[#allocation8 + $0x328] sm:$0xff] }
 0x32d   :  { %1238 = vmatpush2.msra.mxu1 %v1183_v14  ;;  %1103 = vmatprep.subr.mxu0 %v1033_v15  ;;  %v1018_v14 = vld [vmem:[#allocation6 + $0x320] sm:$0xff] }
 0x32e   :  { %1239 = vmatprep.subr.mxu1 %v1182_v43  ;;  %1104 = vmatpush2.msra.mxu0 %v1032_v18  ;;  %v1167_v15 = vld [vmem:[#allocation8 + $0x320] sm:$0xff]  ;;  %v1017_v43 = vld [vmem:[#allocation6 + $0x318] sm:$0xff] }
 0x32f   :  { %1240 = vmatpush2.msra.mxu1 %v1181_v30  ;;  %1105 = vmatprep.subr.mxu0 %v1031_v19 }
 0x330   :  { %1241 = vmatprep.subr.mxu1 %v1180_v20  ;;  %1106 = vmatpush2.msra.mxu0 %v1030_v22  ;;  %v1166_v20 = vld [vmem:[#allocation8 + $0x318] sm:$0xff]  ;;  %v1016_v22 = vld [vmem:[#allocation6 + $0x310] sm:$0xff] }
 0x331   :  { %1242 = vmatpush2.msra.mxu1 %v1179_v23  ;;  %1107 = vmatprep.subr.mxu0 %v1029_v24  ;;  %v1165_v23 = vld [vmem:[#allocation8 + $0x310] sm:$0xff] }
 0x332   :  { %1243 = vmatprep.subr.mxu1 %v1178_v25  ;;  %1108 = vmatpush2.msra.mxu0 %v1028_v26  ;;  %v1015_v26 = vld [vmem:[#allocation6 + $0x308] sm:$0xff] }
 0x333   :  { %1244 = vmatpush2.msra.mxu1 %v1177_v21  ;;  %1109 = vmatprep.subr.mxu0 %v1027_v27  ;;  %v1164_v21 = vld [vmem:[#allocation8 + $0x308] sm:$0xff] }
 0x334   :  { %1245 = vmatprep.subr.mxu1 %v1176_v28  ;;  %1110 = vmatpush2.msra.mxu0 %v1026_v29  ;;  %v1014_v28 = vld [vmem:[#allocation6 + $0x300] sm:$0xff] }
 0x335   :  { %1246 = vmatpush2.msra.mxu1 %v1175_v32  ;;  %1111 = vmatprep.subr.mxu0 %v1025_v2 }
 0x336   :  { %1247 = vmatprep.subr.mxu1 %v1174_v3  ;;  %1112 = vmatpush2.msra.mxu0 %v1024_v5 }
 0x337   :  { %1248 = vmatpush2.msra.mxu1 %v1173_v6  ;;  %1113 = vmatprep.subr.mxu0 %v1023_v47 }
 0x338   :  { %1249 = vmatprep.subr.mxu1 %v1172_v48  ;;  %1114 = vmatpush2.msra.mxu0 %v1022_v7 }
 0x339   :  { %1250 = vmatpush2.msra.mxu1 %v1171_v38 }
 0x33a   :  { %1251 = vmatprep.subr.mxu1 %v1170_v45 }
 0x33b   :  { %1252 = vmatpush2.msra.mxu1 %v1169_v10 }
 0x33c   :  { %1253 = vmatprep.subr.mxu1 %v1168_v12 }
 0x33d   :  { %1254 = vmatpush2.msra.mxu1 %v1167_v15 }
 0x33e   :  { %1255 = vmatprep.subr.mxu1 %v1166_v20 }
 0x33f   :  { %1256 = vmatpush2.msra.mxu1 %v1165_v23 }
 0x340   :  { %1257 = vmatprep.subr.mxu1 %v1164_v21  ;;  %v3461_v21 = vld [vmem:[#allocation11 + $0xd0] sm:$0xff] }
 0x370   :  { %v938_v33 = vpop.permute.xlu1 %937  ;;  %v935_v50 = vpop.permute.xlu0 %934 }
 0x371   :  { %v947_v34 = vsel %vm734_vm8, %v935_v50, %v938_v33 }
 0x372   :  { %v948_v35 = vsel %vm736_vm9, %v947_v34, %v935_v50  ;;  %v3456_v50 = vld [vmem:[#allocation11 + $0xf8] sm:$0xff] }
 0x373   :  { %v949_v53 = vsel %vm738_vm10, %v948_v35, %v938_v33 }
 0x374   :  { %v894_v57 = vpop.permute.xlu1 %893  ;;  %v891_v56 = vpop.permute.xlu0 %890  ;;  %v953_v0 = vadd.f32 %v949_v53, %v4177_v54  ;;  %v1021_v54 = vld [vmem:[#allocation6 + $0x338] sm:$0xff] }
 0x375   :  { %v903_v37 = vsel %vm734_vm8, %v891_v56, %v894_v57  ;;  %1115 = vmatprep.subr.mxu0 %v1021_v54 }
 0x376   :  { %966 = vrot.lane.b32.xlu1 %v953_v0, %s3811_s3  ;;  %v904_v31 = vsel %vm736_vm9, %v903_v37, %v891_v56  ;;  %1116 = vmatpush2.msra.mxu0 %v1020_v9 }
 0x377   :  { %1117 = vmatprep.subr.mxu0 %v1019_v11  ;;  %v905_v24 = vsel %vm738_vm10, %v904_v31, %v894_v57 }
 0x378   :  { %v901_v8 = vpop.permute.xlu1 %900  ;;  %v898_v17 = vpop.permute.xlu0 %897  ;;  %1118 = vmatpush2.msra.mxu0 %v1018_v14  ;;  %v909_v33 = vadd.f32 %v905_v24, %v4179_v49 }
 0x379   :  { %v906_v36 = vsel %vm734_vm8, %v898_v17, %v901_v8  ;;  %1119 = vmatprep.subr.mxu0 %v1017_v43 }
 0x37a   :  { %v907_v16 = vsel %vm736_vm9, %v906_v36, %v898_v17  ;;  %1120 = vmatpush2.msra.mxu0 %v1016_v22  ;;  %v377_v17 = vld [vmem:[%s5176_s5] sm:$0x3] }
 0x37b   :  { %v908_v13 = vsel %vm738_vm10, %v907_v16, %v901_v8  ;;  %1121 = vmatprep.subr.mxu0 %v1015_v26  ;;  %v386_v45 = vrot.slane %v377_v17, %v4034_v41  ;;  %v3460_v26 = vld [vmem:[#allocation11 + $0xd8] sm:$0xff] }
 0x37c   :  { %v945_v18 = vpop.permute.xlu1 %944  ;;  %v942_v30 = vpop.permute.xlu0 %941  ;;  %v910_v19 = vadd.f32 %v908_v13, %v4188_v61  ;;  %v1163_v61 = vld [vmem:[#allocation8 + $0x300] sm:$0xff]  ;;  %1122 = vmatpush2.msra.mxu0 %v1014_v28  ;;  %v382_v13 = vrot.slane %v377_v17, %v4028_v39  ;;  %v3463_v28 = vld [vmem:[#allocation11 + $0xc0] sm:$0xff] }
 0x37d   :  { %v950_v25 = vsel %vm734_vm8, %v942_v30, %v945_v18  ;;  %1258 = vmatpush2.msra.mxu1 %v1163_v61  ;;  %1268 = vmatprep.subr.mxu0 %v3456_v50  ;;  %v458_v14 = vadd.f32 %v4068_v59, %v386_v45  ;;  %v3464_v61 = vld [vmem:[#allocation11 + $0xb8] sm:$0xff]  ;;  %v3487_v17 = vld [vmem:[#allocation11] sm:$0xff]  ;;  %v3489_v45 = vld [vmem:[#allocation11 + $0x1f0] sm:$0xff] }
 0x37e   :  { %v951_v27 = vsel %vm736_vm9, %v950_v25, %v942_v30  ;;  %960 = vrot.lane.b32.xlu0 %v910_v19, %s3811_s3  ;;  %v456_v22 = vadd.f32 %v4066_v58, %v382_v13  ;;  %v3457_v58 = vld [vmem:[#allocation11 + $0xf0] sm:$0xff]  ;;  %v3468_v50 = vld [vmem:[#allocation11 + $0x98] sm:$0xff] }
 0x37f   :  { %v952_v29 = vsel %vm738_vm10, %v951_v27, %v945_v18  ;;  %v3462_v27 = vld [vmem:[#allocation11 + $0xc8] sm:$0xff]  ;;  %v3497_v13 = vld [vmem:[#allocation11 + $0x1b0] sm:$0xff] }
 0x380   :  { %v954_v32 = vadd.f32 %v952_v29, %v4191_v55  ;;  %v916_v34 = vpop.permute.xlu1 %915  ;;  %v913_v35 = vpop.permute.xlu0 %912  ;;  %v3465_v29 = vld [vmem:[#allocation11 + $0xb0] sm:$0xff] }
 0x381   :  { %v925_v55 = vsel %vm734_vm8, %v913_v35, %v916_v34 }
 0x382   :  { %970 = vrot.lane.b32.xlu1 %v954_v32, %s3811_s3  ;;  %956 = vrot.lane.b32.xlu0 %v909_v33, %s3811_s3  ;;  %v926_v5 = vsel %vm736_vm9, %v925_v55, %v913_v35  ;;  %v3466_v32 = vld [vmem:[#allocation11 + $0xa8] sm:$0xff]  ;;  %v3467_v33 = vld [vmem:[#allocation11 + $0xa0] sm:$0xff] }
 0x383   :  { %v927_v37 = vsel %vm738_vm10, %v926_v5, %v916_v34  ;;  %v3469_v34 = vld [vmem:[#allocation11 + $0x90] sm:$0xff]  ;;  %v3470_v35 = vld [vmem:[#allocation11 + $0x88] sm:$0xff]  ;;  %v3475_v55 = vld [vmem:[#allocation11 + $0x60] sm:$0xff] }
 0x384   :  { %v872_v53 = vpop.permute.xlu1 %871  ;;  %v869_v57 = vpop.permute.xlu0 %868  ;;  %v931_v36 = vadd.f32 %v927_v37, %v4181_v52  ;;  %v3479_v5 = vld [vmem:[#allocation11 + $0x40] sm:$0xff] }
 0x385   :  { %v881_v47 = vsel %vm734_vm8, %v869_v57, %v872_v53  ;;  %v3483_v37 = vld [vmem:[#allocation11 + $0x20] sm:$0xff] }
 0x386   :  { %v882_v38 = vsel %vm736_vm9, %v881_v47, %v869_v57  ;;  %v3472_v57 = vld [vmem:[#allocation11 + $0x78] sm:$0xff]  ;;  %v3481_v47 = vld [vmem:[#allocation11 + $0x30] sm:$0xff] }
 0x387   :  { %v883_v16 = vsel %vm738_vm10, %v882_v38, %v872_v53  ;;  %v3471_v53 = vld [vmem:[#allocation11 + $0x80] sm:$0xff]  ;;  %v3485_v38 = vld [vmem:[#allocation11 + $0x10] sm:$0xff] }
 0x388   :  { %v879_v56 = vpop.permute.xlu1 %878  ;;  %v876_v0 = vpop.permute.xlu0 %875  ;;  %v887_v18 = vadd.f32 %v883_v16, %v4185_v60  ;;  %v3458_v60 = vld [vmem:[#allocation11 + $0xe8] sm:$0xff] }
 0x389   :  { %v884_v49 = vsel %vm734_vm8, %v876_v0, %v879_v56  ;;  %v3494_v16 = vld [vmem:[#allocation11 + $0x1c8] sm:$0xff] }
 0x38a   :  { %v885_v6 = vsel %vm736_vm9, %v884_v49, %v876_v0  ;;  %v3474_v0 = vld [vmem:[#allocation11 + $0x68] sm:$0xff]  ;;  %v3476_v49 = vld [vmem:[#allocation11 + $0x58] sm:$0xff] }
 0x38b   :  { %v886_v7 = vsel %vm738_vm10, %v885_v6, %v879_v56  ;;  %v3473_v56 = vld [vmem:[#allocation11 + $0x70] sm:$0xff]  ;;  %v3480_v6 = vld [vmem:[#allocation11 + $0x38] sm:$0xff] }
 0x38c   :  { %v923_v2 = vpop.permute.xlu1 %922  ;;  %v920_v3 = vpop.permute.xlu0 %919  ;;  %v888_v9 = vadd.f32 %v886_v7, %v4194_v62  ;;  %v3484_v7 = vld [vmem:[#allocation11 + $0x18] sm:$0xff] }
 0x38d   :  { %v928_v48 = vsel %vm734_vm8, %v920_v3, %v923_v2 }
 0x38e   :  { %v929_v8 = vsel %vm736_vm9, %v928_v48, %v920_v3  ;;  %v3478_v3 = vld [vmem:[#allocation11 + $0x48] sm:$0xff] }
 0x38f   :  { %v930_v31 = vsel %vm738_vm10, %v929_v8, %v923_v2  ;;  %v3477_v2 = vld [vmem:[#allocation11 + $0x50] sm:$0xff]  ;;  %v3482_v48 = vld [vmem:[#allocation11 + $0x28] sm:$0xff] }
 0x390   :  { %v932_v43 = vadd.f32 %v930_v31, %v4197_v63  ;;  %v3459_v63 = vld [vmem:[#allocation11 + $0xe0] sm:$0xff]  ;;  %v3486_v8 = vld [vmem:[#allocation11 + $0x8] sm:$0xff]  ;;  %v3493_v31 = vld [vmem:[#allocation11 + $0x1d0] sm:$0xff] }
 0x3e8   :  { %v967_v54 = vpop.permute.xlu1 %966 }
 0x3e9   :  { %v973_v11 = vadd.f32 %v967_v54, %v931_v36  ;;  %v3488_v54 = vld [vmem:[#allocation11 + $0x1f8] sm:$0xff]  ;;  %v3490_v36 = vld [vmem:[#allocation11 + $0x1e8] sm:$0xff] }
 0x3f0   :  { %v961_v10 = vpop.permute.xlu0 %960 }
 0x3f1   :  { %v964_v12 = vadd.f32 %v961_v10, %v888_v9  ;;  %v3491_v9 = vld [vmem:[#allocation11 + $0x1e0] sm:$0xff]  ;;  %v3492_v10 = vld [vmem:[#allocation11 + $0x1d8] sm:$0xff] }
 0x3f3   :  { %v976_v15 = vadd.f32 %v973_v11, %v964_v12  ;;  %v3495_v11 = vld [vmem:[#allocation11 + $0x1c0] sm:$0xff]  ;;  %v3496_v12 = vld [vmem:[#allocation11 + $0x1b8] sm:$0xff] }
 0x3f4   :  { %v971_v30 = vpop.permute.xlu1 %970  ;;  %v957_v52 = vpop.permute.xlu0 %956 }
 0x3f5   :  { %v978_v19 = vadd.f32 %v976_v15, %v458_v14  ;;  %v974_v62 = vadd.f32 %v971_v30, %v932_v43  ;;  %v963_v20 = vadd.f32 %v957_v52, %v887_v18  ;;  %v3498_v14 = vld [vmem:[#allocation11 + $0x1a8] sm:$0xff]  ;;  %v3499_v15 = vld [vmem:[#allocation11 + $0x1a0] sm:$0xff]  ;;  %v3500_v43 = vld [vmem:[#allocation11 + $0x198] sm:$0xff] }
 0x3f6   :  { %v3501_v18 = vld [vmem:[#allocation11 + $0x190] sm:$0xff]  ;;  %v3502_v30 = vld [vmem:[#allocation11 + $0x188] sm:$0xff]  ;;  %v3503_v52 = vld [vmem:[#allocation11 + $0x180] sm:$0xff] }
 0x3f7   :  { %v4287_v23 = vmul.f32 0.70710677, %v978_v19  ;;  %v975_v24 = vadd.f32 %v974_v62, %v963_v20  ;;  %v3504_v19 = vld [vmem:[#allocation11 + $0x178] sm:$0xff]  ;;  %v3505_v62 = vld [vmem:[#allocation11 + $0x170] sm:$0xff]  ;;  %v3506_v20 = vld [vmem:[#allocation11 + $0x168] sm:$0xff] }
 0x3f9   :  { %v977_v25 = vadd.f32 %v975_v24, %v456_v22  ;;  %1123 = vmatprep.mubr.f32.mxu0 %v4287_v23  ;;  %1259 = vmatprep.mubr.f32.mxu1 %v4287_v23  ;;  %v3507_v22 = vld [vmem:[#allocation11 + $0x160] sm:$0xff]  ;;  %v3508_v24 = vld [vmem:[#allocation11 + $0x158] sm:$0xff] }
 0x3fb   :  { %v4291_v59 = vmul.f32 0.70710677, %v977_v25  ;;  %v3509_v25 = vld [vmem:[#allocation11 + $0x150] sm:$0xff] }
 0x3fd   :  { %1401 = vrot.lane.b32.xlu1 %v4291_v59, %s3811_s3  ;;  %1398 = vrot.lane.b32.xlu0 %v4291_v59, %s3802_s29 }
 0x3fe   :  { %1124 = vmatmul.mubr.f32.vlgmr.msra.gmra.mxu0 %v4291_v59  ;;  %1260 = vmatmul.mubr.f32.vlgmr.msra.gmra.mxu1 %v4291_v59 }
 0x3ff   :  { %1269 = vmatpush1.msra.mxu0 %v3457_v58  ;;  %v3510_v58 = vld [vmem:[#allocation11 + $0x148] sm:$0xff] }
 0x400   :  { %1270 = vmatprep.subr.mxu0 %v3458_v60  ;;  %v3511_v60 = vld [vmem:[#allocation11 + $0x140] sm:$0xff] }
 0x401   :  { %1471 = vrot.lane.b32.xlu1 %v4287_v23, %s3811_s3  ;;  %1468 = vrot.lane.b32.xlu0 %v4287_v23, %s3802_s29 }
 0x402   :  { %1271 = vmatpush1.msra.mxu0 %v3459_v63  ;;  %v3512_v63 = vld [vmem:[#allocation11 + $0x138] sm:$0xff] }
 0x403   :  { %1272 = vmatprep.subr.mxu0 %v3460_v26  ;;  %v3513_v26 = vld [vmem:[#allocation11 + $0x130] sm:$0xff] }
 0x404   :  { %1273 = vmatpush1.msra.mxu0 %v3461_v21  ;;  %v3514_v21 = vld [vmem:[#allocation11 + $0x128] sm:$0xff] }
 0x405   :  { %1474 = vrot.lane.b32.xlu1 %v4287_v23, %s3812_s24  ;;  %1404 = vrot.lane.b32.xlu0 %v4291_v59, %s3812_s24 }
 0x406   :  { %1274 = vmatprep.subr.mxu0 %v3462_v27  ;;  %v3515_v27 = vld [vmem:[#allocation11 + $0x120] sm:$0xff] }
 0x407   :  { %1275 = vmatpush1.msra.mxu0 %v3463_v28  ;;  %v3516_v28 = vld [vmem:[#allocation11 + $0x118] sm:$0xff] }
 0x408   :  { %1276 = vmatprep.subr.mxu0 %v3464_v61  ;;  %v3517_v61 = vld [vmem:[#allocation11 + $0x110] sm:$0xff] }
 0x409   :  { %1277 = vmatpush1.msra.mxu0 %v3465_v29  ;;  %v3518_v29 = vld [vmem:[#allocation11 + $0x108] sm:$0xff] }
 0x40a   :  { %1278 = vmatprep.subr.mxu0 %v3466_v32  ;;  %v3519_v32 = vld [vmem:[#allocation11 + $0x100] sm:$0xff] }
 0x40b   :  { %1279 = vmatpush1.msra.mxu0 %v3467_v33 }
 0x40c   :  { %1280 = vmatprep.subr.mxu0 %v3468_v50 }
 0x40d   :  { %1281 = vmatpush1.msra.mxu0 %v3469_v34 }
 0x40e   :  { %1282 = vmatprep.subr.mxu0 %v3470_v35 }
 0x40f   :  { %1283 = vmatpush1.msra.mxu0 %v3471_v53 }
 0x410   :  { %1284 = vmatprep.subr.mxu0 %v3472_v57 }
 0x411   :  { %1285 = vmatpush1.msra.mxu0 %v3473_v56 }
 0x412   :  { %1286 = vmatprep.subr.mxu0 %v3474_v0 }
 0x413   :  { %1287 = vmatpush1.msra.mxu0 %v3475_v55 }
 0x414   :  { %1288 = vmatprep.subr.mxu0 %v3476_v49 }
 0x415   :  { %1289 = vmatpush1.msra.mxu0 %v3477_v2 }
 0x416   :  { %1290 = vmatprep.subr.mxu0 %v3478_v3  ;;  %v4335_v3 = vld [vmem:[%s5179_s8 + $0x10] sm:$0xff] }
 0x417   :  { %1291 = vmatpush1.msra.mxu0 %v3479_v5  ;;  %v4340_v5 = vld [vmem:[%s5179_s8 + $0x18] sm:$0xff] }
 0x418   :  { %1292 = vmatprep.subr.mxu0 %v3480_v6 }
 0x419   :  { %1293 = vmatpush1.msra.mxu0 %v3481_v47 }
 0x41a   :  { %1294 = vmatprep.subr.mxu0 %v3482_v48 }
 0x41b   :  { %1295 = vmatpush1.msra.mxu0 %v3483_v37  ;;  %v1513_v37 = vrot.slane %v4335_v3, %v4096_v44 }
 0x41c   :  { %1296 = vmatprep.subr.mxu0 %v3484_v7  ;;  %v1447_v7 = vrot.slane %v4340_v5, %v4099_v46 }
 0x41d   :  { %1297 = vmatpush1.msra.mxu0 %v3485_v38  ;;  %v1517_v38 = vrot.slane %v4340_v5, %v4096_v44 }
 0x41e   :  { %1298 = vmatprep.subr.mxu0 %v3486_v8  ;;  %v1443_v8 = vrot.slane %v4335_v3, %v4099_v46 }
 0x41f   :  { %1299 = vmatpush1.msra.mxu0 %v3487_v17  ;;  %v1483_v17 = vrot.slane %v4335_v3, %v4113_v51 }
 0x420   :  { %1300 = vmatprep.subr.mxu0 %v3488_v54  ;;  %v1417_v54 = vrot.slane %v4340_v5, %v4028_v39 }
 0x421   :  { %1301 = vmatpush2.msra.mxu0 %v3489_v45 }
 0x422   :  { %1302 = vmatprep.subr.mxu0 %v3490_v36 }
 0x423   :  { %1303 = vmatpush2.msra.mxu0 %v3491_v9  ;;  %v1487_v9 = vrot.slane %v4340_v5, %v4113_v51 }
 0x424   :  { %1304 = vmatprep.subr.mxu0 %v3492_v10  ;;  %v1413_v10 = vrot.slane %v4335_v3, %v4028_v39 }
 0x425   :  { %1305 = vmatpush2.msra.mxu0 %v3493_v31 }
 0x426   :  { %1306 = vmatprep.subr.mxu0 %v3494_v16 }
 0x427   :  { %1307 = vmatpush2.msra.mxu0 %v3495_v11 }
 0x428   :  { %1308 = vmatprep.subr.mxu0 %v3496_v12 }
 0x429   :  { %1309 = vmatpush2.msra.mxu0 %v3497_v13 }
 0x42a   :  { %1310 = vmatprep.subr.mxu0 %v3498_v14 }
 0x42b   :  { %1311 = vmatpush2.msra.mxu0 %v3499_v15 }
 0x42c   :  { %1312 = vmatprep.subr.mxu0 %v3500_v43 }
 0x42d   :  { %1313 = vmatpush2.msra.mxu0 %v3501_v18 }
 0x42e   :  { %1314 = vmatprep.subr.mxu0 %v3502_v30 }
 0x42f   :  { %1315 = vmatpush2.msra.mxu0 %v3503_v52 }
 0x430   :  { %1316 = vmatprep.subr.mxu0 %v3504_v19 }
 0x431   :  { %1317 = vmatpush2.msra.mxu0 %v3505_v62 }
 0x432   :  { %1318 = vmatprep.subr.mxu0 %v3506_v20 }
 0x433   :  { %1319 = vmatpush2.msra.mxu0 %v3507_v22 }
 0x434   :  { %1320 = vmatprep.subr.mxu0 %v3508_v24 }
 0x435   :  { %1321 = vmatpush2.msra.mxu0 %v3509_v25 }
 0x436   :  { %1322 = vmatprep.subr.mxu0 %v3510_v58 }
 0x437   :  { %1323 = vmatpush2.msra.mxu0 %v3511_v60 }
 0x438   :  { %1324 = vmatprep.subr.mxu0 %v3512_v63 }
 0x439   :  { %1325 = vmatpush2.msra.mxu0 %v3513_v26 }
 0x43a   :  { %1326 = vmatprep.subr.mxu0 %v3514_v21 }
 0x43b   :  { %1327 = vmatpush2.msra.mxu0 %v3515_v27 }
 0x43c   :  { %1328 = vmatprep.subr.mxu0 %v3516_v28 }
 0x43d   :  { %1329 = vmatpush2.msra.mxu0 %v3517_v61 }
 0x43e   :  { %1330 = vmatprep.subr.mxu0 %v3518_v29 }
 0x43f   :  { %1331 = vmatpush2.msra.mxu0 %v3519_v32 }
 0x46f   :  { %v4307_v33 = vpop.permute.xlu1 %1401  ;;  %v4309_v50 = vpop.permute.xlu0 %1398 }
 0x470   :  { %v1407_v34 = vsel %vm734_vm8, %v4291_v59, %v4309_v50 }
 0x471   :  { %v1408_v35 = vsel %vm736_vm9, %v1407_v34, %v4307_v33 }
 0x473   :  { %v4316_v53 = vpop.permute.xlu1 %1471  ;;  %v4318_v57 = vpop.permute.xlu0 %1468 }
 0x474   :  { %v1477_v56 = vsel %vm734_vm8, %v4287_v23, %v4318_v57 }
 0x475   :  { %v1478_v0 = vsel %vm736_vm9, %v1477_v56, %v4316_v53 }
 0x477   :  { %v4325_v55 = vpop.permute.xlu1 %1474  ;;  %v4327_v49 = vpop.permute.xlu0 %1404 }
 0x478   :  { %v1507_v2 = vsel %vm734_vm8, %v4316_v53, %v4325_v55  ;;  %v1437_v6 = vsel %vm734_vm8, %v4307_v33, %v4327_v49  ;;  %v1479_v45 = vsel %vm738_vm10, %v1478_v0, %v4325_v55  ;;  %v1409_v36 = vsel %vm738_vm10, %v1408_v35, %v4327_v49 }
 0x479   :  { %v1508_v47 = vsel %vm736_vm9, %v1507_v2, %v4287_v23  ;;  %v1438_v48 = vsel %vm736_vm9, %v1437_v6, %v4291_v59  ;;  %v4381_v15 = vmul.f32 %v1483_v17, %v1479_v45  ;;  %v4383_v43 = vmul.f32 %v1417_v54, %v1409_v36 }
 0x47a   :  { %v1509_v31 = vsel %vm738_vm10, %v1508_v47, %v4318_v57  ;;  %v1439_v16 = vsel %vm738_vm10, %v1438_v48, %v4309_v50  ;;  %v4385_v18 = vmul.f32 %v1487_v9, %v1479_v45  ;;  %v4387_v30 = vmul.f32 %v1413_v10, %v1409_v36  ;;  %v1372_v47 = vld [vmem:[#allocation9 + $0x2] sm:$0x3] }
 0x47b   :  { %v4373_v11 = vmul.f32 %v1513_v37, %v1509_v31  ;;  %v4375_v12 = vmul.f32 %v1447_v7, %v1439_v16  ;;  %v4377_v13 = vmul.f32 %v1517_v38, %v1509_v31  ;;  %v4379_v14 = vmul.f32 %v1443_v8, %v1439_v16 }
 0x47c   :  { %v1379_v8 = vrot.slane %v1372_v47, %v4028_v39  ;;  %v1383_v10 = vrot.slane %v1372_v47, %v4034_v41 }
 0x4be   :  { %v4389_v52 = vpop.f32.mrf.mxu1  ;;  %v4397_v22 = vpop.f32.mrf.mxu0 }
 0x4bf   :  { %v1266_v20 = vmul.f32 %v4389_v52, %v4389_v52 }
 0x4c0   :  { %v4391_v19 = vpop.f32.mrf.mxu1  ;;  %v4399_v24 = vpop.f32.mrf.mxu0 }
 0x4c1   :  { %v1267_v62 = vmul.f32 %v4391_v19, %v4391_v19 }
 0x4c3   :  { %1332 = vmatprep.mubr.f32.mxu0 %v1267_v62 }
 0x4c4   :  { %1333 = vmatmul.mubr.f32.vlgmr.msra.gmra.mxu0 %v1266_v20 }
 0x584   :  { %v1334_v25 = vpop.f32.mrf.mxu0 }
 0x585   :  { %v1339_v58 = vmul.f32 %v1334_v25, %v1334_v25 }
 0x586   :  { %v1336_v60 = vpop.f32.mrf.mxu0 }
 0x587   :  { %v1341_v63 = vadd.f32 1e-16, %v1339_v58  ;;  %v1340_v26 = vmul.f32 %v1336_v60, %v1336_v60  ;;  %v1522_v60 = vsel %vm734_vm8, %v4318_v57, %v4316_v53 }
 0x589   :  { %3414 = vrsqrt.f32 %v1341_v63  ;;  %v1342_v21 = vadd.f32 1e-16, %v1340_v26  ;;  %vm1345_vm11 = vcmp.eq.f32.partialorder %v1341_v63, inf  ;;  %v1348_v61 = vand.u32 2147483648, %v1341_v63 }
 0x58a   :  { %vm1347_vm12 = vcmp.eq.f32.partialorder %v1341_v63, 0.0  ;;  %v1452_v26 = vsel %vm734_vm8, %v4309_v50, %v4307_v33 }
 0x58b   :  { %3416 = vrsqrt.f32 %v1342_v21  ;;  %vm1352_vm13 = vcmp.eq.f32.partialorder %v1342_v21, inf  ;;  %v1355_v56 = vand.u32 2147483648, %v1342_v21  ;;  %vm1354_vm14 = vcmp.eq.f32.partialorder %v1342_v21, 0.0 }
 0x596   :  { %v3415_v27 = vpop.eup %3414 }
 0x597   :  { %v1344_v28 = vmul.f32 %v3415_v27, %v1341_v63  ;;  %v1528_v27 = vrot.slane %v4335_v3, %v4085_v40 }
 0x598   :  { %v3417_v29 = vpop.eup %3416 }
 0x599   :  { %v1346_v32 = vsel %vm1345_vm11, %v1341_v63, %v1344_v28  ;;  %v1351_v35 = vmul.f32 %v3417_v29, %v1342_v21  ;;  %v1523_v63 = vsel %vm736_vm9, %v1522_v60, %v4325_v55  ;;  %v1828_v60 = vld [vmem:[#allocation8 + $0x4d8] sm:$0xff] }
 0x59a   :  { %v1349_v34 = vsel %vm1347_vm12, %v1348_v61, %v1346_v32  ;;  %v1524_v28 = vsel %vm738_vm10, %v1523_v63, %v4287_v23  ;;  %v1458_v61 = vrot.slane %v4335_v3, %v4088_v42 }
 0x59b   :  { %3418 = vrsqrt.f32 %v1349_v34  ;;  %v1353_v0 = vsel %vm1352_vm13, %v1342_v21, %v1351_v35  ;;  %vm1359_vm15 = vcmp.eq.f32.partialorder %v1349_v34, inf  ;;  %v1362_v37 = vand.u32 2147483648, %v1349_v34 }
 0x59c   :  { %v1356_v2 = vsel %vm1354_vm14, %v1355_v56, %v1353_v0  ;;  %vm1361_vm0 = vcmp.eq.f32.partialorder %v1349_v34, 0.0  ;;  %v1453_v21 = vsel %vm736_vm9, %v1452_v26, %v4327_v49  ;;  %v1533_v35 = vmul.f32 %v1528_v27, %v1524_v28  ;;  %v1827_v27 = vld [vmem:[#allocation8 + $0x4d0] sm:$0xff] }
 0x59d   :  { %3420 = vrsqrt.f32 %v1356_v2  ;;  %vm1366_vm1 = vcmp.eq.f32.partialorder %v1356_v2, inf  ;;  %v1369_v36 = vand.u32 2147483648, %v1356_v2  ;;  %vm1368_vm2 = vcmp.eq.f32.partialorder %v1356_v2, 0.0 }
 0x59e   :  { %v1454_v32 = vsel %vm738_vm10, %v1453_v21, %v4291_v59  ;;  %v1502_v26 = vrot.slane %v4340_v5, %v4207_v4  ;;  %v1678_v21 = vld [vmem:[#allocation6 + $0x4d0] sm:$0xff] }
 0x5a8   :  { %v3419_v6 = vpop.eup %3418 }
 0x5a9   :  { %v1358_v48 = vmul.f32 %v3419_v6, %v1349_v34 }
 0x5aa   :  { %v3421_v7 = vpop.eup %3420 }
 0x5ab   :  { %v1360_v38 = vsel %vm1359_vm15, %v1349_v34, %v1358_v48  ;;  %v1365_v54 = vmul.f32 %v3421_v7, %v1356_v2 }
 0x5ac   :  { %v1363_v17 = vsel %vm1361_vm0, %v1362_v37, %v1360_v38 }
 0x5ad   :  { %v3306_v45 = vadd.f32 -1.0, %v1363_v17  ;;  %v1367_v9 = vsel %vm1366_vm1, %v1356_v2, %v1365_v54  ;;  %v1463_v2 = vmul.f32 %v1458_v61, %v1454_v32  ;;  %v1677_v61 = vld [vmem:[#allocation6 + $0x4c8] sm:$0xff] }
 0x5ae   :  { %v1370_v16 = vsel %vm1368_vm2, %v1369_v36, %v1367_v9  ;;  %v1683_v9 = vld [vmem:[#allocation6 + $0x4f8] sm:$0xff] }
 0x5af   :  { %v1386_v31 = vmul.f32 %v3306_v45, %v1379_v8  ;;  %v3307_v62 = vadd.f32 -1.0, %v1370_v16  ;;  %1729 = vmatprep.subr.mxu1 %v1683_v9  ;;  %v1831_v16 = vld [vmem:[#allocation8 + $0x4f0] sm:$0xff]  ;;  %v1813_v9 = vld [vmem:[#allocation8 + $0x460] sm:$0xff] }
 0x5b1   :  { %v1388_v20 = vadd.f32 1.0, %v1386_v31  ;;  %v1387_v25 = vmul.f32 %v3307_v62, %v1383_v10  ;;  %v1832_v10 = vld [vmem:[#allocation8 + $0x4f8] sm:$0xff]  ;;  %v1682_v31 = vld [vmem:[#allocation6 + $0x4f0] sm:$0xff]  ;;  %v1681_v62 = vld [vmem:[#allocation6 + $0x4e8] sm:$0xff] }
 0x5b2   :  { %1865 = vmatprep.subr.mxu0 %v1832_v10  ;;  %1730 = vmatpush1.msra.mxu1 %v1682_v31  ;;  %v1663_v10 = vld [vmem:[#allocation6 + $0x458] sm:$0xff] }
 0x5b3   :  { %3422 = vrcp.f32 %v1388_v20  ;;  %v1389_v58 = vadd.f32 1.0, %v1387_v25  ;;  %1866 = vmatpush1.msra.mxu0 %v1831_v16  ;;  %v1829_v25 = vld [vmem:[#allocation8 + $0x4e0] sm:$0xff]  ;;  %1731 = vmatprep.subr.mxu1 %v1681_v62  ;;  %v1812_v31 = vld [vmem:[#allocation8 + $0x458] sm:$0xff]  ;;  %v1662_v16 = vld [vmem:[#allocation6 + $0x450] sm:$0xff] }
 0x5b4   :  { %v1811_v62 = vld [vmem:[#allocation8 + $0x450] sm:$0xff] }
 0x5b5   :  { %3424 = vrcp.f32 %v1389_v58  ;;  %v1679_v58 = vld [vmem:[#allocation6 + $0x4d8] sm:$0xff] }
 0x5c0   :  { %v3423_v29 = vpop.eup %3422 }
 0x5c1   :  { %v1391_v34 = vmul.f32 %v3423_v29, %v4389_v52  ;;  %v1462_v52 = vrot.slane %v4340_v5, %v4088_v42  ;;  %v1826_v29 = vld [vmem:[#allocation8 + $0x4c8] sm:$0xff] }
 0x5c2   :  { %v3425_v56 = vpop.eup %3424 }
 0x5c3   :  { %v1535_v0 = vmul.f32 %v1533_v35, %v1391_v34  ;;  %v4423_v6 = vmul.f32 %v3425_v56, %v4391_v19  ;;  %v4426_v47 = vmul.f32 %v4373_v11, %v1391_v34  ;;  %v4429_v48 = vmul.f32 %v4379_v14, %v1391_v34  ;;  %v1824_v56 = vld [vmem:[#allocation8 + $0x4b8] sm:$0xff] }
 0x5c4   :  { %v4432_v37 = vmul.f32 %v4381_v15, %v1391_v34  ;;  %v4439_v7 = vmul.f32 %v4387_v30, %v1391_v34  ;;  %v1465_v19 = vmul.f32 %v1463_v2, %v1391_v34  ;;  %v1492_v30 = vsel %vm734_vm8, %v4325_v55, %v4287_v23  ;;  %v1674_v2 = vld [vmem:[#allocation6 + $0x4b0] sm:$0xff] }
 0x5c5   :  { %1607 = vrot.lane.b32.xlu1 %v1535_v0, %s3802_s29  ;;  %1604 = vrot.lane.b32.xlu0 %v1535_v0, %s3812_s24  ;;  %v4443_v11 = vmul.f32 %v4375_v12, %v4423_v6  ;;  %v4447_v14 = vmul.f32 %v4377_v13, %v4423_v6  ;;  %v4451_v15 = vmul.f32 %v4383_v43, %v4423_v6 }
 0x5c6   :  { %v4455_v38 = vmul.f32 %v4385_v18, %v4423_v6  ;;  %v1464_v12 = vmul.f32 %v1462_v52, %v1454_v32  ;;  %v1532_v13 = vrot.slane %v4340_v5, %v4085_v40  ;;  %v1493_v43 = vsel %vm736_vm9, %v1492_v30, %v4318_v57  ;;  %v1676_v32 = vld [vmem:[#allocation6 + $0x4c0] sm:$0xff]  ;;  %v1823_v52 = vld [vmem:[#allocation8 + $0x4b0] sm:$0xff]  ;;  %v1822_v30 = vld [vmem:[#allocation8 + $0x4a8] sm:$0xff] }
 0x5c7   :  { %v1422_v18 = vsel %vm734_vm8, %v4327_v49, %v4291_v59  ;;  %v1498_v55 = vrot.slane %v4335_v3, %v4207_v4  ;;  %v1494_v17 = vsel %vm738_vm10, %v1493_v43, %v4316_v53  ;;  %v1428_v49 = vrot.slane %v4335_v3, %v4034_v41  ;;  %v1830_v3 = vld [vmem:[#allocation8 + $0x4e8] sm:$0xff]  ;;  %v1820_v43 = vld [vmem:[#allocation8 + $0x498] sm:$0xff] }
 0x5c8   :  { %v1466_v8 = vmul.f32 %v1464_v12, %v4423_v6  ;;  %v1534_v23 = vmul.f32 %v1532_v13, %v1524_v28  ;;  %v1423_v57 = vsel %vm736_vm9, %v1422_v18, %v4309_v50  ;;  %v1432_v50 = vrot.slane %v4340_v5, %v4034_v41  ;;  %1867 = vmatprep.subr.mxu0 %v1830_v3  ;;  %v1675_v5 = vld [vmem:[#allocation6 + $0x4b8] sm:$0xff]  ;;  %v1672_v12 = vld [vmem:[#allocation6 + $0x4a0] sm:$0xff]  ;;  %v1819_v18 = vld [vmem:[#allocation8 + $0x490] sm:$0xff] }
 0x5c9   :  { %1563 = vrot.lane.b32.xlu1 %v1465_v19, %s3802_s29  ;;  %1560 = vrot.lane.b32.xlu0 %v1465_v19, %s3812_s24  ;;  %v1503_v59 = vmul.f32 %v1498_v55, %v1494_v17  ;;  %v1424_v45 = vsel %vm738_vm10, %v1423_v57, %v4307_v33  ;;  %v1680_v33 = vld [vmem:[#allocation6 + $0x4e0] sm:$0xff]  ;;  %v1504_v35 = vmul.f32 %v1502_v26, %v1494_v17  ;;  %v1673_v19 = vld [vmem:[#allocation6 + $0x4a8] sm:$0xff]  ;;  %v1667_v57 = vld [vmem:[#allocation6 + $0x478] sm:$0xff] }
 0x5ca   :  { %v1536_v54 = vmul.f32 %v1534_v23, %v4423_v6  ;;  %v1433_v53 = vmul.f32 %v1428_v49, %v1424_v45  ;;  %v1434_v63 = vmul.f32 %v1432_v50, %v1424_v45  ;;  %1732 = vmatpush1.msra.mxu1 %v1680_v33  ;;  %1868 = vmatpush1.msra.mxu0 %v1829_v25  ;;  %v1821_v13 = vld [vmem:[#allocation8 + $0x4a0] sm:$0xff]  ;;  %v1669_v23 = vld [vmem:[#allocation6 + $0x488] sm:$0xff]  ;;  %v1666_v49 = vld [vmem:[#allocation6 + $0x470] sm:$0xff] }
 0x5cb   :  { %v1505_v36 = vmul.f32 %v1503_v59, %v1391_v34  ;;  %1733 = vmatprep.subr.mxu1 %v1679_v58  ;;  %1869 = vmatprep.subr.mxu0 %v1828_v60  ;;  %v1506_v0 = vmul.f32 %v1504_v35, %v4423_v6  ;;  %v1818_v55 = vld [vmem:[#allocation8 + $0x488] sm:$0xff]  ;;  %v1668_v17 = vld [vmem:[#allocation6 + $0x480] sm:$0xff]  ;;  %v1816_v59 = vld [vmem:[#allocation8 + $0x478] sm:$0xff] }
 0x5cc   :  { %v1435_v20 = vmul.f32 %v1433_v53, %v1391_v34  ;;  %v1436_v28 = vmul.f32 %v1434_v63, %v4423_v6  ;;  %1734 = vmatpush1.msra.mxu1 %v1678_v21  ;;  %1870 = vmatpush1.msra.mxu0 %v1827_v27  ;;  %v1825_v34 = vld [vmem:[#allocation8 + $0x4c0] sm:$0xff]  ;;  %v1670_v6 = vld [vmem:[#allocation6 + $0x490] sm:$0xff]  ;;  %v1814_v53 = vld [vmem:[#allocation8 + $0x468] sm:$0xff] }
 0x5cd   :  { %1570 = vrot.lane.b32.xlu1 %v1466_v8, %s3802_s29  ;;  %1567 = vrot.lane.b32.xlu0 %v1466_v8, %s3812_s24  ;;  %v1671_v8 = vld [vmem:[#allocation6 + $0x498] sm:$0xff]  ;;  %v1815_v45 = vld [vmem:[#allocation8 + $0x470] sm:$0xff]  ;;  %v1664_v50 = vld [vmem:[#allocation6 + $0x460] sm:$0xff] }
 0x5ce   :  { %1735 = vmatprep.subr.mxu1 %v1677_v61  ;;  %1871 = vmatprep.subr.mxu0 %v1826_v29  ;;  %v1661_v3 = vld [vmem:[#allocation6 + $0x448] sm:$0xff]  ;;  %v1660_v33 = vld [vmem:[#allocation6 + $0x440] sm:$0xff]  ;;  %v1659_v58 = vld [vmem:[#allocation6 + $0x438] sm:$0xff] }
 0x5cf   :  { %1736 = vmatpush1.msra.mxu1 %v1676_v32  ;;  %1872 = vmatpush1.msra.mxu0 %v1825_v34  ;;  %v1809_v25 = vld [vmem:[#allocation8 + $0x440] sm:$0xff]  ;;  %v1808_v60 = vld [vmem:[#allocation8 + $0x438] sm:$0xff]  ;;  %v1658_v63 = vld [vmem:[#allocation6 + $0x430] sm:$0xff] }
 0x5d0   :  { %1737 = vmatprep.subr.mxu1 %v1675_v5  ;;  %1873 = vmatprep.subr.mxu0 %v1824_v56  ;;  %v1807_v26 = vld [vmem:[#allocation8 + $0x430] sm:$0xff]  ;;  %v1657_v21 = vld [vmem:[#allocation6 + $0x428] sm:$0xff]  ;;  %v1805_v61 = vld [vmem:[#allocation8 + $0x420] sm:$0xff] }
 0x5d1   :  { %1614 = vrot.lane.b32.xlu1 %v1536_v54, %s3802_s29  ;;  %1611 = vrot.lane.b32.xlu0 %v1536_v54, %s3812_s24  ;;  %v1817_v54 = vld [vmem:[#allocation8 + $0x480] sm:$0xff]  ;;  %v1806_v27 = vld [vmem:[#allocation8 + $0x428] sm:$0xff]  ;;  %v1655_v29 = vld [vmem:[#allocation6 + $0x418] sm:$0xff] }
 0x5d2   :  { %1738 = vmatpush1.msra.mxu1 %v1674_v2  ;;  %1874 = vmatpush1.msra.mxu0 %v1823_v52  ;;  %v1804_v32 = vld [vmem:[#allocation8 + $0x418] sm:$0xff]  ;;  %v1654_v34 = vld [vmem:[#allocation6 + $0x410] sm:$0xff]  ;;  %v1653_v5 = vld [vmem:[#allocation6 + $0x408] sm:$0xff] }
 0x5d3   :  { %1739 = vmatprep.subr.mxu1 %v1673_v19  ;;  %1875 = vmatprep.subr.mxu0 %v1822_v30  ;;  %v1803_v35 = vld [vmem:[#allocation8 + $0x410] sm:$0xff]  ;;  %v1802_v56 = vld [vmem:[#allocation8 + $0x408] sm:$0xff]  ;;  %v1801_v2 = vld [vmem:[#allocation8 + $0x400] sm:$0xff] }
 0x5d4   :  { %1740 = vmatpush1.msra.mxu1 %v1672_v12  ;;  %1876 = vmatpush1.msra.mxu0 %v1821_v13  ;;  %v1715_v52 = vld [vmem:[#allocation6 + $0x5f8] sm:$0xff]  ;;  %v1714_v30 = vld [vmem:[#allocation6 + $0x5f0] sm:$0xff]  ;;  %v1713_v13 = vld [vmem:[#allocation6 + $0x5e8] sm:$0xff] }
 0x5d5   :  { %1585 = vrot.lane.b32.xlu1 %v1505_v36, %s3802_s29  ;;  %1582 = vrot.lane.b32.xlu0 %v1505_v36, %s3812_s24  ;;  %v1665_v36 = vld [vmem:[#allocation6 + $0x468] sm:$0xff]  ;;  %v1864_v19 = vld [vmem:[#allocation8 + $0x5f8] sm:$0xff]  ;;  %v1863_v12 = vld [vmem:[#allocation8 + $0x5f0] sm:$0xff] }
 0x5d6   :  { %1741 = vmatprep.subr.mxu1 %v1671_v8  ;;  %1877 = vmatprep.subr.mxu0 %v1820_v43  ;;  %v1862_v8 = vld [vmem:[#allocation8 + $0x5e8] sm:$0xff]  ;;  %v1712_v43 = vld [vmem:[#allocation6 + $0x5e0] sm:$0xff] }
 0x5d7   :  { %1742 = vmatpush1.msra.mxu1 %v1670_v6  ;;  %1878 = vmatpush1.msra.mxu0 %v1819_v18  ;;  %v1861_v6 = vld [vmem:[#allocation8 + $0x5e0] sm:$0xff]  ;;  %v1711_v18 = vld [vmem:[#allocation6 + $0x5d8] sm:$0xff] }
 0x5d8   :  { %1743 = vmatprep.subr.mxu1 %v1669_v23  ;;  %1879 = vmatprep.subr.mxu0 %v1818_v55  ;;  %v1860_v23 = vld [vmem:[#allocation8 + $0x5d8] sm:$0xff]  ;;  %v1710_v55 = vld [vmem:[#allocation6 + $0x5d0] sm:$0xff] }
 0x5d9   :  { %1541 = vrot.lane.b32.xlu1 %v1435_v20, %s3802_s29  ;;  %1538 = vrot.lane.b32.xlu0 %v1435_v20, %s3812_s24  ;;  %v1810_v20 = vld [vmem:[#allocation8 + $0x448] sm:$0xff] }
 0x5da   :  { %1744 = vmatpush1.msra.mxu1 %v1668_v17  ;;  %1880 = vmatpush1.msra.mxu0 %v1817_v54  ;;  %v1859_v17 = vld [vmem:[#allocation8 + $0x5d0] sm:$0xff]  ;;  %v1709_v54 = vld [vmem:[#allocation6 + $0x5c8] sm:$0xff] }
 0x5db   :  { %1745 = vmatprep.subr.mxu1 %v1667_v57  ;;  %1881 = vmatprep.subr.mxu0 %v1816_v59  ;;  %v1858_v57 = vld [vmem:[#allocation8 + $0x5c8] sm:$0xff]  ;;  %v1708_v59 = vld [vmem:[#allocation6 + $0x5c0] sm:$0xff] }
 0x5dc   :  { %1746 = vmatpush1.msra.mxu1 %v1666_v49  ;;  %1882 = vmatpush1.msra.mxu0 %v1815_v45  ;;  %v1857_v49 = vld [vmem:[#allocation8 + $0x5c0] sm:$0xff]  ;;  %v1707_v45 = vld [vmem:[#allocation6 + $0x5b8] sm:$0xff] }
 0x5dd   :  { %1548 = vrot.lane.b32.xlu1 %v1436_v28, %s3802_s29  ;;  %1545 = vrot.lane.b32.xlu0 %v1436_v28, %s3812_s24  ;;  %v1656_v28 = vld [vmem:[#allocation6 + $0x420] sm:$0xff] }
 0x5de   :  { %1747 = vmatprep.subr.mxu1 %v1665_v36  ;;  %1883 = vmatprep.subr.mxu0 %v1814_v53  ;;  %v1856_v36 = vld [vmem:[#allocation8 + $0x5b8] sm:$0xff]  ;;  %v1706_v53 = vld [vmem:[#allocation6 + $0x5b0] sm:$0xff] }
 0x5df   :  { %1748 = vmatpush1.msra.mxu1 %v1664_v50  ;;  %1884 = vmatpush1.msra.mxu0 %v1813_v9  ;;  %v1855_v50 = vld [vmem:[#allocation8 + $0x5b0] sm:$0xff]  ;;  %v1705_v9 = vld [vmem:[#allocation6 + $0x5a8] sm:$0xff] }
 0x5e0   :  { %1749 = vmatprep.subr.mxu1 %v1663_v10  ;;  %1885 = vmatprep.subr.mxu0 %v1812_v31  ;;  %v1854_v10 = vld [vmem:[#allocation8 + $0x5a8] sm:$0xff]  ;;  %v1704_v31 = vld [vmem:[#allocation6 + $0x5a0] sm:$0xff] }
 0x5e1   :  { %1592 = vrot.lane.b32.xlu1 %v1506_v0, %s3802_s29  ;;  %1589 = vrot.lane.b32.xlu0 %v1506_v0, %s3812_s24  ;;  %v1652_v0 = vld [vmem:[#allocation6 + $0x400] sm:$0xff] }
 0x5e2   :  { %1750 = vmatpush1.msra.mxu1 %v1662_v16  ;;  %1886 = vmatpush1.msra.mxu0 %v1811_v62  ;;  %v1853_v16 = vld [vmem:[#allocation8 + $0x5a0] sm:$0xff]  ;;  %v1703_v62 = vld [vmem:[#allocation6 + $0x598] sm:$0xff] }
 0x5e3   :  { %1751 = vmatprep.subr.mxu1 %v1661_v3  ;;  %1887 = vmatprep.subr.mxu0 %v1810_v20  ;;  %v1852_v3 = vld [vmem:[#allocation8 + $0x598] sm:$0xff]  ;;  %v1702_v20 = vld [vmem:[#allocation6 + $0x590] sm:$0xff] }
 0x5e4   :  { %1752 = vmatpush1.msra.mxu1 %v1660_v33  ;;  %1888 = vmatpush1.msra.mxu0 %v1809_v25  ;;  %v1851_v33 = vld [vmem:[#allocation8 + $0x590] sm:$0xff]  ;;  %v1701_v25 = vld [vmem:[#allocation6 + $0x588] sm:$0xff] }
 0x5e5   :  { %1753 = vmatprep.subr.mxu1 %v1659_v58  ;;  %1889 = vmatprep.subr.mxu0 %v1808_v60  ;;  %v1850_v58 = vld [vmem:[#allocation8 + $0x588] sm:$0xff]  ;;  %v1700_v60 = vld [vmem:[#allocation6 + $0x580] sm:$0xff] }
 0x5e6   :  { %1754 = vmatpush1.msra.mxu1 %v1658_v63  ;;  %1890 = vmatpush1.msra.mxu0 %v1807_v26  ;;  %v1849_v63 = vld [vmem:[#allocation8 + $0x580] sm:$0xff]  ;;  %v1699_v26 = vld [vmem:[#allocation6 + $0x578] sm:$0xff] }
 0x5e7   :  { %1755 = vmatprep.subr.mxu1 %v1657_v21  ;;  %1891 = vmatprep.subr.mxu0 %v1806_v27  ;;  %v1848_v21 = vld [vmem:[#allocation8 + $0x578] sm:$0xff]  ;;  %v1698_v27 = vld [vmem:[#allocation6 + $0x570] sm:$0xff] }
 0x5e8   :  { %1756 = vmatpush1.msra.mxu1 %v1656_v28  ;;  %1892 = vmatpush1.msra.mxu0 %v1805_v61  ;;  %v1847_v28 = vld [vmem:[#allocation8 + $0x570] sm:$0xff]  ;;  %v1697_v61 = vld [vmem:[#allocation6 + $0x568] sm:$0xff] }
 0x5e9   :  { %1757 = vmatprep.subr.mxu1 %v1655_v29  ;;  %1893 = vmatprep.subr.mxu0 %v1804_v32  ;;  %v1846_v29 = vld [vmem:[#allocation8 + $0x568] sm:$0xff]  ;;  %v1696_v32 = vld [vmem:[#allocation6 + $0x560] sm:$0xff] }
 0x5ea   :  { %1758 = vmatpush1.msra.mxu1 %v1654_v34  ;;  %1894 = vmatpush1.msra.mxu0 %v1803_v35  ;;  %v1845_v34 = vld [vmem:[#allocation8 + $0x560] sm:$0xff] }
 0x5eb   :  { %1759 = vmatprep.subr.mxu1 %v1653_v5  ;;  %1895 = vmatprep.subr.mxu0 %v1802_v56 }
 0x5ec   :  { %1760 = vmatpush1.msra.mxu1 %v1652_v0  ;;  %1896 = vmatpush1.msra.mxu0 %v1801_v2 }
 0x5ed   :  { %1761 = vmatprep.subr.mxu1 %v1715_v52  ;;  %1897 = vmatprep.subr.mxu0 %v1864_v19 }
 0x5ee   :  { %1762 = vmatpush2.msra.mxu1 %v1714_v30  ;;  %1898 = vmatpush2.msra.mxu0 %v1863_v12  ;;  %v1695_v12 = vld [vmem:[#allocation6 + $0x558] sm:$0xff] }
 0x5ef   :  { %1763 = vmatprep.subr.mxu1 %v1713_v13  ;;  %1899 = vmatprep.subr.mxu0 %v1862_v8  ;;  %v1844_v13 = vld [vmem:[#allocation8 + $0x558] sm:$0xff]  ;;  %v1694_v8 = vld [vmem:[#allocation6 + $0x550] sm:$0xff] }
 0x5f0   :  { %1764 = vmatpush2.msra.mxu1 %v1712_v43  ;;  %1900 = vmatpush2.msra.mxu0 %v1861_v6  ;;  %v1843_v43 = vld [vmem:[#allocation8 + $0x550] sm:$0xff] }
 0x5f1   :  { %1765 = vmatprep.subr.mxu1 %v1711_v18  ;;  %1901 = vmatprep.subr.mxu0 %v1860_v23  ;;  %v1693_v18 = vld [vmem:[#allocation6 + $0x548] sm:$0xff] }
 0x5f2   :  { %1766 = vmatpush2.msra.mxu1 %v1710_v55  ;;  %1902 = vmatpush2.msra.mxu0 %v1859_v17  ;;  %v1842_v23 = vld [vmem:[#allocation8 + $0x548] sm:$0xff]  ;;  %v1692_v55 = vld [vmem:[#allocation6 + $0x540] sm:$0xff] }
 0x5f3   :  { %1767 = vmatprep.subr.mxu1 %v1709_v54  ;;  %1903 = vmatprep.subr.mxu0 %v1858_v57  ;;  %v1841_v57 = vld [vmem:[#allocation8 + $0x540] sm:$0xff] }
 0x5f4   :  { %1768 = vmatpush2.msra.mxu1 %v1708_v59  ;;  %1904 = vmatpush2.msra.mxu0 %v1857_v49 }
 0x5f5   :  { %1769 = vmatprep.subr.mxu1 %v1707_v45  ;;  %1905 = vmatprep.subr.mxu0 %v1856_v36  ;;  %v1691_v45 = vld [vmem:[#allocation6 + $0x538] sm:$0xff] }
 0x5f6   :  { %1770 = vmatpush2.msra.mxu1 %v1706_v53  ;;  %1906 = vmatpush2.msra.mxu0 %v1855_v50  ;;  %v1840_v36 = vld [vmem:[#allocation8 + $0x538] sm:$0xff]  ;;  %v1690_v50 = vld [vmem:[#allocation6 + $0x530] sm:$0xff] }
 0x5f7   :  { %1771 = vmatprep.subr.mxu1 %v1705_v9  ;;  %1907 = vmatprep.subr.mxu0 %v1854_v10  ;;  %v1839_v9 = vld [vmem:[#allocation8 + $0x530] sm:$0xff]  ;;  %v1689_v10 = vld [vmem:[#allocation6 + $0x528] sm:$0xff] }
 0x5f8   :  { %1772 = vmatpush2.msra.mxu1 %v1704_v31  ;;  %1908 = vmatpush2.msra.mxu0 %v1853_v16 }
 0x5f9   :  { %1773 = vmatprep.subr.mxu1 %v1703_v62  ;;  %1909 = vmatprep.subr.mxu0 %v1852_v3  ;;  %v1838_v3 = vld [vmem:[#allocation8 + $0x528] sm:$0xff] }
 0x5fa   :  { %1774 = vmatpush2.msra.mxu1 %v1702_v20  ;;  %1910 = vmatpush2.msra.mxu0 %v1851_v33  ;;  %v1688_v20 = vld [vmem:[#allocation6 + $0x520] sm:$0xff] }
 0x5fb   :  { %1775 = vmatprep.subr.mxu1 %v1701_v25  ;;  %1911 = vmatprep.subr.mxu0 %v1850_v58  ;;  %v1837_v33 = vld [vmem:[#allocation8 + $0x520] sm:$0xff] }
 0x5fc   :  { %1776 = vmatpush2.msra.mxu1 %v1700_v60  ;;  %1912 = vmatpush2.msra.mxu0 %v1849_v63  ;;  %v1687_v60 = vld [vmem:[#allocation6 + $0x518] sm:$0xff] }
 0x5fd   :  { %1777 = vmatprep.subr.mxu1 %v1699_v26  ;;  %1913 = vmatprep.subr.mxu0 %v1848_v21  ;;  %v1836_v63 = vld [vmem:[#allocation8 + $0x518] sm:$0xff]  ;;  %v1686_v26 = vld [vmem:[#allocation6 + $0x510] sm:$0xff] }
 0x5fe   :  { %1778 = vmatpush2.msra.mxu1 %v1698_v27  ;;  %1914 = vmatpush2.msra.mxu0 %v1847_v28  ;;  %v1685_v27 = vld [vmem:[#allocation6 + $0x508] sm:$0xff] }
 0x5ff   :  { %1779 = vmatprep.subr.mxu1 %v1697_v61  ;;  %1915 = vmatprep.subr.mxu0 %v1846_v29 }
 0x600   :  { %1780 = vmatpush2.msra.mxu1 %v1696_v32  ;;  %1916 = vmatpush2.msra.mxu0 %v1845_v34  ;;  %v1834_v32 = vld [vmem:[#allocation8 + $0x508] sm:$0xff]  ;;  %v1684_v34 = vld [vmem:[#allocation6 + $0x500] sm:$0xff] }
 0x601   :  { %1781 = vmatprep.subr.mxu1 %v1695_v12  ;;  %1917 = vmatprep.subr.mxu0 %v1844_v13 }
 0x602   :  { %1782 = vmatpush2.msra.mxu1 %v1694_v8  ;;  %1918 = vmatpush2.msra.mxu0 %v1843_v43 }
 0x603   :  { %1783 = vmatprep.subr.mxu1 %v1693_v18  ;;  %1919 = vmatprep.subr.mxu0 %v1842_v23 }
 0x604   :  { %1784 = vmatpush2.msra.mxu1 %v1692_v55  ;;  %1920 = vmatpush2.msra.mxu0 %v1841_v57  ;;  %v3305_v57 = vld [vmem:[%s5176_s5 + $0x2] sm:$0x3] }
 0x605   :  { %1785 = vmatprep.subr.mxu1 %v1691_v45  ;;  %1921 = vmatprep.subr.mxu0 %v1840_v36 }
 0x606   :  { %1786 = vmatpush2.msra.mxu1 %v1690_v50  ;;  %1922 = vmatpush2.msra.mxu0 %v1839_v9 }
 0x607   :  { %1787 = vmatprep.subr.mxu1 %v1689_v10  ;;  %1923 = vmatprep.subr.mxu0 %v1838_v3 }
 0x608   :  { %1788 = vmatpush2.msra.mxu1 %v1688_v20  ;;  %1924 = vmatpush2.msra.mxu0 %v1837_v33 }
 0x609   :  { %1789 = vmatprep.subr.mxu1 %v1687_v60  ;;  %1925 = vmatprep.subr.mxu0 %v1836_v63 }
 0x60a   :  { %1790 = vmatpush2.msra.mxu1 %v1686_v26 }
 0x60b   :  { %1791 = vmatprep.subr.mxu1 %v1685_v27  ;;  %v3525_v27 = vld [vmem:[#allocation11 + $0xd0] sm:$0xff] }
 0x60c   :  { %1792 = vmatpush2.msra.mxu1 %v1684_v34  ;;  %v3530_v34 = vld [vmem:[#allocation11 + $0xa8] sm:$0xff] }
 0x637   :  { %v1608_v35 = vpop.permute.xlu1 %1607  ;;  %v1605_v5 = vpop.permute.xlu0 %1604 }
 0x638   :  { %v1617_v56 = vsel %vm734_vm8, %v1605_v5, %v1608_v35 }
 0x639   :  { %v1618_v0 = vsel %vm736_vm9, %v1617_v56, %v1605_v5  ;;  %v3520_v5 = vld [vmem:[#allocation11 + $0xf8] sm:$0xff] }
 0x63a   :  { %v1619_v2 = vsel %vm738_vm10, %v1618_v0, %v1608_v35  ;;  %v1833_v35 = vld [vmem:[#allocation8 + $0x500] sm:$0xff]  ;;  %1938 = vmatprep.subr.mxu1 %v3520_v5 }
 0x63b   :  { %v1564_v52 = vpop.permute.xlu1 %1563  ;;  %v1561_v19 = vpop.permute.xlu0 %1560  ;;  %v1623_v30 = vadd.f32 %v1619_v2, %v4426_v47  ;;  %v3532_v5 = vld [vmem:[#allocation11 + $0x98] sm:$0xff] }
 0x63c   :  { %v1573_v6 = vsel %vm734_vm8, %v1561_v19, %v1564_v52 }
 0x63d   :  { %1636 = vrot.lane.b32.xlu1 %v1623_v30, %s3811_s3  ;;  %v1574_v59 = vsel %vm736_vm9, %v1573_v6, %v1561_v19 }
 0x63e   :  { %v1575_v25 = vsel %vm738_vm10, %v1574_v59, %v1564_v52  ;;  %v1056_v59 = vrot.slane %v3305_v57, %v4034_v41 }
 0x63f   :  { %v1571_v17 = vpop.permute.xlu1 %1570  ;;  %v1568_v54 = vpop.permute.xlu0 %1567  ;;  %v1579_v29 = vadd.f32 %v1575_v25, %v4429_v48 }
 0x640   :  { %v1576_v47 = vsel %vm734_vm8, %v1568_v54, %v1571_v17 }
 0x641   :  { %v1577_v49 = vsel %vm736_vm9, %v1576_v47, %v1568_v54 }
 0x642   :  { %v1578_v53 = vsel %vm738_vm10, %v1577_v49, %v1571_v17 }
 0x643   :  { %v1615_v31 = vpop.permute.xlu1 %1614  ;;  %v1612_v16 = vpop.permute.xlu0 %1611  ;;  %v1580_v62 = vadd.f32 %v1578_v53, %v4443_v11  ;;  %v1835_v11 = vld [vmem:[#allocation8 + $0x510] sm:$0xff] }
 0x644   :  { %v1620_v58 = vsel %vm734_vm8, %v1612_v16, %v1615_v31  ;;  %1926 = vmatpush2.msra.mxu0 %v1835_v11  ;;  %v3524_v11 = vld [vmem:[#allocation11 + $0xd8] sm:$0xff] }
 0x645   :  { %v1621_v21 = vsel %vm736_vm9, %v1620_v58, %v1612_v16  ;;  %1630 = vrot.lane.b32.xlu0 %v1580_v62, %s3811_s3  ;;  %1927 = vmatprep.subr.mxu0 %v1834_v32  ;;  %v1128_v16 = vadd.f32 %v4399_v24, %v1056_v59  ;;  %v3529_v32 = vld [vmem:[#allocation11 + $0xb0] sm:$0xff] }
 0x646   :  { %v1622_v28 = vsel %vm738_vm10, %v1621_v21, %v1615_v31  ;;  %1928 = vmatpush2.msra.mxu0 %v1833_v35  ;;  %v1052_v31 = vrot.slane %v3305_v57, %v4028_v39  ;;  %v3531_v35 = vld [vmem:[#allocation11 + $0xa0] sm:$0xff]  ;;  %v3553_v59 = vld [vmem:[#allocation11 + $0x1f0] sm:$0xff] }
 0x647   :  { %v1624_v61 = vadd.f32 %v1622_v28, %v4447_v14  ;;  %v1586_v56 = vpop.permute.xlu1 %1585  ;;  %v1583_v14 = vpop.permute.xlu0 %1582  ;;  %v3526_v28 = vld [vmem:[#allocation11 + $0xc8] sm:$0xff]  ;;  %v3551_v57 = vld [vmem:[#allocation11] sm:$0xff] }
 0x648   :  { %v1595_v19 = vsel %vm734_vm8, %v1583_v14, %v1586_v56  ;;  %v1126_v60 = vadd.f32 %v4397_v22, %v1052_v31  ;;  %v3521_v22 = vld [vmem:[#allocation11 + $0xf0] sm:$0xff] }
 0x649   :  { %1640 = vrot.lane.b32.xlu1 %v1624_v61, %s3811_s3  ;;  %1626 = vrot.lane.b32.xlu0 %v1579_v29, %s3811_s3  ;;  %v1596_v8 = vsel %vm736_vm9, %v1595_v19, %v1583_v14  ;;  %v3527_v61 = vld [vmem:[#allocation11 + $0xc0] sm:$0xff]  ;;  %v3528_v29 = vld [vmem:[#allocation11 + $0xb8] sm:$0xff]  ;;  %v3534_v14 = vld [vmem:[#allocation11 + $0x88] sm:$0xff] }
 0x64a   :  { %v1597_v23 = vsel %vm738_vm10, %v1596_v8, %v1586_v56  ;;  %v3533_v56 = vld [vmem:[#allocation11 + $0x90] sm:$0xff]  ;;  %v3539_v19 = vld [vmem:[#allocation11 + $0x60] sm:$0xff] }
 0x64b   :  { %v1542_v0 = vpop.permute.xlu1 %1541  ;;  %v1539_v48 = vpop.permute.xlu0 %1538  ;;  %v1601_v49 = vadd.f32 %v1597_v23, %v4432_v37  ;;  %v3543_v8 = vld [vmem:[#allocation11 + $0x40] sm:$0xff]  ;;  %v3561_v31 = vld [vmem:[#allocation11 + $0x1b0] sm:$0xff] }
 0x64c   :  { %v1551_v6 = vsel %vm734_vm8, %v1539_v48, %v1542_v0  ;;  %v3547_v23 = vld [vmem:[#allocation11 + $0x20] sm:$0xff] }
 0x64d   :  { %v1552_v17 = vsel %vm736_vm9, %v1551_v6, %v1539_v48  ;;  %v3536_v48 = vld [vmem:[#allocation11 + $0x78] sm:$0xff]  ;;  %v3545_v6 = vld [vmem:[#allocation11 + $0x30] sm:$0xff] }
 0x64e   :  { %v1553_v50 = vsel %vm738_vm10, %v1552_v17, %v1542_v0  ;;  %v3535_v0 = vld [vmem:[#allocation11 + $0x80] sm:$0xff]  ;;  %v3549_v17 = vld [vmem:[#allocation11 + $0x10] sm:$0xff] }
 0x64f   :  { %v1549_v2 = vpop.permute.xlu1 %1548  ;;  %v1546_v52 = vpop.permute.xlu0 %1545  ;;  %v1557_v20 = vadd.f32 %v1553_v50, %v4439_v7  ;;  %v3522_v7 = vld [vmem:[#allocation11 + $0xe8] sm:$0xff] }
 0x650   :  { %v1554_v30 = vsel %vm734_vm8, %v1546_v52, %v1549_v2  ;;  %v3558_v50 = vld [vmem:[#allocation11 + $0x1c8] sm:$0xff] }
 0x651   :  { %v1555_v43 = vsel %vm736_vm9, %v1554_v30, %v1546_v52  ;;  %v3538_v52 = vld [vmem:[#allocation11 + $0x68] sm:$0xff]  ;;  %v3540_v30 = vld [vmem:[#allocation11 + $0x58] sm:$0xff] }
 0x652   :  { %v1556_v55 = vsel %vm738_vm10, %v1555_v43, %v1549_v2  ;;  %v3537_v2 = vld [vmem:[#allocation11 + $0x70] sm:$0xff]  ;;  %v3544_v43 = vld [vmem:[#allocation11 + $0x38] sm:$0xff] }
 0x653   :  { %v1593_v12 = vpop.permute.xlu1 %1592  ;;  %v1590_v13 = vpop.permute.xlu0 %1589  ;;  %v1558_v45 = vadd.f32 %v1556_v55, %v4451_v15  ;;  %v3548_v55 = vld [vmem:[#allocation11 + $0x18] sm:$0xff] }
 0x654   :  { %v1598_v18 = vsel %vm734_vm8, %v1590_v13, %v1593_v12 }
 0x655   :  { %v1599_v54 = vsel %vm736_vm9, %v1598_v18, %v1590_v13  ;;  %v3542_v13 = vld [vmem:[#allocation11 + $0x48] sm:$0xff] }
 0x656   :  { %v1600_v53 = vsel %vm738_vm10, %v1599_v54, %v1593_v12  ;;  %v3541_v12 = vld [vmem:[#allocation11 + $0x50] sm:$0xff]  ;;  %v3546_v18 = vld [vmem:[#allocation11 + $0x28] sm:$0xff] }
 0x657   :  { %v1602_v3 = vadd.f32 %v1600_v53, %v4455_v38  ;;  %v3523_v38 = vld [vmem:[#allocation11 + $0xe0] sm:$0xff]  ;;  %v3550_v54 = vld [vmem:[#allocation11 + $0x8] sm:$0xff]  ;;  %v3557_v53 = vld [vmem:[#allocation11 + $0x1d0] sm:$0xff] }
 0x6af   :  { %v1637_v47 = vpop.permute.xlu1 %1636 }
 0x6b0   :  { %v1643_v9 = vadd.f32 %v1637_v47, %v1601_v49  ;;  %v3552_v47 = vld [vmem:[#allocation11 + $0x1f8] sm:$0xff]  ;;  %v3554_v49 = vld [vmem:[#allocation11 + $0x1e8] sm:$0xff] }
 0x6b7   :  { %v1631_v36 = vpop.permute.xlu0 %1630 }
 0x6b8   :  { %v1634_v10 = vadd.f32 %v1631_v36, %v1558_v45  ;;  %v3555_v45 = vld [vmem:[#allocation11 + $0x1e0] sm:$0xff]  ;;  %v3556_v36 = vld [vmem:[#allocation11 + $0x1d8] sm:$0xff] }
 0x6ba   :  { %v1646_v62 = vadd.f32 %v1643_v9, %v1634_v10  ;;  %v3559_v9 = vld [vmem:[#allocation11 + $0x1c0] sm:$0xff]  ;;  %v3560_v10 = vld [vmem:[#allocation11 + $0x1b8] sm:$0xff] }
 0x6bb   :  { %v1641_v33 = vpop.permute.xlu1 %1640  ;;  %v1627_v37 = vpop.permute.xlu0 %1626 }
 0x6bc   :  { %v1648_v25 = vadd.f32 %v1646_v62, %v1128_v16  ;;  %v1644_v15 = vadd.f32 %v1641_v33, %v1602_v3  ;;  %v1633_v58 = vadd.f32 %v1627_v37, %v1557_v20  ;;  %v3562_v16 = vld [vmem:[#allocation11 + $0x1a8] sm:$0xff]  ;;  %v3563_v62 = vld [vmem:[#allocation11 + $0x1a0] sm:$0xff]  ;;  %v3564_v3 = vld [vmem:[#allocation11 + $0x198] sm:$0xff] }
 0x6bd   :  { %v3565_v20 = vld [vmem:[#allocation11 + $0x190] sm:$0xff]  ;;  %v3566_v33 = vld [vmem:[#allocation11 + $0x188] sm:$0xff]  ;;  %v3567_v37 = vld [vmem:[#allocation11 + $0x180] sm:$0xff] }
 0x6be   :  { %v4542_v63 = vmul.f32 0.70710677, %v1648_v25  ;;  %v1645_v26 = vadd.f32 %v1644_v15, %v1633_v58  ;;  %v3568_v25 = vld [vmem:[#allocation11 + $0x178] sm:$0xff]  ;;  %v3569_v15 = vld [vmem:[#allocation11 + $0x170] sm:$0xff]  ;;  %v3570_v58 = vld [vmem:[#allocation11 + $0x168] sm:$0xff] }
 0x6c0   :  { %v1647_v21 = vadd.f32 %v1645_v26, %v1126_v60  ;;  %1793 = vmatprep.mubr.f32.mxu1 %v4542_v63  ;;  %1929 = vmatprep.mubr.f32.mxu0 %v4542_v63  ;;  %v3571_v60 = vld [vmem:[#allocation11 + $0x160] sm:$0xff]  ;;  %v3572_v26 = vld [vmem:[#allocation11 + $0x158] sm:$0xff] }
 0x6c2   :  { %v4546_v24 = vmul.f32 0.70710677, %v1647_v21  ;;  %v3573_v21 = vld [vmem:[#allocation11 + $0x150] sm:$0xff] }
 0x6c4   :  { %2071 = vrot.lane.b32.xlu1 %v4546_v24, %s3811_s3  ;;  %2068 = vrot.lane.b32.xlu0 %v4546_v24, %s3802_s29 }
 0x6c5   :  { %1794 = vmatmul.mubr.f32.vlgmr.msra.gmra.mxu1 %v4546_v24  ;;  %1930 = vmatmul.mubr.f32.vlgmr.msra.gmra.mxu0 %v4546_v24 }
 0x6c6   :  { %1939 = vmatpush1.msra.mxu1 %v3521_v22  ;;  %v3574_v22 = vld [vmem:[#allocation11 + $0x148] sm:$0xff] }
 0x6c7   :  { %1940 = vmatprep.subr.mxu1 %v3522_v7  ;;  %v3575_v7 = vld [vmem:[#allocation11 + $0x140] sm:$0xff] }
 0x6c8   :  { %2141 = vrot.lane.b32.xlu1 %v4542_v63, %s3811_s3  ;;  %2138 = vrot.lane.b32.xlu0 %v4542_v63, %s3802_s29 }
 0x6c9   :  { %1941 = vmatpush1.msra.mxu1 %v3523_v38  ;;  %v3576_v38 = vld [vmem:[#allocation11 + $0x138] sm:$0xff] }
 0x6ca   :  { %1942 = vmatprep.subr.mxu1 %v3524_v11  ;;  %v3577_v11 = vld [vmem:[#allocation11 + $0x130] sm:$0xff] }
 0x6cb   :  { %1943 = vmatpush1.msra.mxu1 %v3525_v27  ;;  %v3578_v27 = vld [vmem:[#allocation11 + $0x128] sm:$0xff] }
 0x6cc   :  { %2144 = vrot.lane.b32.xlu1 %v4542_v63, %s3812_s24  ;;  %2074 = vrot.lane.b32.xlu0 %v4546_v24, %s3812_s24 }
 0x6cd   :  { %1944 = vmatprep.subr.mxu1 %v3526_v28  ;;  %v3579_v28 = vld [vmem:[#allocation11 + $0x120] sm:$0xff] }
 0x6ce   :  { %1945 = vmatpush1.msra.mxu1 %v3527_v61  ;;  %v3580_v61 = vld [vmem:[#allocation11 + $0x118] sm:$0xff] }
 0x6cf   :  { %1946 = vmatprep.subr.mxu1 %v3528_v29  ;;  %v3581_v29 = vld [vmem:[#allocation11 + $0x110] sm:$0xff] }
 0x6d0   :  { %1947 = vmatpush1.msra.mxu1 %v3529_v32  ;;  %v3582_v32 = vld [vmem:[#allocation11 + $0x108] sm:$0xff] }
 0x6d1   :  { %1948 = vmatprep.subr.mxu1 %v3530_v34  ;;  %v3583_v34 = vld [vmem:[#allocation11 + $0x100] sm:$0xff] }
 0x6d2   :  { %1949 = vmatpush1.msra.mxu1 %v3531_v35 }
 0x6d3   :  { %1950 = vmatprep.subr.mxu1 %v3532_v5 }
 0x6d4   :  { %1951 = vmatpush1.msra.mxu1 %v3533_v56 }
 0x6d5   :  { %1952 = vmatprep.subr.mxu1 %v3534_v14 }
 0x6d6   :  { %1953 = vmatpush1.msra.mxu1 %v3535_v0 }
 0x6d7   :  { %1954 = vmatprep.subr.mxu1 %v3536_v48 }
 0x6d8   :  { %1955 = vmatpush1.msra.mxu1 %v3537_v2 }
 0x6d9   :  { %1956 = vmatprep.subr.mxu1 %v3538_v52 }
 0x6da   :  { %1957 = vmatpush1.msra.mxu1 %v3539_v19 }
 0x6db   :  { %1958 = vmatprep.subr.mxu1 %v3540_v30 }
 0x6dc   :  { %1959 = vmatpush1.msra.mxu1 %v3541_v12 }
 0x6dd   :  { %1960 = vmatprep.subr.mxu1 %v3542_v13  ;;  %v4590_v13 = vld [vmem:[%s5179_s8 + $0x20] sm:$0xff] }
 0x6de   :  { %1961 = vmatpush1.msra.mxu1 %v3543_v8  ;;  %v4595_v8 = vld [vmem:[%s5179_s8 + $0x28] sm:$0xff] }
 0x6df   :  { %1962 = vmatprep.subr.mxu1 %v3544_v43 }
 0x6e0   :  { %1963 = vmatpush1.msra.mxu1 %v3545_v6 }
 0x6e1   :  { %1964 = vmatprep.subr.mxu1 %v3546_v18 }
 0x6e2   :  { %1965 = vmatpush1.msra.mxu1 %v3547_v23  ;;  %v2183_v23 = vrot.slane %v4590_v13, %v4096_v44 }
 0x6e3   :  { %1966 = vmatprep.subr.mxu1 %v3548_v55  ;;  %v2117_v55 = vrot.slane %v4595_v8, %v4099_v46 }
 0x6e4   :  { %1967 = vmatpush1.msra.mxu1 %v3549_v17  ;;  %v2187_v17 = vrot.slane %v4595_v8, %v4096_v44 }
 0x6e5   :  { %1968 = vmatprep.subr.mxu1 %v3550_v54  ;;  %v2113_v54 = vrot.slane %v4590_v13, %v4099_v46 }
 0x6e6   :  { %1969 = vmatpush1.msra.mxu1 %v3551_v57  ;;  %v2153_v57 = vrot.slane %v4590_v13, %v4113_v51 }
 0x6e7   :  { %1970 = vmatprep.subr.mxu1 %v3552_v47  ;;  %v2087_v47 = vrot.slane %v4595_v8, %v4028_v39 }
 0x6e8   :  { %1971 = vmatpush2.msra.mxu1 %v3553_v59 }
 0x6e9   :  { %1972 = vmatprep.subr.mxu1 %v3554_v49 }
 0x6ea   :  { %1973 = vmatpush2.msra.mxu1 %v3555_v45  ;;  %v2157_v45 = vrot.slane %v4595_v8, %v4113_v51 }
 0x6eb   :  { %1974 = vmatprep.subr.mxu1 %v3556_v36  ;;  %v2083_v36 = vrot.slane %v4590_v13, %v4028_v39 }
 0x6ec   :  { %1975 = vmatpush2.msra.mxu1 %v3557_v53 }
 0x6ed   :  { %1976 = vmatprep.subr.mxu1 %v3558_v50 }
 0x6ee   :  { %1977 = vmatpush2.msra.mxu1 %v3559_v9 }
 0x6ef   :  { %1978 = vmatprep.subr.mxu1 %v3560_v10 }
 0x6f0   :  { %1979 = vmatpush2.msra.mxu1 %v3561_v31 }
 0x6f1   :  { %1980 = vmatprep.subr.mxu1 %v3562_v16 }
 0x6f2   :  { %1981 = vmatpush2.msra.mxu1 %v3563_v62 }
 0x6f3   :  { %1982 = vmatprep.subr.mxu1 %v3564_v3 }
 0x6f4   :  { %1983 = vmatpush2.msra.mxu1 %v3565_v20 }
 0x6f5   :  { %1984 = vmatprep.subr.mxu1 %v3566_v33 }
 0x6f6   :  { %1985 = vmatpush2.msra.mxu1 %v3567_v37 }
 0x6f7   :  { %1986 = vmatprep.subr.mxu1 %v3568_v25 }
 0x6f8   :  { %1987 = vmatpush2.msra.mxu1 %v3569_v15 }
 0x6f9   :  { %1988 = vmatprep.subr.mxu1 %v3570_v58 }
 0x6fa   :  { %1989 = vmatpush2.msra.mxu1 %v3571_v60 }
 0x6fb   :  { %1990 = vmatprep.subr.mxu1 %v3572_v26 }
 0x6fc   :  { %1991 = vmatpush2.msra.mxu1 %v3573_v21 }
 0x6fd   :  { %1992 = vmatprep.subr.mxu1 %v3574_v22 }
 0x6fe   :  { %1993 = vmatpush2.msra.mxu1 %v3575_v7 }
 0x6ff   :  { %1994 = vmatprep.subr.mxu1 %v3576_v38 }
 0x700   :  { %1995 = vmatpush2.msra.mxu1 %v3577_v11 }
 0x701   :  { %1996 = vmatprep.subr.mxu1 %v3578_v27 }
 0x702   :  { %1997 = vmatpush2.msra.mxu1 %v3579_v28 }
 0x703   :  { %1998 = vmatprep.subr.mxu1 %v3580_v61 }
 0x704   :  { %1999 = vmatpush2.msra.mxu1 %v3581_v29 }
 0x705   :  { %2000 = vmatprep.subr.mxu1 %v3582_v32 }
 0x706   :  { %2001 = vmatpush2.msra.mxu1 %v3583_v34 }
 0x736   :  { %v4562_v35 = vpop.permute.xlu1 %2071  ;;  %v4564_v5 = vpop.permute.xlu0 %2068 }
 0x737   :  { %v2077_v56 = vsel %vm734_vm8, %v4546_v24, %v4564_v5 }
 0x738   :  { %v2078_v14 = vsel %vm736_vm9, %v2077_v56, %v4562_v35 }
 0x73a   :  { %v4571_v0 = vpop.permute.xlu1 %2141  ;;  %v4573_v48 = vpop.permute.xlu0 %2138 }
 0x73b   :  { %v2147_v2 = vsel %vm734_vm8, %v4542_v63, %v4573_v48 }
 0x73c   :  { %v2148_v52 = vsel %vm736_vm9, %v2147_v2, %v4571_v0 }
 0x73e   :  { %v4580_v19 = vpop.permute.xlu1 %2144  ;;  %v4582_v30 = vpop.permute.xlu0 %2074 }
 0x73f   :  { %v2177_v12 = vsel %vm734_vm8, %v4571_v0, %v4580_v19  ;;  %v2107_v43 = vsel %vm734_vm8, %v4562_v35, %v4582_v30  ;;  %v2149_v59 = vsel %vm738_vm10, %v2148_v52, %v4580_v19  ;;  %v2079_v49 = vsel %vm738_vm10, %v2078_v14, %v4582_v30 }
 0x740   :  { %v2178_v6 = vsel %vm736_vm9, %v2177_v12, %v4542_v63  ;;  %v2108_v18 = vsel %vm736_vm9, %v2107_v43, %v4546_v24  ;;  %v4636_v62 = vmul.f32 %v2153_v57, %v2149_v59  ;;  %v4638_v3 = vmul.f32 %v2087_v47, %v2079_v49 }
 0x741   :  { %v2179_v53 = vsel %vm738_vm10, %v2178_v6, %v4573_v48  ;;  %v2109_v50 = vsel %vm738_vm10, %v2108_v18, %v4564_v5  ;;  %v4640_v20 = vmul.f32 %v2157_v45, %v2149_v59  ;;  %v4642_v33 = vmul.f32 %v2083_v36, %v2079_v49  ;;  %v2042_v6 = vld [vmem:[#allocation9 + $0x4] sm:$0x3] }
 0x742   :  { %v4628_v9 = vmul.f32 %v2183_v23, %v2179_v53  ;;  %v4630_v10 = vmul.f32 %v2117_v55, %v2109_v50  ;;  %v4632_v31 = vmul.f32 %v2187_v17, %v2179_v53  ;;  %v4634_v16 = vmul.f32 %v2113_v54, %v2109_v50 }
 0x743   :  { %v2049_v54 = vrot.slane %v2042_v6, %v4028_v39  ;;  %v2053_v36 = vrot.slane %v2042_v6, %v4034_v41 }
 0x785   :  { %v4644_v37 = vpop.f32.mrf.mxu0  ;;  %v4652_v60 = vpop.f32.mrf.mxu1 }
 0x786   :  { %v1936_v58 = vmul.f32 %v4644_v37, %v4644_v37 }
 0x787   :  { %v4646_v25 = vpop.f32.mrf.mxu0  ;;  %v4654_v26 = vpop.f32.mrf.mxu1 }
 0x788   :  { %v1937_v15 = vmul.f32 %v4646_v25, %v4646_v25 }
 0x78a   :  { %2002 = vmatprep.mubr.f32.mxu1 %v1937_v15 }
 0x78b   :  { %2003 = vmatmul.mubr.f32.vlgmr.msra.gmra.mxu1 %v1936_v58 }
 0x84b   :  { %v2004_v21 = vpop.f32.mrf.mxu1 }
 0x84c   :  { %v2009_v22 = vmul.f32 %v2004_v21, %v2004_v21 }
 0x84d   :  { %v2006_v7 = vpop.f32.mrf.mxu1 }
 0x84e   :  { %v2011_v38 = vadd.f32 1e-16, %v2009_v22  ;;  %v2010_v11 = vmul.f32 %v2006_v7, %v2006_v7  ;;  %v2192_v7 = vsel %vm734_vm8, %v4573_v48, %v4571_v0 }
 0x850   :  { %3426 = vrsqrt.f32 %v2011_v38  ;;  %v2012_v27 = vadd.f32 1e-16, %v2010_v11  ;;  %vm2015_vm3 = vcmp.eq.f32.partialorder %v2011_v38, inf  ;;  %v2018_v29 = vand.u32 2147483648, %v2011_v38 }
 0x851   :  { %vm2017_vm4 = vcmp.eq.f32.partialorder %v2011_v38, 0.0  ;;  %v2122_v11 = vsel %vm734_vm8, %v4564_v5, %v4562_v35 }
 0x852   :  { %3428 = vrsqrt.f32 %v2012_v27  ;;  %vm2022_vm5 = vcmp.eq.f32.partialorder %v2012_v27, inf  ;;  %v2025_v2 = vand.u32 2147483648, %v2012_v27  ;;  %vm2024_vm6 = vcmp.eq.f32.partialorder %v2012_v27, 0.0 }
 0x85d   :  { %v3427_v28 = vpop.eup %3426 }
 0x85e   :  { %v2014_v61 = vmul.f32 %v3427_v28, %v2011_v38  ;;  %v2198_v28 = vrot.slane %v4590_v13, %v4085_v40 }
 0x85f   :  { %v3429_v32 = vpop.eup %3428 }
 0x860   :  { %v2016_v34 = vsel %vm2015_vm3, %v2011_v38, %v2014_v61  ;;  %v2021_v14 = vmul.f32 %v3429_v32, %v2012_v27  ;;  %v2193_v38 = vsel %vm736_vm9, %v2192_v7, %v4580_v19  ;;  %v2498_v7 = vld [vmem:[#allocation8 + $0x6d8] sm:$0xff] }
 0x861   :  { %v2019_v56 = vsel %vm2017_vm4, %v2018_v29, %v2016_v34  ;;  %v2194_v61 = vsel %vm738_vm10, %v2193_v38, %v4542_v63  ;;  %v2128_v29 = vrot.slane %v4590_v13, %v4088_v42 }
 0x862   :  { %3430 = vrsqrt.f32 %v2019_v56  ;;  %v2023_v52 = vsel %vm2022_vm5, %v2012_v27, %v2021_v14  ;;  %vm2029_vm7 = vcmp.eq.f32.partialorder %v2019_v56, inf  ;;  %v2032_v23 = vand.u32 2147483648, %v2019_v56 }
 0x863   :  { %v2026_v12 = vsel %vm2024_vm6, %v2025_v2, %v2023_v52  ;;  %vm2031_vm11 = vcmp.eq.f32.partialorder %v2019_v56, 0.0  ;;  %v2123_v27 = vsel %vm736_vm9, %v2122_v11, %v4582_v30  ;;  %v2203_v14 = vmul.f32 %v2198_v28, %v2194_v61  ;;  %v2497_v28 = vld [vmem:[#allocation8 + $0x6d0] sm:$0xff] }
 0x864   :  { %3432 = vrsqrt.f32 %v2026_v12  ;;  %vm2036_vm12 = vcmp.eq.f32.partialorder %v2026_v12, inf  ;;  %v2039_v49 = vand.u32 2147483648, %v2026_v12  ;;  %vm2038_vm13 = vcmp.eq.f32.partialorder %v2026_v12, 0.0 }
 0x865   :  { %v2124_v34 = vsel %vm738_vm10, %v2123_v27, %v4546_v24  ;;  %v2172_v11 = vrot.slane %v4595_v8, %v4207_v4  ;;  %v2348_v27 = vld [vmem:[#allocation6 + $0x6d0] sm:$0xff] }
 0x86f   :  { %v3431_v43 = vpop.eup %3430 }
 0x870   :  { %v2028_v18 = vmul.f32 %v3431_v43, %v2019_v56 }
 0x871   :  { %v3433_v55 = vpop.eup %3432 }
 0x872   :  { %v2030_v17 = vsel %vm2029_vm7, %v2019_v56, %v2028_v18  ;;  %v2035_v47 = vmul.f32 %v3433_v55, %v2026_v12  ;;  %vm3283_vm7 = vcmask 57344  }
 0x873   :  { %v2033_v57 = vsel %vm2031_vm11, %v2032_v23, %v2030_v17 }
 0x874   :  { %v3311_v59 = vadd.f32 -1.0, %v2033_v57  ;;  %v2037_v45 = vsel %vm2036_vm12, %v2026_v12, %v2035_v47  ;;  %v2133_v12 = vmul.f32 %v2128_v29, %v2124_v34  ;;  %v2347_v29 = vld [vmem:[#allocation6 + $0x6c8] sm:$0xff] }
 0x875   :  { %v2040_v50 = vsel %vm2038_vm13, %v2039_v49, %v2037_v45  ;;  %v2353_v45 = vld [vmem:[#allocation6 + $0x6f8] sm:$0xff] }
 0x876   :  { %v2056_v53 = vmul.f32 %v3311_v59, %v2049_v54  ;;  %v3312_v15 = vadd.f32 -1.0, %v2040_v50  ;;  %2399 = vmatprep.subr.mxu0 %v2353_v45  ;;  %v2501_v50 = vld [vmem:[#allocation8 + $0x6f0] sm:$0xff]  ;;  %v2483_v45 = vld [vmem:[#allocation8 + $0x660] sm:$0xff] }
 0x878   :  { %v2058_v58 = vadd.f32 1.0, %v2056_v53  ;;  %v2057_v21 = vmul.f32 %v3312_v15, %v2053_v36  ;;  %v2502_v36 = vld [vmem:[#allocation8 + $0x6f8] sm:$0xff]  ;;  %v2352_v53 = vld [vmem:[#allocation6 + $0x6f0] sm:$0xff]  ;;  %v2351_v15 = vld [vmem:[#allocation6 + $0x6e8] sm:$0xff] }
 0x879   :  { %2535 = vmatprep.subr.mxu1 %v2502_v36  ;;  %2400 = vmatpush1.msra.mxu0 %v2352_v53  ;;  %v2333_v36 = vld [vmem:[#allocation6 + $0x658] sm:$0xff] }
 0x87a   :  { %3434 = vrcp.f32 %v2058_v58  ;;  %v2059_v22 = vadd.f32 1.0, %v2057_v21  ;;  %2536 = vmatpush1.msra.mxu1 %v2501_v50  ;;  %v2499_v21 = vld [vmem:[#allocation8 + $0x6e0] sm:$0xff]  ;;  %2401 = vmatprep.subr.mxu0 %v2351_v15  ;;  %v2482_v53 = vld [vmem:[#allocation8 + $0x658] sm:$0xff]  ;;  %v2332_v50 = vld [vmem:[#allocation6 + $0x650] sm:$0xff] }
 0x87b   :  { %v2481_v15 = vld [vmem:[#allocation8 + $0x650] sm:$0xff] }
 0x87c   :  { %3436 = vrcp.f32 %v2059_v22  ;;  %v2349_v22 = vld [vmem:[#allocation6 + $0x6d8] sm:$0xff] }
 0x887   :  { %v3435_v32 = vpop.eup %3434 }
 0x888   :  { %v2061_v56 = vmul.f32 %v3435_v32, %v4644_v37  ;;  %v2132_v37 = vrot.slane %v4595_v8, %v4088_v42  ;;  %v2496_v32 = vld [vmem:[#allocation8 + $0x6c8] sm:$0xff] }
 0x889   :  { %v3437_v2 = vpop.eup %3436 }
 0x88a   :  { %v2205_v52 = vmul.f32 %v2203_v14, %v2061_v56  ;;  %v4678_v43 = vmul.f32 %v3437_v2, %v4646_v25  ;;  %v4681_v6 = vmul.f32 %v4628_v9, %v2061_v56  ;;  %v4684_v18 = vmul.f32 %v4634_v16, %v2061_v56  ;;  %v2494_v2 = vld [vmem:[#allocation8 + $0x6b8] sm:$0xff] }
 0x88b   :  { %v4687_v23 = vmul.f32 %v4636_v62, %v2061_v56  ;;  %v4694_v55 = vmul.f32 %v4642_v33, %v2061_v56  ;;  %v2135_v25 = vmul.f32 %v2133_v12, %v2061_v56  ;;  %v2162_v33 = vsel %vm734_vm8, %v4580_v19, %v4542_v63  ;;  %v2344_v12 = vld [vmem:[#allocation6 + $0x6b0] sm:$0xff] }
 0x88c   :  { %2277 = vrot.lane.b32.xlu1 %v2205_v52, %s3802_s29  ;;  %2274 = vrot.lane.b32.xlu0 %v2205_v52, %s3812_s24  ;;  %v4698_v9 = vmul.f32 %v4630_v10, %v4678_v43  ;;  %v4702_v16 = vmul.f32 %v4632_v31, %v4678_v43  ;;  %v4706_v62 = vmul.f32 %v4638_v3, %v4678_v43 }
 0x88d   :  { %v4710_v17 = vmul.f32 %v4640_v20, %v4678_v43  ;;  %v2134_v10 = vmul.f32 %v2132_v37, %v2124_v34  ;;  %v2202_v31 = vrot.slane %v4595_v8, %v4085_v40  ;;  %v2163_v3 = vsel %vm736_vm9, %v2162_v33, %v4573_v48  ;;  %v2346_v34 = vld [vmem:[#allocation6 + $0x6c0] sm:$0xff]  ;;  %v2493_v37 = vld [vmem:[#allocation8 + $0x6b0] sm:$0xff]  ;;  %v2492_v33 = vld [vmem:[#allocation8 + $0x6a8] sm:$0xff] }
 0x88e   :  { %v2092_v20 = vsel %vm734_vm8, %v4582_v30, %v4546_v24  ;;  %v2168_v19 = vrot.slane %v4590_v13, %v4207_v4  ;;  %v2164_v57 = vsel %vm738_vm10, %v2163_v3, %v4571_v0  ;;  %v2098_v30 = vrot.slane %v4590_v13, %v4034_v41  ;;  %v2500_v13 = vld [vmem:[#allocation8 + $0x6e8] sm:$0xff]  ;;  %v2490_v3 = vld [vmem:[#allocation8 + $0x698] sm:$0xff] }
 0x88f   :  { %v2136_v54 = vmul.f32 %v2134_v10, %v4678_v43  ;;  %v2204_v63 = vmul.f32 %v2202_v31, %v2194_v61  ;;  %v2093_v48 = vsel %vm736_vm9, %v2092_v20, %v4564_v5  ;;  %v2102_v5 = vrot.slane %v4595_v8, %v4034_v41  ;;  %2537 = vmatprep.subr.mxu1 %v2500_v13  ;;  %v2345_v8 = vld [vmem:[#allocation6 + $0x6b8] sm:$0xff]  ;;  %v2342_v10 = vld [vmem:[#allocation6 + $0x6a0] sm:$0xff]  ;;  %v2489_v20 = vld [vmem:[#allocation8 + $0x690] sm:$0xff] }
 0x890   :  { %2233 = vrot.lane.b32.xlu1 %v2135_v25, %s3802_s29  ;;  %2230 = vrot.lane.b32.xlu0 %v2135_v25, %s3812_s24  ;;  %v2173_v24 = vmul.f32 %v2168_v19, %v2164_v57  ;;  %v2094_v59 = vsel %vm738_vm10, %v2093_v48, %v4562_v35  ;;  %v2350_v35 = vld [vmem:[#allocation6 + $0x6e0] sm:$0xff]  ;;  %v2174_v14 = vmul.f32 %v2172_v11, %v2164_v57  ;;  %v2343_v25 = vld [vmem:[#allocation6 + $0x6a8] sm:$0xff]  ;;  %v2337_v48 = vld [vmem:[#allocation6 + $0x678] sm:$0xff] }
 0x891   :  { %v2206_v47 = vmul.f32 %v2204_v63, %v4678_v43  ;;  %v2103_v0 = vmul.f32 %v2098_v30, %v2094_v59  ;;  %v2104_v38 = vmul.f32 %v2102_v5, %v2094_v59  ;;  %2402 = vmatpush1.msra.mxu0 %v2350_v35  ;;  %2538 = vmatpush1.msra.mxu1 %v2499_v21  ;;  %v2491_v31 = vld [vmem:[#allocation8 + $0x6a0] sm:$0xff]  ;;  %v2339_v63 = vld [vmem:[#allocation6 + $0x688] sm:$0xff]  ;;  %v2336_v30 = vld [vmem:[#allocation6 + $0x670] sm:$0xff] }
 0x892   :  { %v2175_v49 = vmul.f32 %v2173_v24, %v2061_v56  ;;  %2403 = vmatprep.subr.mxu0 %v2349_v22  ;;  %2539 = vmatprep.subr.mxu1 %v2498_v7  ;;  %v2176_v52 = vmul.f32 %v2174_v14, %v4678_v43  ;;  %v2488_v19 = vld [vmem:[#allocation8 + $0x688] sm:$0xff]  ;;  %v2338_v57 = vld [vmem:[#allocation6 + $0x680] sm:$0xff]  ;;  %v2486_v24 = vld [vmem:[#allocation8 + $0x678] sm:$0xff] }
 0x893   :  { %v2105_v58 = vmul.f32 %v2103_v0, %v2061_v56  ;;  %v2106_v61 = vmul.f32 %v2104_v38, %v4678_v43  ;;  %2404 = vmatpush1.msra.mxu0 %v2348_v27  ;;  %2540 = vmatpush1.msra.mxu1 %v2497_v28  ;;  %v2495_v56 = vld [vmem:[#allocation8 + $0x6c0] sm:$0xff]  ;;  %v2340_v43 = vld [vmem:[#allocation6 + $0x690] sm:$0xff]  ;;  %v2484_v0 = vld [vmem:[#allocation8 + $0x668] sm:$0xff] }
 0x894   :  { %2240 = vrot.lane.b32.xlu1 %v2136_v54, %s3802_s29  ;;  %2237 = vrot.lane.b32.xlu0 %v2136_v54, %s3812_s24  ;;  %v2341_v54 = vld [vmem:[#allocation6 + $0x698] sm:$0xff]  ;;  %v2485_v59 = vld [vmem:[#allocation8 + $0x670] sm:$0xff]  ;;  %v2334_v5 = vld [vmem:[#allocation6 + $0x660] sm:$0xff] }
 0x895   :  { %2405 = vmatprep.subr.mxu0 %v2347_v29  ;;  %2541 = vmatprep.subr.mxu1 %v2496_v32  ;;  %v2331_v13 = vld [vmem:[#allocation6 + $0x648] sm:$0xff]  ;;  %v2330_v35 = vld [vmem:[#allocation6 + $0x640] sm:$0xff]  ;;  %v2329_v22 = vld [vmem:[#allocation6 + $0x638] sm:$0xff] }
 0x896   :  { %2406 = vmatpush1.msra.mxu0 %v2346_v34  ;;  %2542 = vmatpush1.msra.mxu1 %v2495_v56  ;;  %v2479_v21 = vld [vmem:[#allocation8 + $0x640] sm:$0xff]  ;;  %v2478_v7 = vld [vmem:[#allocation8 + $0x638] sm:$0xff]  ;;  %v2328_v38 = vld [vmem:[#allocation6 + $0x630] sm:$0xff] }
 0x897   :  { %2407 = vmatprep.subr.mxu0 %v2345_v8  ;;  %2543 = vmatprep.subr.mxu1 %v2494_v2  ;;  %v2477_v11 = vld [vmem:[#allocation8 + $0x630] sm:$0xff]  ;;  %v2327_v27 = vld [vmem:[#allocation6 + $0x628] sm:$0xff]  ;;  %v2475_v29 = vld [vmem:[#allocation8 + $0x620] sm:$0xff] }
 0x898   :  { %2284 = vrot.lane.b32.xlu1 %v2206_v47, %s3802_s29  ;;  %2281 = vrot.lane.b32.xlu0 %v2206_v47, %s3812_s24  ;;  %v2487_v47 = vld [vmem:[#allocation8 + $0x680] sm:$0xff]  ;;  %v2476_v28 = vld [vmem:[#allocation8 + $0x628] sm:$0xff]  ;;  %v2325_v32 = vld [vmem:[#allocation6 + $0x618] sm:$0xff] }
 0x899   :  { %2408 = vmatpush1.msra.mxu0 %v2344_v12  ;;  %2544 = vmatpush1.msra.mxu1 %v2493_v37  ;;  %v2474_v34 = vld [vmem:[#allocation8 + $0x618] sm:$0xff]  ;;  %v2324_v56 = vld [vmem:[#allocation6 + $0x610] sm:$0xff]  ;;  %v2323_v8 = vld [vmem:[#allocation6 + $0x608] sm:$0xff] }
 0x89a   :  { %2409 = vmatprep.subr.mxu0 %v2343_v25  ;;  %2545 = vmatprep.subr.mxu1 %v2492_v33  ;;  %v2473_v14 = vld [vmem:[#allocation8 + $0x610] sm:$0xff]  ;;  %v2472_v2 = vld [vmem:[#allocation8 + $0x608] sm:$0xff]  ;;  %v2471_v12 = vld [vmem:[#allocation8 + $0x600] sm:$0xff] }
 0x89b   :  { %2410 = vmatpush1.msra.mxu0 %v2342_v10  ;;  %2546 = vmatpush1.msra.mxu1 %v2491_v31  ;;  %v2385_v37 = vld [vmem:[#allocation6 + $0x7f8] sm:$0xff]  ;;  %v2384_v33 = vld [vmem:[#allocation6 + $0x7f0] sm:$0xff]  ;;  %v2383_v31 = vld [vmem:[#allocation6 + $0x7e8] sm:$0xff] }
 0x89c   :  { %2255 = vrot.lane.b32.xlu1 %v2175_v49, %s3802_s29  ;;  %2252 = vrot.lane.b32.xlu0 %v2175_v49, %s3812_s24  ;;  %v2335_v49 = vld [vmem:[#allocation6 + $0x668] sm:$0xff]  ;;  %v2534_v25 = vld [vmem:[#allocation8 + $0x7f8] sm:$0xff]  ;;  %v2533_v10 = vld [vmem:[#allocation8 + $0x7f0] sm:$0xff] }
 0x89d   :  { %2411 = vmatprep.subr.mxu0 %v2341_v54  ;;  %2547 = vmatprep.subr.mxu1 %v2490_v3  ;;  %v2532_v54 = vld [vmem:[#allocation8 + $0x7e8] sm:$0xff]  ;;  %v2382_v3 = vld [vmem:[#allocation6 + $0x7e0] sm:$0xff] }
 0x89e   :  { %2412 = vmatpush1.msra.mxu0 %v2340_v43  ;;  %2548 = vmatpush1.msra.mxu1 %v2489_v20  ;;  %v2531_v43 = vld [vmem:[#allocation8 + $0x7e0] sm:$0xff]  ;;  %v2381_v20 = vld [vmem:[#allocation6 + $0x7d8] sm:$0xff] }
 0x89f   :  { %2413 = vmatprep.subr.mxu0 %v2339_v63  ;;  %2549 = vmatprep.subr.mxu1 %v2488_v19  ;;  %v2530_v63 = vld [vmem:[#allocation8 + $0x7d8] sm:$0xff]  ;;  %v2380_v19 = vld [vmem:[#allocation6 + $0x7d0] sm:$0xff] }
 0x8a0   :  { %2211 = vrot.lane.b32.xlu1 %v2105_v58, %s3802_s29  ;;  %2208 = vrot.lane.b32.xlu0 %v2105_v58, %s3812_s24  ;;  %v2480_v58 = vld [vmem:[#allocation8 + $0x648] sm:$0xff] }
 0x8a1   :  { %2414 = vmatpush1.msra.mxu0 %v2338_v57  ;;  %2550 = vmatpush1.msra.mxu1 %v2487_v47  ;;  %v2529_v57 = vld [vmem:[#allocation8 + $0x7d0] sm:$0xff]  ;;  %v2379_v47 = vld [vmem:[#allocation6 + $0x7c8] sm:$0xff] }
 0x8a2   :  { %2415 = vmatprep.subr.mxu0 %v2337_v48  ;;  %2551 = vmatprep.subr.mxu1 %v2486_v24  ;;  %v2528_v48 = vld [vmem:[#allocation8 + $0x7c8] sm:$0xff]  ;;  %v2378_v24 = vld [vmem:[#allocation6 + $0x7c0] sm:$0xff] }
 0x8a3   :  { %2416 = vmatpush1.msra.mxu0 %v2336_v30  ;;  %2552 = vmatpush1.msra.mxu1 %v2485_v59  ;;  %v2527_v30 = vld [vmem:[#allocation8 + $0x7c0] sm:$0xff]  ;;  %v2377_v59 = vld [vmem:[#allocation6 + $0x7b8] sm:$0xff] }
 0x8a4   :  { %2218 = vrot.lane.b32.xlu1 %v2106_v61, %s3802_s29  ;;  %2215 = vrot.lane.b32.xlu0 %v2106_v61, %s3812_s24  ;;  %v2326_v61 = vld [vmem:[#allocation6 + $0x620] sm:$0xff] }
 0x8a5   :  { %2417 = vmatprep.subr.mxu0 %v2335_v49  ;;  %2553 = vmatprep.subr.mxu1 %v2484_v0  ;;  %v2526_v49 = vld [vmem:[#allocation8 + $0x7b8] sm:$0xff]  ;;  %v2376_v0 = vld [vmem:[#allocation6 + $0x7b0] sm:$0xff] }
 0x8a6   :  { %2418 = vmatpush1.msra.mxu0 %v2334_v5  ;;  %2554 = vmatpush1.msra.mxu1 %v2483_v45  ;;  %v2525_v5 = vld [vmem:[#allocation8 + $0x7b0] sm:$0xff]  ;;  %v2375_v45 = vld [vmem:[#allocation6 + $0x7a8] sm:$0xff] }
 0x8a7   :  { %2419 = vmatprep.subr.mxu0 %v2333_v36  ;;  %2555 = vmatprep.subr.mxu1 %v2482_v53  ;;  %v2524_v36 = vld [vmem:[#allocation8 + $0x7a8] sm:$0xff]  ;;  %v2374_v53 = vld [vmem:[#allocation6 + $0x7a0] sm:$0xff] }
 0x8a8   :  { %2262 = vrot.lane.b32.xlu1 %v2176_v52, %s3802_s29  ;;  %2259 = vrot.lane.b32.xlu0 %v2176_v52, %s3812_s24  ;;  %v2322_v52 = vld [vmem:[#allocation6 + $0x600] sm:$0xff] }
 0x8a9   :  { %2420 = vmatpush1.msra.mxu0 %v2332_v50  ;;  %2556 = vmatpush1.msra.mxu1 %v2481_v15  ;;  %v2523_v50 = vld [vmem:[#allocation8 + $0x7a0] sm:$0xff]  ;;  %v2373_v15 = vld [vmem:[#allocation6 + $0x798] sm:$0xff] }
 0x8aa   :  { %2421 = vmatprep.subr.mxu0 %v2331_v13  ;;  %2557 = vmatprep.subr.mxu1 %v2480_v58  ;;  %v2522_v13 = vld [vmem:[#allocation8 + $0x798] sm:$0xff]  ;;  %v2372_v58 = vld [vmem:[#allocation6 + $0x790] sm:$0xff] }
 0x8ab   :  { %2422 = vmatpush1.msra.mxu0 %v2330_v35  ;;  %2558 = vmatpush1.msra.mxu1 %v2479_v21  ;;  %v2521_v35 = vld [vmem:[#allocation8 + $0x790] sm:$0xff]  ;;  %v2371_v21 = vld [vmem:[#allocation6 + $0x788] sm:$0xff] }
 0x8ac   :  { %2423 = vmatprep.subr.mxu0 %v2329_v22  ;;  %2559 = vmatprep.subr.mxu1 %v2478_v7  ;;  %v2520_v22 = vld [vmem:[#allocation8 + $0x788] sm:$0xff]  ;;  %v2370_v7 = vld [vmem:[#allocation6 + $0x780] sm:$0xff] }
 0x8ad   :  { %2424 = vmatpush1.msra.mxu0 %v2328_v38  ;;  %2560 = vmatpush1.msra.mxu1 %v2477_v11  ;;  %v2519_v38 = vld [vmem:[#allocation8 + $0x780] sm:$0xff]  ;;  %v2369_v11 = vld [vmem:[#allocation6 + $0x778] sm:$0xff] }
 0x8ae   :  { %2425 = vmatprep.subr.mxu0 %v2327_v27  ;;  %2561 = vmatprep.subr.mxu1 %v2476_v28  ;;  %v2518_v27 = vld [vmem:[#allocation8 + $0x778] sm:$0xff]  ;;  %v2368_v28 = vld [vmem:[#allocation6 + $0x770] sm:$0xff] }
 0x8af   :  { %2426 = vmatpush1.msra.mxu0 %v2326_v61  ;;  %2562 = vmatpush1.msra.mxu1 %v2475_v29  ;;  %v2517_v61 = vld [vmem:[#allocation8 + $0x770] sm:$0xff]  ;;  %v2367_v29 = vld [vmem:[#allocation6 + $0x768] sm:$0xff] }
 0x8b0   :  { %2427 = vmatprep.subr.mxu0 %v2325_v32  ;;  %2563 = vmatprep.subr.mxu1 %v2474_v34  ;;  %v2516_v32 = vld [vmem:[#allocation8 + $0x768] sm:$0xff]  ;;  %v2366_v34 = vld [vmem:[#allocation6 + $0x760] sm:$0xff] }
 0x8b1   :  { %2428 = vmatpush1.msra.mxu0 %v2324_v56  ;;  %2564 = vmatpush1.msra.mxu1 %v2473_v14  ;;  %v2515_v56 = vld [vmem:[#allocation8 + $0x760] sm:$0xff] }
 0x8b2   :  { %2429 = vmatprep.subr.mxu0 %v2323_v8  ;;  %2565 = vmatprep.subr.mxu1 %v2472_v2 }
 0x8b3   :  { %2430 = vmatpush1.msra.mxu0 %v2322_v52  ;;  %2566 = vmatpush1.msra.mxu1 %v2471_v12 }
 0x8b4   :  { %2431 = vmatprep.subr.mxu0 %v2385_v37  ;;  %2567 = vmatprep.subr.mxu1 %v2534_v25 }
 0x8b5   :  { %2432 = vmatpush2.msra.mxu0 %v2384_v33  ;;  %2568 = vmatpush2.msra.mxu1 %v2533_v10  ;;  %v2365_v10 = vld [vmem:[#allocation6 + $0x758] sm:$0xff] }
 0x8b6   :  { %2433 = vmatprep.subr.mxu0 %v2383_v31  ;;  %2569 = vmatprep.subr.mxu1 %v2532_v54  ;;  %v2514_v31 = vld [vmem:[#allocation8 + $0x758] sm:$0xff]  ;;  %v2364_v54 = vld [vmem:[#allocation6 + $0x750] sm:$0xff] }
 0x8b7   :  { %2434 = vmatpush2.msra.mxu0 %v2382_v3  ;;  %2570 = vmatpush2.msra.mxu1 %v2531_v43  ;;  %v2513_v3 = vld [vmem:[#allocation8 + $0x750] sm:$0xff] }
 0x8b8   :  { %2435 = vmatprep.subr.mxu0 %v2381_v20  ;;  %2571 = vmatprep.subr.mxu1 %v2530_v63  ;;  %v2363_v20 = vld [vmem:[#allocation6 + $0x748] sm:$0xff] }
 0x8b9   :  { %2436 = vmatpush2.msra.mxu0 %v2380_v19  ;;  %2572 = vmatpush2.msra.mxu1 %v2529_v57  ;;  %v2512_v63 = vld [vmem:[#allocation8 + $0x748] sm:$0xff]  ;;  %v2362_v19 = vld [vmem:[#allocation6 + $0x740] sm:$0xff] }
 0x8ba   :  { %2437 = vmatprep.subr.mxu0 %v2379_v47  ;;  %2573 = vmatprep.subr.mxu1 %v2528_v48  ;;  %v2511_v48 = vld [vmem:[#allocation8 + $0x740] sm:$0xff] }
 0x8bb   :  { %2438 = vmatpush2.msra.mxu0 %v2378_v24  ;;  %2574 = vmatpush2.msra.mxu1 %v2527_v30 }
 0x8bc   :  { %2439 = vmatprep.subr.mxu0 %v2377_v59  ;;  %2575 = vmatprep.subr.mxu1 %v2526_v49  ;;  %v2361_v59 = vld [vmem:[#allocation6 + $0x738] sm:$0xff] }
 0x8bd   :  { %2440 = vmatpush2.msra.mxu0 %v2376_v0  ;;  %2576 = vmatpush2.msra.mxu1 %v2525_v5  ;;  %v2510_v49 = vld [vmem:[#allocation8 + $0x738] sm:$0xff]  ;;  %v2360_v5 = vld [vmem:[#allocation6 + $0x730] sm:$0xff] }
 0x8be   :  { %2441 = vmatprep.subr.mxu0 %v2375_v45  ;;  %2577 = vmatprep.subr.mxu1 %v2524_v36  ;;  %v2509_v45 = vld [vmem:[#allocation8 + $0x730] sm:$0xff]  ;;  %v2359_v36 = vld [vmem:[#allocation6 + $0x728] sm:$0xff] }
 0x8bf   :  { %2442 = vmatpush2.msra.mxu0 %v2374_v53  ;;  %2578 = vmatpush2.msra.mxu1 %v2523_v50 }
 0x8c0   :  { %2443 = vmatprep.subr.mxu0 %v2373_v15  ;;  %2579 = vmatprep.subr.mxu1 %v2522_v13  ;;  %v2508_v13 = vld [vmem:[#allocation8 + $0x728] sm:$0xff] }
 0x8c1   :  { %2444 = vmatpush2.msra.mxu0 %v2372_v58  ;;  %2580 = vmatpush2.msra.mxu1 %v2521_v35  ;;  %v2358_v58 = vld [vmem:[#allocation6 + $0x720] sm:$0xff] }
 0x8c2   :  { %2445 = vmatprep.subr.mxu0 %v2371_v21  ;;  %2581 = vmatprep.subr.mxu1 %v2520_v22  ;;  %v2507_v35 = vld [vmem:[#allocation8 + $0x720] sm:$0xff] }
 0x8c3   :  { %2446 = vmatpush2.msra.mxu0 %v2370_v7  ;;  %2582 = vmatpush2.msra.mxu1 %v2519_v38  ;;  %v2357_v7 = vld [vmem:[#allocation6 + $0x718] sm:$0xff] }
 0x8c4   :  { %2447 = vmatprep.subr.mxu0 %v2369_v11  ;;  %2583 = vmatprep.subr.mxu1 %v2518_v27  ;;  %v2506_v38 = vld [vmem:[#allocation8 + $0x718] sm:$0xff]  ;;  %v2356_v11 = vld [vmem:[#allocation6 + $0x710] sm:$0xff] }
 0x8c5   :  { %2448 = vmatpush2.msra.mxu0 %v2368_v28  ;;  %2584 = vmatpush2.msra.mxu1 %v2517_v61  ;;  %v2355_v28 = vld [vmem:[#allocation6 + $0x708] sm:$0xff] }
 0x8c6   :  { %2449 = vmatprep.subr.mxu0 %v2367_v29  ;;  %2585 = vmatprep.subr.mxu1 %v2516_v32 }
 0x8c7   :  { %2450 = vmatpush2.msra.mxu0 %v2366_v34  ;;  %2586 = vmatpush2.msra.mxu1 %v2515_v56  ;;  %v2504_v34 = vld [vmem:[#allocation8 + $0x708] sm:$0xff]  ;;  %v2354_v56 = vld [vmem:[#allocation6 + $0x700] sm:$0xff] }
 0x8c8   :  { %2451 = vmatprep.subr.mxu0 %v2365_v10  ;;  %2587 = vmatprep.subr.mxu1 %v2514_v31 }
 0x8c9   :  { %2452 = vmatpush2.msra.mxu0 %v2364_v54  ;;  %2588 = vmatpush2.msra.mxu1 %v2513_v3 }
 0x8ca   :  { %2453 = vmatprep.subr.mxu0 %v2363_v20  ;;  %2589 = vmatprep.subr.mxu1 %v2512_v63 }
 0x8cb   :  { %2454 = vmatpush2.msra.mxu0 %v2362_v19  ;;  %2590 = vmatpush2.msra.mxu1 %v2511_v48  ;;  %v3310_v48 = vld [vmem:[%s5176_s5 + $0x4] sm:$0x3] }
 0x8cc   :  { %2455 = vmatprep.subr.mxu0 %v2361_v59  ;;  %2591 = vmatprep.subr.mxu1 %v2510_v49 }
 0x8cd   :  { %2456 = vmatpush2.msra.mxu0 %v2360_v5  ;;  %2592 = vmatpush2.msra.mxu1 %v2509_v45 }
 0x8ce   :  { %2457 = vmatprep.subr.mxu0 %v2359_v36  ;;  %2593 = vmatprep.subr.mxu1 %v2508_v13 }
 0x8cf   :  { %2458 = vmatpush2.msra.mxu0 %v2358_v58  ;;  %2594 = vmatpush2.msra.mxu1 %v2507_v35 }
 0x8d0   :  { %2459 = vmatprep.subr.mxu0 %v2357_v7  ;;  %2595 = vmatprep.subr.mxu1 %v2506_v38 }
 0x8d1   :  { %2460 = vmatpush2.msra.mxu0 %v2356_v11 }
 0x8d2   :  { %2461 = vmatprep.subr.mxu0 %v2355_v28  ;;  %v3589_v28 = vld [vmem:[#allocation11 + $0xd0] sm:$0xff] }
 0x8d3   :  { %2462 = vmatpush2.msra.mxu0 %v2354_v56  ;;  %v3594_v56 = vld [vmem:[#allocation11 + $0xa8] sm:$0xff] }
 0x8fe   :  { %v2278_v14 = vpop.permute.xlu1 %2277  ;;  %v2275_v8 = vpop.permute.xlu0 %2274 }
 0x8ff   :  { %v2287_v2 = vsel %vm734_vm8, %v2275_v8, %v2278_v14 }
 0x900   :  { %v2288_v52 = vsel %vm736_vm9, %v2287_v2, %v2275_v8  ;;  %v3584_v8 = vld [vmem:[#allocation11 + $0xf8] sm:$0xff] }
 0x901   :  { %v2289_v12 = vsel %vm738_vm10, %v2288_v52, %v2278_v14  ;;  %v2503_v14 = vld [vmem:[#allocation8 + $0x700] sm:$0xff]  ;;  %2608 = vmatprep.subr.mxu0 %v3584_v8 }
 0x902   :  { %v2234_v37 = vpop.permute.xlu1 %2233  ;;  %v2231_v25 = vpop.permute.xlu0 %2230  ;;  %v2293_v33 = vadd.f32 %v2289_v12, %v4681_v6  ;;  %v3596_v8 = vld [vmem:[#allocation11 + $0x98] sm:$0xff] }
 0x903   :  { %v2243_v43 = vsel %vm734_vm8, %v2231_v25, %v2234_v37 }
 0x904   :  { %2306 = vrot.lane.b32.xlu1 %v2293_v33, %s3811_s3  ;;  %v2244_v24 = vsel %vm736_vm9, %v2243_v43, %v2231_v25 }
 0x905   :  { %v2245_v21 = vsel %vm738_vm10, %v2244_v24, %v2234_v37  ;;  %v1726_v24 = vrot.slane %v3310_v48, %v4034_v41 }
 0x906   :  { %v2241_v57 = vpop.permute.xlu1 %2240  ;;  %v2238_v47 = vpop.permute.xlu0 %2237  ;;  %v2249_v32 = vadd.f32 %v2245_v21, %v4684_v18 }
 0x907   :  { %v2246_v6 = vsel %vm734_vm8, %v2238_v47, %v2241_v57 }
 0x908   :  { %v2247_v30 = vsel %vm736_vm9, %v2246_v6, %v2238_v47 }
 0x909   :  { %v2248_v0 = vsel %vm738_vm10, %v2247_v30, %v2241_v57 }
 0x90a   :  { %v2285_v53 = vpop.permute.xlu1 %2284  ;;  %v2282_v50 = vpop.permute.xlu0 %2281  ;;  %v2250_v15 = vadd.f32 %v2248_v0, %v4698_v9  ;;  %v2505_v9 = vld [vmem:[#allocation8 + $0x710] sm:$0xff] }
 0x90b   :  { %v2290_v22 = vsel %vm734_vm8, %v2282_v50, %v2285_v53  ;;  %2596 = vmatpush2.msra.mxu1 %v2505_v9  ;;  %v3588_v9 = vld [vmem:[#allocation11 + $0xd8] sm:$0xff] }
 0x90c   :  { %v2291_v27 = vsel %vm736_vm9, %v2290_v22, %v2282_v50  ;;  %2300 = vrot.lane.b32.xlu0 %v2250_v15, %s3811_s3  ;;  %2597 = vmatprep.subr.mxu1 %v2504_v34  ;;  %v1798_v50 = vadd.f32 %v4654_v26, %v1726_v24  ;;  %v3593_v34 = vld [vmem:[#allocation11 + $0xb0] sm:$0xff] }
 0x90d   :  { %v2292_v61 = vsel %vm738_vm10, %v2291_v27, %v2285_v53  ;;  %2598 = vmatpush2.msra.mxu1 %v2503_v14  ;;  %v1722_v53 = vrot.slane %v3310_v48, %v4028_v39  ;;  %v3595_v14 = vld [vmem:[#allocation11 + $0xa0] sm:$0xff]  ;;  %v3617_v24 = vld [vmem:[#allocation11 + $0x1f0] sm:$0xff] }
 0x90e   :  { %v2294_v29 = vadd.f32 %v2292_v61, %v4702_v16  ;;  %v2256_v2 = vpop.permute.xlu1 %2255  ;;  %v2253_v16 = vpop.permute.xlu0 %2252  ;;  %v3590_v61 = vld [vmem:[#allocation11 + $0xc8] sm:$0xff]  ;;  %v3615_v48 = vld [vmem:[#allocation11] sm:$0xff] }
 0x90f   :  { %v2265_v25 = vsel %vm734_vm8, %v2253_v16, %v2256_v2  ;;  %v1796_v7 = vadd.f32 %v4652_v60, %v1722_v53  ;;  %v3585_v60 = vld [vmem:[#allocation11 + $0xf0] sm:$0xff] }
 0x910   :  { %2310 = vrot.lane.b32.xlu1 %v2294_v29, %s3811_s3  ;;  %2296 = vrot.lane.b32.xlu0 %v2249_v32, %s3811_s3  ;;  %v2266_v54 = vsel %vm736_vm9, %v2265_v25, %v2253_v16  ;;  %v3591_v29 = vld [vmem:[#allocation11 + $0xc0] sm:$0xff]  ;;  %v3592_v32 = vld [vmem:[#allocation11 + $0xb8] sm:$0xff]  ;;  %v3598_v16 = vld [vmem:[#allocation11 + $0x88] sm:$0xff] }
 0x911   :  { %v2267_v63 = vsel %vm738_vm10, %v2266_v54, %v2256_v2  ;;  %v3597_v2 = vld [vmem:[#allocation11 + $0x90] sm:$0xff]  ;;  %v3603_v25 = vld [vmem:[#allocation11 + $0x60] sm:$0xff] }
 0x912   :  { %v2212_v52 = vpop.permute.xlu1 %2211  ;;  %v2209_v18 = vpop.permute.xlu0 %2208  ;;  %v2271_v30 = vadd.f32 %v2267_v63, %v4687_v23  ;;  %v3607_v54 = vld [vmem:[#allocation11 + $0x40] sm:$0xff]  ;;  %v3625_v53 = vld [vmem:[#allocation11 + $0x1b0] sm:$0xff] }
 0x913   :  { %v2221_v43 = vsel %vm734_vm8, %v2209_v18, %v2212_v52  ;;  %v3611_v63 = vld [vmem:[#allocation11 + $0x20] sm:$0xff] }
 0x914   :  { %v2222_v57 = vsel %vm736_vm9, %v2221_v43, %v2209_v18  ;;  %v3600_v18 = vld [vmem:[#allocation11 + $0x78] sm:$0xff]  ;;  %v3609_v43 = vld [vmem:[#allocation11 + $0x30] sm:$0xff] }
 0x915   :  { %v2223_v5 = vsel %vm738_vm10, %v2222_v57, %v2212_v52  ;;  %v3599_v52 = vld [vmem:[#allocation11 + $0x80] sm:$0xff]  ;;  %v3613_v57 = vld [vmem:[#allocation11 + $0x10] sm:$0xff] }
 0x916   :  { %v2219_v12 = vpop.permute.xlu1 %2218  ;;  %v2216_v37 = vpop.permute.xlu0 %2215  ;;  %v2227_v58 = vadd.f32 %v2223_v5, %v4694_v55  ;;  %v3586_v55 = vld [vmem:[#allocation11 + $0xe8] sm:$0xff] }
 0x917   :  { %v2224_v33 = vsel %vm734_vm8, %v2216_v37, %v2219_v12  ;;  %v3622_v5 = vld [vmem:[#allocation11 + $0x1c8] sm:$0xff] }
 0x918   :  { %v2225_v3 = vsel %vm736_vm9, %v2224_v33, %v2216_v37  ;;  %v3602_v37 = vld [vmem:[#allocation11 + $0x68] sm:$0xff]  ;;  %v3604_v33 = vld [vmem:[#allocation11 + $0x58] sm:$0xff] }
 0x919   :  { %v2226_v19 = vsel %vm738_vm10, %v2225_v3, %v2219_v12  ;;  %v3601_v12 = vld [vmem:[#allocation11 + $0x70] sm:$0xff]  ;;  %v3608_v3 = vld [vmem:[#allocation11 + $0x38] sm:$0xff] }
 0x91a   :  { %v2263_v10 = vpop.permute.xlu1 %2262  ;;  %v2260_v31 = vpop.permute.xlu0 %2259  ;;  %v2228_v59 = vadd.f32 %v2226_v19, %v4706_v62  ;;  %v3612_v19 = vld [vmem:[#allocation11 + $0x18] sm:$0xff] }
 0x91b   :  { %v2268_v20 = vsel %vm734_vm8, %v2260_v31, %v2263_v10 }
 0x91c   :  { %v2269_v47 = vsel %vm736_vm9, %v2268_v20, %v2260_v31  ;;  %v3606_v31 = vld [vmem:[#allocation11 + $0x48] sm:$0xff] }
 0x91d   :  { %v2270_v0 = vsel %vm738_vm10, %v2269_v47, %v2263_v10  ;;  %v3605_v10 = vld [vmem:[#allocation11 + $0x50] sm:$0xff]  ;;  %v3610_v20 = vld [vmem:[#allocation11 + $0x28] sm:$0xff] }
 0x91e   :  { %v2272_v13 = vadd.f32 %v2270_v0, %v4710_v17  ;;  %v3587_v17 = vld [vmem:[#allocation11 + $0xe0] sm:$0xff]  ;;  %v3614_v47 = vld [vmem:[#allocation11 + $0x8] sm:$0xff]  ;;  %v3621_v0 = vld [vmem:[#allocation11 + $0x1d0] sm:$0xff] }
 0x976   :  { %v2307_v6 = vpop.permute.xlu1 %2306 }
 0x977   :  { %v2313_v45 = vadd.f32 %v2307_v6, %v2271_v30  ;;  %v3616_v6 = vld [vmem:[#allocation11 + $0x1f8] sm:$0xff]  ;;  %v3618_v30 = vld [vmem:[#allocation11 + $0x1e8] sm:$0xff] }
 0x97e   :  { %v2301_v49 = vpop.permute.xlu0 %2300 }
 0x97f   :  { %v2304_v36 = vadd.f32 %v2301_v49, %v2228_v59  ;;  %v3619_v59 = vld [vmem:[#allocation11 + $0x1e0] sm:$0xff]  ;;  %v3620_v49 = vld [vmem:[#allocation11 + $0x1d8] sm:$0xff] }
 0x981   :  { %v2316_v15 = vadd.f32 %v2313_v45, %v2304_v36  ;;  %v3623_v45 = vld [vmem:[#allocation11 + $0x1c0] sm:$0xff]  ;;  %v3624_v36 = vld [vmem:[#allocation11 + $0x1b8] sm:$0xff] }
 0x982   :  { %v2311_v35 = vpop.permute.xlu1 %2310  ;;  %v2297_v23 = vpop.permute.xlu0 %2296 }
 0x983   :  { %v2318_v21 = vadd.f32 %v2316_v15, %v1798_v50  ;;  %v2314_v62 = vadd.f32 %v2311_v35, %v2272_v13  ;;  %v2303_v22 = vadd.f32 %v2297_v23, %v2227_v58  ;;  %v3626_v50 = vld [vmem:[#allocation11 + $0x1a8] sm:$0xff]  ;;  %v3627_v15 = vld [vmem:[#allocation11 + $0x1a0] sm:$0xff]  ;;  %v3628_v13 = vld [vmem:[#allocation11 + $0x198] sm:$0xff] }
 0x984   :  { %v3629_v58 = vld [vmem:[#allocation11 + $0x190] sm:$0xff]  ;;  %v3630_v35 = vld [vmem:[#allocation11 + $0x188] sm:$0xff]  ;;  %v3631_v23 = vld [vmem:[#allocation11 + $0x180] sm:$0xff] }
 0x985   :  { %v4797_v38 = vmul.f32 0.70710677, %v2318_v21  ;;  %v2315_v11 = vadd.f32 %v2314_v62, %v2303_v22  ;;  %v3632_v21 = vld [vmem:[#allocation11 + $0x178] sm:$0xff]  ;;  %v3633_v62 = vld [vmem:[#allocation11 + $0x170] sm:$0xff]  ;;  %v3634_v22 = vld [vmem:[#allocation11 + $0x168] sm:$0xff] }
 0x987   :  { %v2317_v27 = vadd.f32 %v2315_v11, %v1796_v7  ;;  %2463 = vmatprep.mubr.f32.mxu0 %v4797_v38  ;;  %2599 = vmatprep.mubr.f32.mxu1 %v4797_v38  ;;  %v3635_v7 = vld [vmem:[#allocation11 + $0x160] sm:$0xff]  ;;  %v3636_v11 = vld [vmem:[#allocation11 + $0x158] sm:$0xff] }
 0x989   :  { %v4801_v26 = vmul.f32 0.70710677, %v2317_v27  ;;  %v3637_v27 = vld [vmem:[#allocation11 + $0x150] sm:$0xff] }
 0x98b   :  { %2741 = vrot.lane.b32.xlu1 %v4801_v26, %s3811_s3  ;;  %2738 = vrot.lane.b32.xlu0 %v4801_v26, %s3802_s29 }
 0x98c   :  { %2464 = vmatmul.mubr.f32.vlgmr.msra.gmra.mxu0 %v4801_v26  ;;  %2600 = vmatmul.mubr.f32.vlgmr.msra.gmra.mxu1 %v4801_v26 }
 0x98d   :  { %2609 = vmatpush1.msra.mxu0 %v3585_v60  ;;  %v3638_v60 = vld [vmem:[#allocation11 + $0x148] sm:$0xff] }
 0x98e   :  { %2610 = vmatprep.subr.mxu0 %v3586_v55  ;;  %v3639_v55 = vld [vmem:[#allocation11 + $0x140] sm:$0xff] }
 0x98f   :  { %2811 = vrot.lane.b32.xlu1 %v4797_v38, %s3811_s3  ;;  %2808 = vrot.lane.b32.xlu0 %v4797_v38, %s3802_s29 }
 0x990   :  { %2611 = vmatpush1.msra.mxu0 %v3587_v17  ;;  %v3640_v17 = vld [vmem:[#allocation11 + $0x138] sm:$0xff] }
 0x991   :  { %2612 = vmatprep.subr.mxu0 %v3588_v9  ;;  %v3641_v9 = vld [vmem:[#allocation11 + $0x130] sm:$0xff] }
 0x992   :  { %2613 = vmatpush1.msra.mxu0 %v3589_v28  ;;  %v3642_v28 = vld [vmem:[#allocation11 + $0x128] sm:$0xff] }
 0x993   :  { %2814 = vrot.lane.b32.xlu1 %v4797_v38, %s3812_s24  ;;  %2744 = vrot.lane.b32.xlu0 %v4801_v26, %s3812_s24 }
 0x994   :  { %2614 = vmatprep.subr.mxu0 %v3590_v61  ;;  %v3643_v61 = vld [vmem:[#allocation11 + $0x120] sm:$0xff] }
 0x995   :  { %2615 = vmatpush1.msra.mxu0 %v3591_v29  ;;  %v3644_v29 = vld [vmem:[#allocation11 + $0x118] sm:$0xff] }
 0x996   :  { %2616 = vmatprep.subr.mxu0 %v3592_v32  ;;  %v3645_v32 = vld [vmem:[#allocation11 + $0x110] sm:$0xff] }
 0x997   :  { %2617 = vmatpush1.msra.mxu0 %v3593_v34  ;;  %v3646_v34 = vld [vmem:[#allocation11 + $0x108] sm:$0xff] }
 0x998   :  { %2618 = vmatprep.subr.mxu0 %v3594_v56  ;;  %v3647_v56 = vld [vmem:[#allocation11 + $0x100] sm:$0xff] }
 0x999   :  { %2619 = vmatpush1.msra.mxu0 %v3595_v14 }
 0x99a   :  { %2620 = vmatprep.subr.mxu0 %v3596_v8 }
 0x99b   :  { %2621 = vmatpush1.msra.mxu0 %v3597_v2 }
 0x99c   :  { %2622 = vmatprep.subr.mxu0 %v3598_v16 }
 0x99d   :  { %2623 = vmatpush1.msra.mxu0 %v3599_v52 }
 0x99e   :  { %2624 = vmatprep.subr.mxu0 %v3600_v18 }
 0x99f   :  { %2625 = vmatpush1.msra.mxu0 %v3601_v12 }
 0x9a0   :  { %2626 = vmatprep.subr.mxu0 %v3602_v37 }
 0x9a1   :  { %2627 = vmatpush1.msra.mxu0 %v3603_v25  ;;  %v4839_v25 = vld [vmem:[%s5179_s8 + $0x30] sm:$0xff] }
 0x9a2   :  { %2628 = vmatprep.subr.mxu0 %v3604_v33 }
 0x9a3   :  { %2629 = vmatpush1.msra.mxu0 %v3605_v10 }
 0x9a4   :  { %2630 = vmatprep.subr.mxu0 %v3606_v31 }
 0x9a5   :  { %2631 = vmatpush1.msra.mxu0 %v3607_v54  ;;  %v4851_v54 = vld [vmem:[%s5179_s8 + $0x38] sm:$0xff]  ;;  %s3772_s8 = scalar_lea.vmem %s3292_s22, 32 }
 0x9a6   :  { %2632 = vmatprep.subr.mxu0 %v3608_v3 }
 0x9a7   :  { %2633 = vmatpush1.msra.mxu0 %v3609_v43  ;;  %v2853_v43 = vrot.slane %v4839_v25, %v4096_v44 }
 0x9a8   :  { %2634 = vmatprep.subr.mxu0 %v3610_v20  ;;  %v2783_v20 = vrot.slane %v4839_v25, %v4099_v46 }
 0x9a9   :  { %2635 = vmatpush1.msra.mxu0 %v3611_v63  ;;  %v2823_v63 = vrot.slane %v4839_v25, %v4113_v51 }
 0x9aa   :  { %2636 = vmatprep.subr.mxu0 %v3612_v19 }
 0x9ab   :  { %2637 = vmatpush1.msra.mxu0 %v3613_v57 }
 0x9ac   :  { %2638 = vmatprep.subr.mxu0 %v3614_v47 }
 0x9ad   :  { %2639 = vmatpush1.msra.mxu0 %v3615_v48  ;;  %v2787_v48 = vrot.slane %v4851_v54, %v4099_v46 }
 0x9ae   :  { %2640 = vmatprep.subr.mxu0 %v3616_v6  ;;  %v2857_v6 = vrot.slane %v4851_v54, %v4096_v44 }
 0x9af   :  { %2641 = vmatpush2.msra.mxu0 %v3617_v24  ;;  %v2757_v24 = vrot.slane %v4851_v54, %v4028_v39 }
 0x9b0   :  { %2642 = vmatprep.subr.mxu0 %v3618_v30 }
 0x9b1   :  { %2643 = vmatpush2.msra.mxu0 %v3619_v59  ;;  %v2827_v59 = vrot.slane %v4851_v54, %v4113_v51 }
 0x9b2   :  { %2644 = vmatprep.subr.mxu0 %v3620_v49  ;;  %v2753_v49 = vrot.slane %v4839_v25, %v4028_v39 }
 0x9b3   :  { %2645 = vmatpush2.msra.mxu0 %v3621_v0 }
 0x9b4   :  { %2646 = vmatprep.subr.mxu0 %v3622_v5 }
 0x9b5   :  { %2647 = vmatpush2.msra.mxu0 %v3623_v45 }
 0x9b6   :  { %2648 = vmatprep.subr.mxu0 %v3624_v36 }
 0x9b7   :  { %2649 = vmatpush2.msra.mxu0 %v3625_v53 }
 0x9b8   :  { %2650 = vmatprep.subr.mxu0 %v3626_v50 }
 0x9b9   :  { %2651 = vmatpush2.msra.mxu0 %v3627_v15 }
 0x9ba   :  { %2652 = vmatprep.subr.mxu0 %v3628_v13 }
 0x9bb   :  { %2653 = vmatpush2.msra.mxu0 %v3629_v58 }
 0x9bc   :  { %2654 = vmatprep.subr.mxu0 %v3630_v35 }
 0x9bd   :  { %2655 = vmatpush2.msra.mxu0 %v3631_v23 }
 0x9be   :  { %2656 = vmatprep.subr.mxu0 %v3632_v21 }
 0x9bf   :  { %2657 = vmatpush2.msra.mxu0 %v3633_v62 }
 0x9c0   :  { %2658 = vmatprep.subr.mxu0 %v3634_v22 }
 0x9c1   :  { %2659 = vmatpush2.msra.mxu0 %v3635_v7 }
 0x9c2   :  { %2660 = vmatprep.subr.mxu0 %v3636_v11 }
 0x9c3   :  { %2661 = vmatpush2.msra.mxu0 %v3637_v27 }
 0x9c4   :  { %2662 = vmatprep.subr.mxu0 %v3638_v60 }
 0x9c5   :  { %2663 = vmatpush2.msra.mxu0 %v3639_v55 }
 0x9c6   :  { %2664 = vmatprep.subr.mxu0 %v3640_v17 }
 0x9c7   :  { %2665 = vmatpush2.msra.mxu0 %v3641_v9 }
 0x9c8   :  { %2666 = vmatprep.subr.mxu0 %v3642_v28 }
 0x9c9   :  { %2667 = vmatpush2.msra.mxu0 %v3643_v61 }
 0x9ca   :  { %2668 = vmatprep.subr.mxu0 %v3644_v29 }
 0x9cb   :  { %2669 = vmatpush2.msra.mxu0 %v3645_v32 }
 0x9cc   :  { %2670 = vmatprep.subr.mxu0 %v3646_v34 }
 0x9cd   :  { %2671 = vmatpush2.msra.mxu0 %v3647_v56 }
 0x9ce   :  { %3367 = vmatprep.subr.mxu0 %v3810_v1 }
 0x9fd   :  { %v4818_v14 = vpop.permute.xlu1 %2741  ;;  %v4820_v8 = vpop.permute.xlu0 %2738 }
 0x9fe   :  { %v2747_v2 = vsel %vm734_vm8, %v4801_v26, %v4820_v8 }
 0x9ff   :  { %v2748_v16 = vsel %vm736_vm9, %v2747_v2, %v4818_v14 }
 0xa01   :  { %v4827_v52 = vpop.permute.xlu1 %2811  ;;  %v4829_v18 = vpop.permute.xlu0 %2808 }
 0xa02   :  { %v2817_v12 = vsel %vm734_vm8, %v4797_v38, %v4829_v18 }
 0xa03   :  { %v2818_v37 = vsel %vm736_vm9, %v2817_v12, %v4827_v52 }
 0xa05   :  { %v4841_v33 = vpop.permute.xlu1 %2814  ;;  %v4843_v10 = vpop.permute.xlu0 %2744 }
 0xa06   :  { %v2847_v31 = vsel %vm734_vm8, %v4827_v52, %v4841_v33  ;;  %v2777_v3 = vsel %vm734_vm8, %v4818_v14, %v4843_v10  ;;  %v2819_v19 = vsel %vm738_vm10, %v2818_v37, %v4841_v33  ;;  %v2749_v30 = vsel %vm738_vm10, %v2748_v16, %v4843_v10  ;;  %v2712_v37 = vld [vmem:[#allocation9 + $0x6] sm:$0x3] }
 0xa07   :  { %v2848_v57 = vsel %vm736_vm9, %v2847_v31, %v4797_v38  ;;  %v2778_v47 = vsel %vm736_vm9, %v2777_v3, %v4801_v26  ;;  %v4884_v5 = vmul.f32 %v2823_v63, %v2819_v19  ;;  %v4894_v51 = vmul.f32 %v2757_v24, %v2749_v30 }
 0xa08   :  { %v2849_v0 = vsel %vm738_vm10, %v2848_v57, %v4829_v18  ;;  %v2779_v46 = vsel %vm738_vm10, %v2778_v47, %v4820_v8  ;;  %v4896_v50 = vmul.f32 %v2827_v59, %v2819_v19  ;;  %v4898_v15 = vmul.f32 %v2753_v49, %v2749_v30 }
 0xa09   :  { %v4886_v44 = vmul.f32 %v2853_v43, %v2849_v0  ;;  %v4888_v45 = vmul.f32 %v2783_v20, %v2779_v46  ;;  %v4890_v36 = vmul.f32 %v2787_v48, %v2779_v46  ;;  %v4892_v53 = vmul.f32 %v2857_v6, %v2849_v0 }
 0xa0a   :  { %v2719_v63 = vrot.slane %v2712_v37, %v4028_v39  ;;  %v2723_v24 = vrot.slane %v2712_v37, %v4034_v41 }
 0xa4c   :  { %v4900_v13 = vpop.f32.mrf.mxu1  ;;  %v4908_v21 = vpop.f32.mrf.mxu0 }
 0xa4d   :  { %v2606_v23 = vmul.f32 %v4900_v13, %v4900_v13 }
 0xa4e   :  { %v4902_v58 = vpop.f32.mrf.mxu1  ;;  %v4910_v62 = vpop.f32.mrf.mxu0 }
 0xa4f   :  { %v2607_v35 = vmul.f32 %v4902_v58, %v4902_v58 }
 0xa51   :  { %2672 = vmatprep.mubr.f32.mxu0 %v2607_v35 }
 0xa52   :  { %2673 = vmatmul.mubr.f32.vlgmr.msra.gmra.mxu0 %v2606_v23  ;;  %v2862_v23 = vsel %vm734_vm8, %v4829_v18, %v4827_v52 }
 0xb12   :  { %v2674_v22 = vpop.f32.mrf.mxu0 }
 0xb13   :  { %v2679_v7 = vmul.f32 %v2674_v22, %v2674_v22  ;;  %v2863_v22 = vsel %vm736_vm9, %v2862_v23, %v4841_v33  ;;  %v3003_v23 = vld [vmem:[%s5181_s10 + $0x50] sm:$0xff] }
 0xb14   :  { %v2676_v11 = vpop.f32.mrf.mxu0 }
 0xb15   :  { %v2681_v27 = vadd.f32 1e-16, %v2679_v7  ;;  %v2680_v60 = vmul.f32 %v2676_v11, %v2676_v11  ;;  %v2792_v7 = vsel %vm734_vm8, %v4820_v8, %v4818_v14 }
 0xb16   :  { %v2793_v11 = vsel %vm736_vm9, %v2792_v7, %v4843_v10  ;;  %v3002_v7 = vld [vmem:[%s5181_s10 + $0x48] sm:$0xff] }
 0xb17   :  { %3438 = vrsqrt.f32 %v2681_v27  ;;  %v2682_v55 = vadd.f32 1e-16, %v2680_v60  ;;  %vm2685_vm14 = vcmp.eq.f32.partialorder %v2681_v27, inf  ;;  %v2688_v28 = vand.u32 2147483648, %v2681_v27 }
 0xb18   :  { %vm2687_vm15 = vcmp.eq.f32.partialorder %v2681_v27, 0.0  ;;  %v2864_v60 = vsel %vm738_vm10, %v2863_v22, %v4797_v38  ;;  %v3018_v22 = vld [vmem:[%s5181_s10 + $0xc8] sm:$0xff] }
 0xb19   :  { %3440 = vrsqrt.f32 %v2682_v55  ;;  %vm2692_vm0 = vcmp.eq.f32.partialorder %v2682_v55, inf  ;;  %v2695_v56 = vand.u32 2147483648, %v2682_v55  ;;  %vm2694_vm1 = vcmp.eq.f32.partialorder %v2682_v55, 0.0 }
 0xb24   :  { %v3439_v17 = vpop.eup %3438 }
 0xb25   :  { %v2684_v9 = vmul.f32 %v3439_v17, %v2681_v27 }
 0xb26   :  { %v3441_v61 = vpop.eup %3440 }
 0xb27   :  { %v2686_v29 = vsel %vm2685_vm14, %v2681_v27, %v2684_v9  ;;  %v2691_v34 = vmul.f32 %v3441_v61, %v2682_v55  ;;  %v2868_v27 = vrot.slane %v4839_v25, %v4085_v40  ;;  %v2794_v9 = vsel %vm738_vm10, %v2793_v11, %v4801_v26  ;;  %v3017_v11 = vld [vmem:[%s5181_s10 + $0xc0] sm:$0xff] }
 0xb28   :  { %v2689_v32 = vsel %vm2687_vm15, %v2688_v28, %v2686_v29 }
 0xb29   :  { %3442 = vrsqrt.f32 %v2689_v32  ;;  %v2693_v2 = vsel %vm2692_vm0, %v2682_v55, %v2691_v34  ;;  %vm2699_vm2 = vcmp.eq.f32.partialorder %v2689_v32, inf  ;;  %v2702_v3 = vand.u32 2147483648, %v2689_v32 }
 0xb2a   :  { %v2696_v16 = vsel %vm2694_vm1, %v2695_v56, %v2693_v2  ;;  %vm2701_vm3 = vcmp.eq.f32.partialorder %v2689_v32, 0.0  ;;  %v2798_v55 = vrot.slane %v4839_v25, %v4088_v42  ;;  %v2873_v61 = vmul.f32 %v2868_v27, %v2864_v60  ;;  %v3001_v27 = vld [vmem:[%s5181_s10 + $0x40] sm:$0xff] }
 0xb2b   :  { %3444 = vrsqrt.f32 %v2696_v16  ;;  %vm2706_vm4 = vcmp.eq.f32.partialorder %v2696_v16, inf  ;;  %v2709_v48 = vand.u32 2147483648, %v2696_v16  ;;  %vm2708_vm5 = vcmp.eq.f32.partialorder %v2696_v16, 0.0 }
 0xb2c   :  { %v2803_v34 = vmul.f32 %v2798_v55, %v2794_v9  ;;  %v3000_v55 = vld [vmem:[%s5181_s10 + $0x38] sm:$0xff] }
 0xb36   :  { %v3443_v12 = vpop.eup %3442 }
 0xb37   :  { %v2698_v31 = vmul.f32 %v3443_v12, %v2689_v32 }
 0xb38   :  { %v3445_v43 = vpop.eup %3444 }
 0xb39   :  { %v2700_v20 = vsel %vm2699_vm2, %v2689_v32, %v2698_v31  ;;  %v2705_v57 = vmul.f32 %v3445_v43, %v2696_v16 }
 0xb3a   :  { %v2703_v19 = vsel %vm2701_vm3, %v2702_v3, %v2700_v20 }
 0xb3b   :  { %v3316_v47 = vadd.f32 -1.0, %v2703_v19  ;;  %v2707_v6 = vsel %vm2706_vm4, %v2696_v16, %v2705_v57  ;;  %v3007_v57 = vld [vmem:[%s5181_s10 + $0x70] sm:$0xff] }
 0xb3c   :  { %v2710_v59 = vsel %vm2708_vm5, %v2709_v48, %v2707_v6  ;;  %v2842_v48 = vrot.slane %v4851_v54, %v4207_v4 }
 0xb3d   :  { %v2726_v30 = vmul.f32 %v3316_v47, %v2719_v63  ;;  %v3317_v49 = vadd.f32 -1.0, %v2710_v59  ;;  %v3024_v63 = vld [vmem:[%s5181_s10 + $0xf8] sm:$0xff]  ;;  %v3022_v47 = vld [vmem:[%s5181_s10 + $0xe8] sm:$0xff]  ;;  %v3021_v59 = vld [vmem:[%s5181_s10 + $0xe0] sm:$0xff] }
 0xb3e   :  { %3325 = vmatprep.subr.mxu1 %v3024_v63  ;;  %v2995_v63 = vld [vmem:[%s5181_s10 + $0x10] sm:$0xff] }
 0xb3f   :  { %v2728_v0 = vadd.f32 1.0, %v2726_v30  ;;  %v2727_v46 = vmul.f32 %v3317_v49, %v2723_v24  ;;  %v3006_v24 = vld [vmem:[%s5181_s10 + $0x68] sm:$0xff]  ;;  %v3020_v49 = vld [vmem:[%s5181_s10 + $0xd8] sm:$0xff] }
 0xb41   :  { %3446 = vrcp.f32 %v2728_v0  ;;  %v2729_v35 = vadd.f32 1.0, %v2727_v46  ;;  %v3004_v46 = vld [vmem:[%s5181_s10 + $0x58] sm:$0xff] }
 0xb43   :  { %3448 = vrcp.f32 %v2729_v35  ;;  %v3019_v35 = vld [vmem:[%s5181_s10 + $0xd0] sm:$0xff] }
 0xb4e   :  { %v3447_v17 = vpop.eup %3446 }
 0xb4f   :  { %v2731_v28 = vmul.f32 %v3447_v17, %v4900_v13  ;;  %v2802_v13 = vrot.slane %v4851_v54, %v4088_v42  ;;  %v2832_v42 = vsel %vm734_vm8, %v4841_v33, %v4797_v38  ;;  %v2838_v33 = vrot.slane %v4839_v25, %v4207_v4  ;;  %v3005_v4 = vld [vmem:[%s5181_s10 + $0x60] sm:$0xff] }
 0xb50   :  { %v3449_v29 = vpop.eup %3448 }
 0xb51   :  { %v2875_v32 = vmul.f32 %v2873_v61, %v2731_v28  ;;  %v4934_v56 = vmul.f32 %v3449_v29, %v4902_v58  ;;  %v4937_v2 = vmul.f32 %v4886_v44, %v2731_v28  ;;  %v4940_v16 = vmul.f32 %v4888_v45, %v2731_v28 }
 0xb52   :  { %v4943_v12 = vmul.f32 %v4884_v5, %v2731_v28  ;;  %v4950_v37 = vmul.f32 %v4898_v15, %v2731_v28  ;;  %v2805_v58 = vmul.f32 %v2803_v34, %v2731_v28 }
 0xb53   :  { %2947 = vrot.lane.b32.xlu1 %v2875_v32, %s3802_s29  ;;  %2944 = vrot.lane.b32.xlu0 %v2875_v32, %s3812_s24  ;;  %v4954_v44 = vmul.f32 %v4890_v36, %v4934_v56  ;;  %v4958_v45 = vmul.f32 %v4892_v53, %v4934_v56  ;;  %v4962_v5 = vmul.f32 %v4894_v51, %v4934_v56 }
 0xb54   :  { %v4966_v31 = vmul.f32 %v4896_v50, %v4934_v56  ;;  %v2804_v36 = vmul.f32 %v2802_v13, %v2794_v9  ;;  %v2872_v53 = vrot.slane %v4851_v54, %v4085_v40  ;;  %v2833_v51 = vsel %vm736_vm9, %v2832_v42, %v4829_v18  ;;  %v3015_v13 = vld [vmem:[%s5181_s10 + $0xb0] sm:$0xff]  ;;  %v3014_v42 = vld [vmem:[%s5181_s10 + $0xa8] sm:$0xff] }
 0xb55   :  { %v2762_v50 = vsel %vm734_vm8, %v4843_v10, %v4801_v26  ;;  %v2834_v40 = vsel %vm738_vm10, %v2833_v51, %v4827_v52  ;;  %v2768_v10 = vrot.slane %v4839_v25, %v4034_v41  ;;  %v3008_v25 = vld [vmem:[%s5181_s10 + $0x78] sm:$0xff] }
 0xb56   :  { %v2806_v15 = vmul.f32 %v2804_v36, %v4934_v56  ;;  %v2874_v38 = vmul.f32 %v2872_v53, %v2864_v60  ;;  %v2763_v18 = vsel %vm736_vm9, %v2762_v50, %v4820_v8  ;;  %v2843_v26 = vmul.f32 %v2838_v33, %v2834_v40  ;;  %3326 = vmatpush3.msra.mxu1 %v3008_v25  ;;  %v3016_v60 = vld [vmem:[%s5181_s10 + $0xb8] sm:$0xff]  ;;  %v3013_v33 = vld [vmem:[%s5181_s10 + $0xa0] sm:$0xff] }
 0xb57   :  { %2903 = vrot.lane.b32.xlu1 %v2805_v58, %s3802_s29  ;;  %2900 = vrot.lane.b32.xlu0 %v2805_v58, %s3812_s24  ;;  %v2764_v43 = vsel %vm738_vm10, %v2763_v18, %v4818_v14  ;;  %v2772_v8 = vrot.slane %v4851_v54, %v4034_v41  ;;  %v3023_v14 = vld [vmem:[%s5181_s10 + $0xf0] sm:$0xff]  ;;  %v2844_v54 = vmul.f32 %v2842_v48, %v2834_v40  ;;  %v2994_v48 = vld [vmem:[%s5181_s10 + $0x8] sm:$0xff] }
 0xb58   :  { %v2876_v3 = vmul.f32 %v2874_v38, %v4934_v56  ;;  %v2845_v20 = vmul.f32 %v2843_v26, %v2731_v28  ;;  %v2773_v52 = vmul.f32 %v2768_v10, %v2764_v43  ;;  %3327 = vmatprep.subr.mxu1 %v3023_v14  ;;  %v2999_v58 = vld [vmem:[%s5181_s10 + $0x30] sm:$0xff]  ;;  %v3010_v14 = vld [vmem:[%s5181_s10 + $0x88] sm:$0xff] }
 0xb59   :  { %v2774_v6 = vmul.f32 %v2772_v8, %v2764_v43  ;;  %3328 = vmatpush3.msra.mxu1 %v3007_v57  ;;  %v2846_v0 = vmul.f32 %v2844_v54, %v4934_v56  ;;  %v3012_v43 = vld [vmem:[%s5181_s10 + $0x98] sm:$0xff] }
 0xb5a   :  { %v2775_v19 = vmul.f32 %v2773_v52, %v2731_v28  ;;  %3329 = vmatprep.subr.mxu1 %v3022_v47  ;;  %v2996_v8 = vld [vmem:[%s5181_s10 + $0x18] sm:$0xff] }
 0xb5b   :  { %2910 = vrot.lane.b32.xlu1 %v2806_v15, %s3802_s29  ;;  %2907 = vrot.lane.b32.xlu0 %v2806_v15, %s3812_s24  ;;  %v2776_v30 = vmul.f32 %v2774_v6, %v4934_v56  ;;  %v3009_v6 = vld [vmem:[%s5181_s10 + $0x80] sm:$0xff] }
 0xb5c   :  { %3330 = vmatpush3.msra.mxu1 %v3006_v24 }
 0xb5d   :  { %3331 = vmatprep.subr.mxu1 %v3021_v59 }
 0xb5e   :  { %3332 = vmatpush3.msra.mxu1 %v3005_v4 }
 0xb5f   :  { %2954 = vrot.lane.b32.xlu1 %v2876_v3, %s3802_s29  ;;  %2951 = vrot.lane.b32.xlu0 %v2876_v3, %s3812_s24  ;;  %v2997_v3 = vld [vmem:[%s5181_s10 + $0x20] sm:$0xff] }
 0xb60   :  { %3333 = vmatprep.subr.mxu1 %v3020_v49 }
 0xb61   :  { %3334 = vmatpush3.msra.mxu1 %v3004_v46 }
 0xb62   :  { %3335 = vmatprep.subr.mxu1 %v3019_v35 }
 0xb63   :  { %2925 = vrot.lane.b32.xlu1 %v2845_v20, %s3802_s29  ;;  %2922 = vrot.lane.b32.xlu0 %v2845_v20, %s3812_s24 }
 0xb64   :  { %3336 = vmatpush3.msra.mxu1 %v3003_v23 }
 0xb65   :  { %3337 = vmatprep.subr.mxu1 %v3018_v22 }
 0xb66   :  { %3338 = vmatpush3.msra.mxu1 %v3002_v7 }
 0xb67   :  { %2881 = vrot.lane.b32.xlu1 %v2775_v19, %s3802_s29  ;;  %2878 = vrot.lane.b32.xlu0 %v2775_v19, %s3812_s24 }
 0xb68   :  { %3339 = vmatprep.subr.mxu1 %v3017_v11 }
 0xb69   :  { %3340 = vmatpush3.msra.mxu1 %v3001_v27 }
 0xb6a   :  { %3341 = vmatprep.subr.mxu1 %v3016_v60 }
 0xb6b   :  { %2888 = vrot.lane.b32.xlu1 %v2776_v30, %s3802_s29  ;;  %2885 = vrot.lane.b32.xlu0 %v2776_v30, %s3812_s24 }
 0xb6c   :  { %3342 = vmatpush3.msra.mxu1 %v3000_v55 }
 0xb6d   :  { %3343 = vmatprep.subr.mxu1 %v3015_v13 }
 0xb6e   :  { %3344 = vmatpush3.msra.mxu1 %v2999_v58 }
 0xb6f   :  { %2932 = vrot.lane.b32.xlu1 %v2846_v0, %s3802_s29  ;;  %2929 = vrot.lane.b32.xlu0 %v2846_v0, %s3812_s24 }
 0xb70   :  { %3345 = vmatprep.subr.mxu1 %v3014_v42 }
 0xbc5   :  { %v2948_v17 = vpop.permute.xlu1 %2947  ;;  %v2945_v9 = vpop.permute.xlu0 %2944 }
 0xbc6   :  { %v2957_v28 = vsel %vm734_vm8, %v2945_v9, %v2948_v17 }
 0xbc7   :  { %v2958_v61 = vsel %vm736_vm9, %v2957_v28, %v2945_v9  ;;  %v3315_v9 = vld [vmem:[%s5176_s5 + $0x6] sm:$0x3] }
 0xbc8   :  { %v2959_v29 = vsel %vm738_vm10, %v2958_v61, %v2948_v17  ;;  %v2396_v61 = vrot.slane %v3315_v9, %v4034_v41 }
 0xbc9   :  { %v2963_v32 = vadd.f32 %v2959_v29, %v4937_v2  ;;  %v2904_v34 = vpop.permute.xlu1 %2903  ;;  %v2901_v56 = vpop.permute.xlu0 %2900  ;;  %v2998_v2 = vld [vmem:[%s5181_s10 + $0x28] sm:$0xff] }
 0xbca   :  { %v2913_v36 = vsel %vm734_vm8, %v2901_v56, %v2904_v34  ;;  %3346 = vmatpush3.msra.mxu1 %v2998_v2  ;;  %v2392_v2 = vrot.slane %v3315_v9, %v4028_v39 }
 0xbcb   :  { %2976 = vrot.lane.b32.xlu1 %v2963_v32, %s3811_s3  ;;  %v2914_v50 = vsel %vm736_vm9, %v2913_v36, %v2901_v56  ;;  %3347 = vmatprep.subr.mxu1 %v3013_v33  ;;  %v2468_v36 = vadd.f32 %v4910_v62, %v2396_v61  ;;  %v3105_v62 = vld [vmem:[#allocation12 + $0x18] sm:$0xff] }
 0xbcc   :  { %3348 = vmatpush3.msra.mxu1 %v2997_v3  ;;  %v2915_v20 = vsel %vm738_vm10, %v2914_v50, %v2904_v34  ;;  %v2466_v33 = vadd.f32 %v4908_v21, %v2392_v2  ;;  %3368 = vmatpush3.msra.mxu0 %v3105_v62  ;;  %v3102_v21 = vld [vmem:[#allocation12] sm:$0xff] }
 0xbcd   :  { %v2911_v53 = vpop.permute.xlu1 %2910  ;;  %v2908_v15 = vpop.permute.xlu0 %2907  ;;  %3349 = vmatprep.subr.mxu1 %v3012_v43  ;;  %v2919_v57 = vadd.f32 %v2915_v20, %v4940_v16  ;;  %v2993_v16 = vld [vmem:[%s5181_s10] sm:$0xff]  ;;  %3369 = vmatprep.subr.mxu0 %v3810_v1 }
 0xbce   :  { %v2916_v51 = vsel %vm734_vm8, %v2908_v15, %v2911_v53  ;;  %3350 = vmatpush3.msra.mxu1 %v2996_v8  ;;  %v3104_v20 = vld [vmem:[#allocation12 + $0x10] sm:$0xff] }
 0xbcf   :  { %v2917_v38 = vsel %vm736_vm9, %v2916_v51, %v2908_v15  ;;  %3370 = vmatpush3.msra.mxu0 %v3104_v20 }
 0xbd0   :  { %v2918_v40 = vsel %vm738_vm10, %v2917_v38, %v2911_v53  ;;  %3371 = vmatprep.subr.mxu0 %v3810_v1 }
 0xbd1   :  { %v2920_v18 = vadd.f32 %v2918_v40, %v4954_v44  ;;  %v2955_v26 = vpop.permute.xlu1 %2954  ;;  %v2952_v10 = vpop.permute.xlu0 %2951  ;;  %v3011_v44 = vld [vmem:[%s5181_s10 + $0x90] sm:$0xff] }
 0xbd2   :  { %v2960_v52 = vsel %vm734_vm8, %v2952_v10, %v2955_v26  ;;  %3351 = vmatprep.subr.mxu1 %v3011_v44 }
 0xbd3   :  { %v2961_v25 = vsel %vm736_vm9, %v2960_v52, %v2952_v10  ;;  %2970 = vrot.lane.b32.xlu0 %v2920_v18, %s3811_s3  ;;  %3352 = vmatpush3.msra.mxu1 %v2995_v63 }
 0xbd4   :  { %v2962_v19 = vsel %vm738_vm10, %v2961_v25, %v2955_v26  ;;  %3353 = vmatprep.subr.mxu1 %v3010_v14 }
 0xbd5   :  { %v2964_v47 = vadd.f32 %v2962_v19, %v4958_v45  ;;  %3354 = vmatpush3.msra.mxu1 %v2994_v48  ;;  %v2926_v45 = vpop.permute.xlu1 %2925  ;;  %v2923_v24 = vpop.permute.xlu0 %2922 }
 0xbd6   :  { %3355 = vmatprep.subr.mxu1 %v3009_v6  ;;  %v2935_v49 = vsel %vm734_vm8, %v2923_v24, %v2926_v45 }
 0xbd7   :  { %2980 = vrot.lane.b32.xlu1 %v2964_v47, %s3811_s3  ;;  %2966 = vrot.lane.b32.xlu0 %v2919_v57, %s3811_s3  ;;  %v2936_v23 = vsel %vm736_vm9, %v2935_v49, %v2923_v24  ;;  %v3194_v57 = vld [vmem:[#allocation2] sm:$0x1]  ;;  %v3814_v47 = vmov 0  }
 0xbd8   :  { %3356 = vmatpush3.msra.mxu1 %v2993_v16  ;;  %v2937_v27 = vsel %vm738_vm10, %v2936_v23, %v2926_v45  ;;  %3401 = vset.pattern.permute.xlu0 %v3814_v47 }
 0xbd9   :  { %3378 = vmatprep.subr.mxu1 %v3810_v1  ;;  %v2882_v30 = vpop.permute.xlu1 %2881  ;;  %v2879_v59 = vpop.permute.xlu0 %2878  ;;  %v2941_v29 = vadd.f32 %v2937_v27, %v4943_v12 }
 0xbda   :  { %v2891_v7 = vsel %vm734_vm8, %v2879_v59, %v2882_v30 }
 0xbdb   :  { %v2892_v55 = vsel %vm736_vm9, %v2891_v7, %v2879_v59  ;;  %3197 = vperm.xlu0 %3401, %v3194_v57  }
 0xbdc   :  { %v2893_v13 = vsel %vm738_vm10, %v2892_v55, %v2882_v30 }
 0xbdd   :  { %v2889_v4 = vpop.permute.xlu1 %2888  ;;  %v2886_v54 = vpop.permute.xlu0 %2885  ;;  %v2897_v41 = vadd.f32 %v2893_v13, %v4950_v37  ;;  %v3103_v37 = vld [vmem:[#allocation12 + $0x8] sm:$0xff] }
 0xbde   :  { %v2894_v0 = vsel %vm734_vm8, %v2886_v54, %v2889_v4  ;;  %3372 = vmatpush3.msra.mxu0 %v3103_v37 }
 0xbdf   :  { %v2895_v22 = vsel %vm736_vm9, %v2894_v0, %v2886_v54  ;;  %3373 = vmatprep.subr.mxu0 %v3810_v1  ;;  %v3193_v54 = vld [vmem:[%s5184_s13] sm:$0x1]  ;;  %s3768_s13 = scalar_lea.vmem %s3292_s22, 16 }
 0xbe0   :  { %v2896_v60 = vsel %vm738_vm10, %v2895_v22, %v2889_v4  ;;  %3374 = vmatpush3.msra.mxu0 %v3102_v21  ;;  %p3769_p2 = scmp.ne.s32.totalorder %s3292_s22, %s3768_s13  ;;  %p3774_p4 = scmp.lt.s32.totalorder %s3772_s8, %s3768_s13 }
 0xbe1   :  { %v2933_v46 = vpop.permute.xlu1 %2932  ;;  %v2930_v35 = vpop.permute.xlu0 %2929  ;;  %v2898_v32 = vadd.f32 %v2896_v60, %v4962_v5 }
 0xbe2   :  { %v2938_v11 = vsel %vm734_vm8, %v2930_v35, %v2933_v46  ;;  %p3775_p5 = por %p3774_p4, %p3773_p3 }
 0xbe3   :  { %v2939_v17 = vsel %vm736_vm9, %v2938_v11, %v2930_v35  ;;  %vm3813_vm9 = vmmov 0   ;;  %v3280_v35 = vld [vmem:[%s5172_s1] sm:$0x1] }
 0xbe4   :  { %v2940_v56 = vsel %vm738_vm10, %v2939_v17, %v2933_v46  ;;  %3375 = vmatprep.mubr.msk.f32.mxu0 %vm3813_vm9, %v3810_v1  ;;  %p3776_p6 = pnand %p3775_p5, %p3769_p2 }
 0xbe5   :  { %v2942_v15 = vadd.f32 %v2940_v56, %v4966_v31 }
 0xc3d   :  { %v2977_v28 = vpop.permute.xlu1 %2976 }
 0xc3e   :  { %v2983_v58 = vadd.f32 %v2977_v28, %v2941_v29 }
 0xc45   :  { %v2971_v34 = vpop.permute.xlu0 %2970 }
 0xc46   :  { %v2974_v42 = vadd.f32 %v2971_v34, %v2898_v32 }
 0xc48   :  { %v2986_v53 = vadd.f32 %v2983_v58, %v2974_v42 }
 0xc49   :  { %v2981_v51 = vpop.permute.xlu1 %2980  ;;  %v2967_v12 = vpop.permute.xlu0 %2966 }
 0xc4a   :  { %v2988_v50 = vadd.f32 %v2986_v53, %v2468_v36  ;;  %v2984_v5 = vadd.f32 %v2981_v51, %v2942_v15  ;;  %v2973_v38 = vadd.f32 %v2967_v12, %v2897_v41 }
 0xc4c   :  { %v2985_v40 = vadd.f32 %v2984_v5, %v2973_v38  ;;  %v2990_v3 = vmul.f32 0.70710677, %v2988_v50 }
 0xc4e   :  { %v2987_v18 = vadd.f32 %v2985_v40, %v2466_v33  ;;  %v2992_v26 = vmul.f32 %v2990_v3, %v2990_v3 }
 0xc50   :  { %v2989_v10 = vmul.f32 0.70710677, %v2987_v18  ;;  %3089 = vmatprep.mubr.f32.mxu1 %v2992_v26 }
 0xc52   :  { %v2991_v43 = vmul.f32 %v2989_v10, %v2989_v10 }
 0xc54   :  { %3090 = vmatmul.mubr.f32.vlgmr.msra.gmra.mxu1 %v2991_v43 }
 0xc55   :  { %3380 = vmatprep.mubr.msk.f32.mxu1 %vm3813_vm9, %v3810_v1  ;;  %v3320_v1 = vld [vmem:[%s5183_s12] ss:$0 sm:$0xff] }
 0xc56   :  { %v3198_v49 = vpop.permute.xlu0 %3197 }
 0xc57   :  { %v3203_v0 = vrot.slane %v3198_v49, %v4028_v39 }
 0xd14   :  { %v3357_v31 = vpop.f32.mrf.mxu1 }
 0xd16   :  { %v3358_v52 = vpop.f32.mrf.mxu1 }
 0xd17   :  { %v3359_v8 = vadd.f32 %v3358_v52, %v3357_v31 }
 0xd19   :  { %3450 = vrsqrt.f32 %v3359_v8  ;;  %vm3097_vm10 = vcmp.eq.f32.partialorder %v3359_v8, inf  ;;  %v3100_v25 = vand.u32 2147483648, %v3359_v8  ;;  %vm3099_vm6 = vcmp.eq.f32.partialorder %v3359_v8, 0.0 }
 0xd26   :  { %v3451_v44 = vpop.eup %3450 }
 0xd27   :  { %v3096_v63 = vmul.f32 %v3451_v44, %v3359_v8 }
 0xd29   :  { %v3098_v14 = vsel %vm3097_vm10, %v3359_v8, %v3096_v63 }
 0xd2a   :  { %v3101_v19 = vsel %vm3099_vm6, %v3100_v25, %v3098_v14 }
 0xd2b   :  { %3376 = vmatmul.mubr.msk.f32.vlgmr.msra.gmra.mxu0 %vm734_vm8, %v3101_v19 }
 0xdeb   :  { %v3182_v48 = vpop.f32.mrf.mxu0 }
 0xdec   :  { %v3183_v6 = vadd.f32 %v3320_v1, %v3182_v48 }
 0xded   :  { %v3377_v16 = vpop.f32.mrf.mxu0 }
 0xdee   :  { %v3322_v45 = vmul.f32 -1.442695, %v3183_v6 }
 0xdf0   :  { %3452 = vpow2.f32 %v3322_v45 }
 0xdfd   :  { %v3453_v24 = vpop.eup %3452 }
 0xdfe   :  { %v3189_v30 = vadd.f32 1.0, %v3453_v24 }
 0xe00   :  { %3454 = vrcp.f32 %v3189_v30 }
 0xe0d   :  { %v3455_v59 = vpop.eup %3454 }
 0xe0e   :  { %v3192_v4 = vmul.f32 %v3455_v59, %v3183_v6 }
 0xe10   :  { %3379 = vmatpush3.xpose.msk.msra.mxu1 %vm734_vm8, %v3192_v4 }
 0xe13   :  { %3381 = vmatmul.mubr.msk.f32.vlgmr.msra.gmra.mxu1 %vm734_vm8, %v3193_v54 }
 0xed3   :  { %v3276_v46 = vpop.f32.mrf.mxu1 }
 0xed4   :  { %v3277_v23 = vadd.f32 %v3276_v46, %v3203_v0 }
 0xed5   :  { %v3382_v22 = vpop.f32.mrf.mxu1 }
 0xed6   :  { %v3281_v7 = vsub.f32 %v3277_v23, %v3280_v35 }
 0xed8   :  { %v3282_v11 = vmul.f32 %v3281_v7, %v3281_v7 }
 0xeda   :  { %3284 = vst.msk [vmem:[#allocation14] sm:$0x1] %vm3283_vm7, %v3282_v11 }
 0xedb   :  { %3779 = shalt.err (!%p3776_p6)
}
 0xedc   :  { %3294 = dma.vmem_to_hbm [thread:$0]  %s3292_s22, 16, %s5186_s15, [#allocation5]  }
 0xedd   :  { %3796 = dma.done.wait [#allocation5], 16  }
 0xede   :  { %3797 = vsyncadd [#allocation5], 4294967280 }
 0xedf   :  { %3298 = vsyncpa [#allocation4], 1 }
 0xee0   :  { %3299 = vsyncpa [#allocation7], 1 }
 0xee1   :  { %3300 = vsyncpa [#allocation10], 1 }
 0xee2   :  { %3301 = vsyncpa [#allocation13], 1 }
 0xee3   :  { %3302 = vsyncpa [#allocation5], 1 }

</bundles_post_ra>
